<compile_context>
chip_gen: v7x
topology: tpu7x:2x2x1
jax: 0.10.0
libtpu: 0.0.40
codegen_flags: <defaults>
</compile_context>

<pallas_src>
import functools

import jax
import jax.numpy as jnp
from jax.experimental import pallas as pl
from jax.experimental.pallas import tpu as pltpu


def _lengths_mlp_kernel(feat_ref, len_ref, w1a_ref, w1b_ref, b1_ref,
                        w2_ref, b2_ref, out_ref):
    n_sets = len_ref.shape[1]  # static

    # Main contraction over d_model on the MXU, f32 accumulation.
    h = jnp.dot(feat_ref[...], w1a_ref[...],
                preferred_element_type=jnp.float32)               # (tm, F)

    # Lengths contraction: K = n_coord_sets is tiny, so keep it off the MXU
    # and do it as a few broadcast multiply-adds on the VPU (f32).
    lengths = len_ref[...].astype(jnp.float32)                     # (tm, S)
    w1b = w1b_ref[...].astype(jnp.float32)                         # (S, F)
    for s in range(n_sets):
        h = h + lengths[:, s:s + 1] * w1b[s:s + 1, :]

    h = h + b1_ref[...]                                            # (tm, F)
    h = h * jax.nn.sigmoid(h)                                      # SiLU (EUP)

    # Second linear on the MXU (cast operand to the weight compute dtype so a
    # bf16 weight path actually runs bf16 on the MXU), f32 accumulation.
    y = jnp.dot(h.astype(w2_ref.dtype), w2_ref[...],
                preferred_element_type=jnp.float32) + b2_ref[...]
    out_ref[...] = y.astype(out_ref.dtype)


def _choose_row_tile(M):
    """Largest tile in {512..8} dividing M, preferring >=2 grid steps."""
    candidates = (512, 256, 128, 64, 32, 16, 8)
    for t in candidates:
        if M % t == 0 and M // t >= 2:
            return t
    for t in candidates:
        if M % t == 0:
            return t
    # No divisor >= 8: fall back to a padded tile.
    return 256 if M > 256 else max(8, -(-M // 8) * 8)


@functools.partial(jax.jit, static_argnames=("tm", "compute_dtype"))
def lengths_mlp(coord_sets, node_feats, w1, b1, w2, b2, *,
                tm=None, compute_dtype=jnp.float32):
    """coord_sets: [B, S, N, 3], node_feats: [B, N, D].

    w1: [D+S, F], b1: [F], w2: [F, D], b2: [D]  (already in x @ W layout).
    compute_dtype: dtype of the MXU matmul operands (accumulation stays f32).
    Returns: [B, N, D]
    """
    B, S, N, _ = coord_sets.shape
    _, _, D = node_feats.shape
    F = w1.shape[1]
    M = B * N

    if tm is None:
        tm = _choose_row_tile(M)
    m_pad = -(-M // tm) * tm   # round M up to a multiple of the row tile

    # Lengths computed in the wrapper: the norm fuses into the transpose copy
    # XLA performs anyway, and the kernel never touches the 3-wide xyz axis.
    lengths = jnp.sqrt(
        jnp.sum(jnp.square(coord_sets.astype(jnp.float32)), axis=-1))  # [B,S,N]
    lengths = jnp.moveaxis(lengths, 1, -1).reshape(M, S)               # [M,S]

    feats = node_feats.reshape(M, D).astype(compute_dtype)             # [M,D]

    if m_pad != M:
        feats = jnp.pad(feats, ((0, m_pad - M), (0, 0)))
        lengths = jnp.pad(lengths, ((0, m_pad - M), (0, 0)))

    w1a = w1[:D, :].astype(compute_dtype)     # [D, F] -> node feats (MXU)
    w1b = w1[D:, :].astype(jnp.float32)       # [S, F] -> lengths (VPU)
    w2c = w2.astype(compute_dtype)            # [F, D]
    b1_2d = b1.reshape(1, F).astype(jnp.float32)
    b2_2d = b2.reshape(1, D).astype(jnp.float32)

    out = pl.pallas_call(
        _lengths_mlp_kernel,
        out_shape=jax.ShapeDtypeStruct((m_pad, D), node_feats.dtype),
        grid_spec=pltpu.PrefetchScalarGridSpec(
            num_scalar_prefetch=0,
            grid=(m_pad // tm,),
            in_specs=[
                pl.BlockSpec((tm, D), lambda i: (i, 0)),   # node feat tile
                pl.BlockSpec((tm, S), lambda i: (i, 0)),   # lengths tile
                pl.BlockSpec((D, F), lambda i: (0, 0)),    # W1a (resident)
                pl.BlockSpec((S, F), lambda i: (0, 0)),    # W1b (resident)
                pl.BlockSpec((1, F), lambda i: (0, 0)),    # b1
                pl.BlockSpec((F, D), lambda i: (0, 0)),    # W2 (resident)
                pl.BlockSpec((1, D), lambda i: (0, 0)),    # b2
            ],
            out_specs=pl.BlockSpec((tm, D), lambda i: (i, 0)),
        ),
        compiler_params=pltpu.CompilerParams(
            dimension_semantics=("parallel",),
        ),
    )(feats, lengths, w1a, w1b, b1_2d, w2c, b2_2d)

    if m_pad != M:
        out = out[:M]
    return out.reshape(B, N, D)


def _reference(coord_sets, node_feats, w1, b1, w2, b2):
    lengths = jnp.linalg.norm(coord_sets, axis=-1)        # [B, S, N]
    lengths = jnp.moveaxis(lengths, 1, -1)                # [B, N, S]
    x = jnp.concatenate([node_feats, lengths], axis=2)    # [B, N, D+S]
    h = x @ w1 + b1
    h = h * jax.nn.sigmoid(h)
    return h @ w2 + b2


if __name__ == "__main__":
    # Small shapes consistent with the module's forward; M = B*N = 512 gives
    # a 2-step grid at tm=256 (even split across v7x's two TensorCores).
    B, S, N, D = 2, 4, 256, 128     # batch, n_coord_sets, n_nodes, d_model
    F = 4 * D                       # d_ff default = 4 * d_model

    key = jax.random.PRNGKey(0)
    k_c, k_f, k_w1, k_b1, k_w2, k_b2 = jax.random.split(key, 6)

    coord_sets = jax.random.normal(k_c, (B, S, N, 3), dtype=jnp.float32)
    node_feats = jax.random.normal(k_f, (B, N, D), dtype=jnp.float32)

    # Deterministic synthetic parameters (Linear layers, stored as x @ W + b).
    w1 = jax.random.normal(k_w1, (D + S, F), dtype=jnp.float32) * (1.0 / jnp.sqrt(D + S))
    b1 = jax.random.normal(k_b1, (F,), dtype=jnp.float32) * 0.01
    w2 = jax.random.normal(k_w2, (F, D), dtype=jnp.float32) * (1.0 / jnp.sqrt(F))
    b2 = jax.random.normal(k_b2, (D,), dtype=jnp.float32) * 0.01

    ref = _reference(coord_sets, node_feats, w1, b1, w2, b2)

    # Full-precision path (v5e-friendly): tight tolerance vs reference.
    out_f32 = lengths_mlp(coord_sets, node_feats, w1, b1, w2, b2,
                          compute_dtype=jnp.float32)
    out_f32 = jax.block_until_ready(out_f32)
    assert out_f32.shape == (B, N, D)
    assert jnp.allclose(out_f32, ref, atol=1e-4, rtol=1e-4), "f32 mismatch vs reference"

    # bf16 MXU-operand path (v6e/v7x fast path): f32 accumulation keeps it
    # close to the f32 reference, checked with a bf16-appropriate tolerance.
    out_bf16 = lengths_mlp(coord_sets, node_feats, w1, b1, w2, b2,
                           compute_dtype=jnp.bfloat16)
    out_bf16 = jax.block_until_ready(out_bf16)
    assert out_bf16.shape == (B, N, D)
    assert jnp.allclose(out_bf16, ref, atol=5e-2, rtol=5e-2), "bf16 mismatch vs reference"

    print("KERNEL_OK")
</pallas_src>

<mosaic_0001>
module attributes {stable_mosaic.version = 11 : i64} {
  func.func @_lengths_mlp_kernel(%arg0: i32, %arg1: memref<256x128xf32, #tpu.memory_space<vmem>>, %arg2: memref<256x4xf32, #tpu.memory_space<vmem>>, %arg3: memref<128x512xf32, #tpu.memory_space<vmem>>, %arg4: memref<4x512xf32, #tpu.memory_space<vmem>>, %arg5: memref<1x512xf32, #tpu.memory_space<vmem>>, %arg6: memref<512x128xf32, #tpu.memory_space<vmem>>, %arg7: memref<1x128xf32, #tpu.memory_space<vmem>>, %arg8: memref<256x128xf32, #tpu.memory_space<vmem>>) attributes {dimension_semantics = [#tpu.dimension_semantics<parallel>], iteration_bounds = array<i64: 2>, scalar_prefetch = 0 : i64, scratch_operands = 0 : i64, tpu.core_type = #tpu.core_type<tc>, window_params = [{transform_indices = @transform_0, window_bounds = array<i64: 256, 128>}, {transform_indices = @transform_1, window_bounds = array<i64: 256, 4>}, {pipeline_mode = #tpu.pipeline_mode<synchronous>, transform_indices = @transform_2, window_bounds = array<i64: 128, 512>}, {pipeline_mode = #tpu.pipeline_mode<synchronous>, transform_indices = @transform_3, window_bounds = array<i64: 4, 512>}, {pipeline_mode = #tpu.pipeline_mode<synchronous>, transform_indices = @transform_4, window_bounds = array<i64: 1, 512>}, {pipeline_mode = #tpu.pipeline_mode<synchronous>, transform_indices = @transform_5, window_bounds = array<i64: 512, 128>}, {pipeline_mode = #tpu.pipeline_mode<synchronous>, transform_indices = @transform_6, window_bounds = array<i64: 1, 128>}, {transform_indices = @transform_7, window_bounds = array<i64: 256, 128>}]} {
    %c0 = arith.constant 0 : index
    %c0_0 = arith.constant 0 : index
    %0 = vector.load %arg1[%c0, %c0_0] : memref<256x128xf32, #tpu.memory_space<vmem>>, vector<256x128xf32>
    %c0_1 = arith.constant 0 : index
    %c0_2 = arith.constant 0 : index
    %1 = vector.load %arg3[%c0_1, %c0_2] : memref<128x512xf32, #tpu.memory_space<vmem>>, vector<128x512xf32>
    %cst = arith.constant dense<0.000000e+00> : vector<256x512xf32>
    %2 = tpu.matmul %0, %1, %cst {dimension_numbers = #tpu.dot_dimension_numbers<[1], [0], [0], [1], [0, 0, 1, 1], [], []>} : vector<256x128xf32>, vector<128x512xf32>, vector<256x512xf32> -> vector<256x512xf32>
    %c0_3 = arith.constant 0 : index
    %c0_4 = arith.constant 0 : index
    %3 = vector.load %arg2[%c0_3, %c0_4] : memref<256x4xf32, #tpu.memory_space<vmem>>, vector<256x4xf32>
    %c0_5 = arith.constant 0 : index
    %c0_6 = arith.constant 0 : index
    %4 = vector.load %arg4[%c0_5, %c0_6] : memref<4x512xf32, #tpu.memory_space<vmem>>, vector<4x512xf32>
    %5 = vector.extract_strided_slice %3 {offsets = [0, 0], sizes = [256, 1], strides = [1, 1]} : vector<256x4xf32> to vector<256x1xf32>
    %6 = vector.extract_strided_slice %4 {offsets = [0, 0], sizes = [1, 512], strides = [1, 1]} : vector<4x512xf32> to vector<1x512xf32>
    %7 = vector.broadcast %5 : vector<256x1xf32> to vector<256x512xf32>
    %8 = vector.broadcast %6 : vector<1x512xf32> to vector<256x512xf32>
    %9 = arith.mulf %7, %8 : vector<256x512xf32>
    %10 = arith.addf %2, %9 : vector<256x512xf32>
    %11 = vector.extract_strided_slice %3 {offsets = [0, 1], sizes = [256, 1], strides = [1, 1]} : vector<256x4xf32> to vector<256x1xf32>
    %12 = vector.extract_strided_slice %4 {offsets = [1, 0], sizes = [1, 512], strides = [1, 1]} : vector<4x512xf32> to vector<1x512xf32>
    %13 = vector.broadcast %11 : vector<256x1xf32> to vector<256x512xf32>
    %14 = vector.broadcast %12 : vector<1x512xf32> to vector<256x512xf32>
    %15 = arith.mulf %13, %14 : vector<256x512xf32>
    %16 = arith.addf %10, %15 : vector<256x512xf32>
    %17 = vector.extract_strided_slice %3 {offsets = [0, 2], sizes = [256, 1], strides = [1, 1]} : vector<256x4xf32> to vector<256x1xf32>
    %18 = vector.extract_strided_slice %4 {offsets = [2, 0], sizes = [1, 512], strides = [1, 1]} : vector<4x512xf32> to vector<1x512xf32>
    %19 = vector.broadcast %17 : vector<256x1xf32> to vector<256x512xf32>
    %20 = vector.broadcast %18 : vector<1x512xf32> to vector<256x512xf32>
    %21 = arith.mulf %19, %20 : vector<256x512xf32>
    %22 = arith.addf %16, %21 : vector<256x512xf32>
    %23 = vector.extract_strided_slice %3 {offsets = [0, 3], sizes = [256, 1], strides = [1, 1]} : vector<256x4xf32> to vector<256x1xf32>
    %24 = vector.extract_strided_slice %4 {offsets = [3, 0], sizes = [1, 512], strides = [1, 1]} : vector<4x512xf32> to vector<1x512xf32>
    %25 = vector.broadcast %23 : vector<256x1xf32> to vector<256x512xf32>
    %26 = vector.broadcast %24 : vector<1x512xf32> to vector<256x512xf32>
    %27 = arith.mulf %25, %26 : vector<256x512xf32>
    %28 = arith.addf %22, %27 : vector<256x512xf32>
    %c0_7 = arith.constant 0 : index
    %c0_8 = arith.constant 0 : index
    %29 = vector.load %arg5[%c0_7, %c0_8] : memref<1x512xf32, #tpu.memory_space<vmem>>, vector<1x512xf32>
    %30 = vector.broadcast %29 : vector<1x512xf32> to vector<256x512xf32>
    %31 = arith.addf %28, %30 : vector<256x512xf32>
    %32 = arith.negf %31 : vector<256x512xf32>
    %33 = math.exp %32 : vector<256x512xf32>
    %cst_9 = arith.constant 1.000000e+00 : f32
    %34 = vector.broadcast %cst_9 : f32 to vector<256x512xf32>
    %35 = arith.addf %34, %33 : vector<256x512xf32>
    %36 = arith.divf %34, %35 : vector<256x512xf32>
    %37 = arith.mulf %31, %36 : vector<256x512xf32>
    %c0_10 = arith.constant 0 : index
    %c0_11 = arith.constant 0 : index
    %38 = vector.load %arg6[%c0_10, %c0_11] : memref<512x128xf32, #tpu.memory_space<vmem>>, vector<512x128xf32>
    %cst_12 = arith.constant dense<0.000000e+00> : vector<256x128xf32>
    %39 = tpu.matmul %37, %38, %cst_12 {dimension_numbers = #tpu.dot_dimension_numbers<[1], [0], [0], [1], [0, 0, 1, 1], [], []>} : vector<256x512xf32>, vector<512x128xf32>, vector<256x128xf32> -> vector<256x128xf32>
    %c0_13 = arith.constant 0 : index
    %c0_14 = arith.constant 0 : index
    %40 = vector.load %arg7[%c0_13, %c0_14] : memref<1x128xf32, #tpu.memory_space<vmem>>, vector<1x128xf32>
    %41 = vector.broadcast %40 : vector<1x128xf32> to vector<256x128xf32>
    %42 = arith.addf %39, %41 : vector<256x128xf32>
    %c0_15 = arith.constant 0 : index
    %c0_16 = arith.constant 0 : index
    %43 = vector.load %arg8[%c0_15, %c0_16] : memref<256x128xf32, #tpu.memory_space<vmem>>, vector<256x128xf32>
    tpu.vector_store %arg8[%c0_15, %c0_16], %42 {strides = array<i32>} : memref<256x128xf32, #tpu.memory_space<vmem>>, vector<256x128xf32>,
    return
  }
  func.func @transform_0(%arg0: i32) -> (i32, i32) {
    %c0_i32 = arith.constant 0 : i32
    %c0_i32_0 = arith.constant 0 : i32
    return %arg0, %c0_i32 : i32, i32
  }
  func.func @transform_1(%arg0: i32) -> (i32, i32) {
    %c0_i32 = arith.constant 0 : i32
    %c0_i32_0 = arith.constant 0 : i32
    return %arg0, %c0_i32 : i32, i32
  }
  func.func @transform_2(%arg0: i32) -> (i32, i32) {
    %c0_i32 = arith.constant 0 : i32
    %c0_i32_0 = arith.constant 0 : i32
    %c0_i32_1 = arith.constant 0 : i32
    return %c0_i32, %c0_i32_0 : i32, i32
  }
  func.func @transform_3(%arg0: i32) -> (i32, i32) {
    %c0_i32 = arith.constant 0 : i32
    %c0_i32_0 = arith.constant 0 : i32
    %c0_i32_1 = arith.constant 0 : i32
    return %c0_i32, %c0_i32_0 : i32, i32
  }
  func.func @transform_4(%arg0: i32) -> (i32, i32) {
    %c0_i32 = arith.constant 0 : i32
    %c0_i32_0 = arith.constant 0 : i32
    %c0_i32_1 = arith.constant 0 : i32
    return %c0_i32, %c0_i32_0 : i32, i32
  }
  func.func @transform_5(%arg0: i32) -> (i32, i32) {
    %c0_i32 = arith.constant 0 : i32
    %c0_i32_0 = arith.constant 0 : i32
    %c0_i32_1 = arith.constant 0 : i32
    return %c0_i32, %c0_i32_0 : i32, i32
  }
  func.func @transform_6(%arg0: i32) -> (i32, i32) {
    %c0_i32 = arith.constant 0 : i32
    %c0_i32_0 = arith.constant 0 : i32
    %c0_i32_1 = arith.constant 0 : i32
    return %c0_i32, %c0_i32_0 : i32, i32
  }
  func.func @transform_7(%arg0: i32) -> (i32, i32) {
    %c0_i32 = arith.constant 0 : i32
    %c0_i32_0 = arith.constant 0 : i32
    return %arg0, %c0_i32 : i32, i32
  }
}

</mosaic_0001>

<bundles_post_ra>
// kernel: lengths_mlp.1
= control target key start
LH: loop header
LB: loop body
LE: loop exit
PB: predicated region body
PF: predicated region fallthrough
CT: control target
= control target key end

     0   :  { %12 = vsyncpa [#allocation3], 0  ;;  %s9709_s0 = inlined_call_operand.vmem [shape: f32[512,128], index: 0, kind: input, shape index: {}]   ;;  %s9710_s1 = inlined_call_operand.vmem [shape: f32[512,4], index: 1, kind: input, shape index: {}]   ;;  %s9711_s2 = inlined_call_operand.vmem [shape: f32[128,512], index: 2, kind: input, shape index: {}]   ;;  %s9712_s3 = inlined_call_operand.vmem [shape: f32[4,512], index: 3, kind: input, shape index: {}]   ;;  %s9713_s4 = inlined_call_operand.vmem [shape: f32[1,512], index: 4, kind: input, shape index: {}]   ;;  %s9714_s5 = inlined_call_operand.vmem [shape: f32[512,128], index: 5, kind: input, shape index: {}]   ;;  %s9715_s6 = inlined_call_operand.vmem [shape: f32[1,128], index: 6, kind: input, shape index: {}]   ;;  %s9716_s7 = inlined_call_operand.hbm [shape: f32[512,128], index: 7, kind: output, shape index: {}]  }
   0x1   :  { %14 = vsyncpa [#allocation3 + $0x1], 0  ;;  %s5345_s24 = smov 0   ;;  %s5347_s25 = smov 0  }
   0x2   :  { %s5349_s26 = smov 0   ;;  %s5351_s27 = smov 0  }
   0x3 LB: > { %s5366_s28 = sadd.s32 4294967295, %s5294_s27   ;;  %s4219_s29 = sadd.s32 4294967294, %s5294_s27   ;;  %s5294_s27 = sphi %s5351_s27, %s10614_s27   ;;  %s5290_s26 = sphi %s5349_s26, %s10613_s26   ;;  %s5286_s25 = sphi %s5347_s25, %s10612_s25   ;;  %s5282_s24 = sphi %s5345_s24, %s10611_s24  }
   0x4   : > { %s5370_s30 = sadd.s32 1, %s5294_s27   ;;  %s184_s8 = sadd.s32 1, %s5290_s26 }
   0x5   : > { %s181_s9 = ssub.s32 %s5294_s27, %s5370_s30  ;;  %p194_p0 = scmp.ne.s32.totalorder %s5290_s26, %s5286_s25 }
   0x6   : > { %p182_p1 = scmp.eq.s32.totalorder %s181_s9, 0  ;;  %p195_p2 = scmp.eq.s32.totalorder %s5366_s28, 1 }
   0x7   : > { %p200_p3 = scmp.ne.s32.totalorder %s5286_s25, %s5282_s24  ;;  %p201_p4 = scmp.eq.s32.totalorder %s4219_s29, 1 }
   0x8   : > { %s5381_s10 = scalar_select %p182_p1, %s5290_s26, %s184_s8  }
   0x9   : > { %p5383_p5 = por %p195_p2, %p194_p0  ;;  %p5387_p6 = por %p201_p4, %p200_p3 }
   0xa   : > { %p4222_p7 = scmp.ge.s32.totalorder %s5294_s27, 1  ;;  %p252_p8 = scmp.lt.s32.totalorder %s5294_s27, 3 }
   0xc   : > { %p253_p9 = pnand %p4222_p7, %p252_p8 }
   0xe   : > { %256 = sbr.rel (%p253_p9) target bundleno = 967 (0x3c7), region = 48 }
  0x15   : > { %v335_v0 = vld [vmem:[%s9711_s2 + $0x8] sm:$0xff]  ;;  %v337_v2 = vld [vmem:[%s9711_s2 + $0x18] sm:$0xff]  ;;  %s4224_s19 = sshll.u32 %s5366_s28, 5  ;;  %v334_v5 = vld [vmem:[%s9711_s2] sm:$0xff]  ;;  %v9720_v7 = vmov 0   ;;  %v9718_v8 = vmov 1  }
  0x16   : > { %v339_v1 = vld [vmem:[%s9711_s2 + $0x28] sm:$0xff]  ;;  %v341_v4 = vld [vmem:[%s9711_s2 + $0x38] sm:$0xff]  ;;  %v338_v6 = vld [vmem:[%s9711_s2 + $0x20] sm:$0xff]  ;;  %4634 = vset.pattern.permute.xlu1 %v9720_v7  ;;  %p5413_p10 = scmp.lt.s32.totalorder %s4224_s19, 63  ;;  %4641 = vset.pattern.permute.xlu0 %v9718_v8  ;;  %v5298_v14 = vmov 0.0   ;;  %s4362_s29 = sshll.u32 %s5366_s28, 12 }
  0x17   : > { %v4363_v3 = vpack.c.bf16 %v339_v1, %v335_v0  ;;  %v4395_v9 = vpack.c.bf16 %v341_v4, %v337_v2  ;;  %v4365_v10 = vpack.c.bf16 %v338_v6, %v334_v5  ;;  %v336_v11 = vld [vmem:[%s9711_s2 + $0x10] sm:$0xff]  ;;  %v343_v13 = vld [vmem:[%s9711_s2 + $0x48] sm:$0xff]  ;;  %822 = vmatprep.mubr.f32.mxu0 %v5298_v14  ;;  %1079 = vmatprep.mubr.f32.mxu1 %v5298_v14  ;;  %v345_v17 = vld [vmem:[%s9711_s2 + $0x58] sm:$0xff]  ;;  %s9661_s14 = scalar_lea.hbm %s9716_s7, %s4362_s29  ;;  %s5302_s16 = smov [#allocation2]  }
  0x18   : > { %v340_v12 = vld [vmem:[%s9711_s2 + $0x30] sm:$0xff]  ;;  %v347_v16 = vld [vmem:[%s9711_s2 + $0x68] sm:$0xff]  ;;  %v349_v18 = vld [vmem:[%s9711_s2 + $0x78] sm:$0xff]  ;;  %s10616_s19 = smov (!%p5413_p10, %s4224_s19), 63  ;;  %s5236_s17 = sshll.u32 %s5302_s16, 4  ;;  %s5237_s17 = int_to_ptr.vmem [resolvable:$false] %s5236_s17 }
  0x19   : > { %4364 = vmatprep.subr.bf16.mxu0 %v4363_v3  ;;  %v4397_v15 = vpack.c.bf16 %v340_v12, %v336_v11  ;;  %4396 = vmatprep.subr.bf16.mxu1 %v4395_v9  ;;  %v4367_v19 = vpack.c.bf16 %v347_v16, %v343_v13  ;;  %v4399_v20 = vpack.c.bf16 %v349_v18, %v345_v17  ;;  %v342_v21 = vld [vmem:[%s9711_s2 + $0x40] sm:$0xff]  ;;  %v344_v23 = vld [vmem:[%s9711_s2 + $0x50] sm:$0xff]  ;;  %s9717_s21 = sshll.u32 %s10616_s19, 3  ;;  %v351_v26 = vld [vmem:[%s9711_s2 + $0x88] sm:$0xff] }
  0x1a   : > { %4366 = vmatpush1.bf16.msra.mxu0 %v4365_v10  ;;  %v346_v22 = vld [vmem:[%s9711_s2 + $0x60] sm:$0xff]  ;;  %v348_v25 = vld [vmem:[%s9711_s2 + $0x70] sm:$0xff]  ;;  %v355_v27 = vld [vmem:[%s9711_s2 + $0xa8] sm:$0xff]  ;;  %s5466_s15 = scalar_lea.vmem %s9710_s1, %s9717_s21  ;;  %s9808_s21 = sshll.u32 %s10616_s19, 3 }
  0x1b   : > { %4398 = vmatpush1.bf16.msra.mxu1 %v4397_v15  ;;  %v4369_v24 = vpack.c.bf16 %v346_v22, %v342_v21  ;;  %4368 = vmatprep.subr.bf16.mxu0 %v4367_v19  ;;  %v4401_v28 = vpack.c.bf16 %v348_v25, %v344_v23  ;;  %v4371_v29 = vpack.c.bf16 %v355_v27, %v351_v26  ;;  %v353_v30 = vld [vmem:[%s9711_s2 + $0x98] sm:$0xff]  ;;  %v350_v32 = vld [vmem:[%s9711_s2 + $0x80] sm:$0xff]  ;;  %v5478_v33 = vld [vmem:[%s5466_s15 + $0x10] sm:$0xff]  ;;  %s5642_s18 = scalar_lea.vmem %s9709_s0, %s9808_s21  ;;  %s5238_s19 = scalar_lea.vmem %s5237_s17, 8192 }
  0x1c   : > { %4400 = vmatprep.subr.bf16.mxu1 %v4399_v20  ;;  %v357_v31 = vld [vmem:[%s9711_s2 + $0xb8] sm:$0xff]  ;;  %v354_v35 = vld [vmem:[%s9711_s2 + $0xa0] sm:$0xff]  ;;  %v352_v36 = vld [vmem:[%s9711_s2 + $0x90] sm:$0xff]  ;;  %444 = vperm.xlu1 %4634, %v5478_v33  }
  0x1d   : > { %v4403_v34 = vpack.c.bf16 %v357_v31, %v353_v30  ;;  %v4373_v37 = vpack.c.bf16 %v354_v35, %v350_v32  ;;  %v356_v38 = vld [vmem:[%s9711_s2 + $0xb0] sm:$0xff]  ;;  %v5491_v39 = vld [vmem:[%s5466_s15 + $0x18] sm:$0xff]  ;;  %v359_v40 = vld [vmem:[%s9711_s2 + $0xc8] sm:$0xff] }
  0x1e   : > { %4370 = vmatpush1.bf16.msra.mxu0 %v4369_v24  ;;  %v4405_v41 = vpack.c.bf16 %v356_v38, %v352_v36  ;;  %v363_v42 = vld [vmem:[%s9711_s2 + $0xe8] sm:$0xff]  ;;  %v361_v43 = vld [vmem:[%s9711_s2 + $0xd8] sm:$0xff]  ;;  %v358_v47 = vld [vmem:[%s9711_s2 + $0xc0] sm:$0xff] }
  0x1f   : > { %4402 = vmatpush1.bf16.msra.mxu1 %v4401_v28  ;;  %4372 = vmatprep.subr.bf16.mxu0 %v4371_v29  ;;  %v365_v44 = vld [vmem:[%s9711_s2 + $0xf8] sm:$0xff]  ;;  %v4375_v45 = vpack.c.bf16 %v363_v42, %v359_v40  ;;  %v362_v48 = vld [vmem:[%s9711_s2 + $0xe0] sm:$0xff]  ;;  %v360_v49 = vld [vmem:[%s9711_s2 + $0xd0] sm:$0xff] }
  0x20   : > { %4404 = vmatprep.subr.bf16.mxu1 %v4403_v34  ;;  %v4407_v46 = vpack.c.bf16 %v365_v44, %v361_v43  ;;  %v364_v50 = vld [vmem:[%s9711_s2 + $0xf0] sm:$0xff]  ;;  %v367_v51 = vld [vmem:[%s9711_s2 + $0x108] sm:$0xff]  ;;  %449 = vperm.xlu1 %4634, %v5491_v39   ;;  %v4377_v52 = vpack.c.bf16 %v362_v48, %v358_v47  ;;  %v369_v54 = vld [vmem:[%s9711_s2 + $0x118] sm:$0xff] }
  0x21   : > { %v371_v53 = vld [vmem:[%s9711_s2 + $0x128] sm:$0xff]  ;;  %v373_v55 = vld [vmem:[%s9711_s2 + $0x138] sm:$0xff]  ;;  %v4409_v56 = vpack.c.bf16 %v364_v50, %v360_v49  ;;  %v366_v59 = vld [vmem:[%s9711_s2 + $0x100] sm:$0xff] }
  0x22   : > { %4374 = vmatpush1.bf16.msra.mxu0 %v4373_v37  ;;  %v5531_v57 = vld [vmem:[%s5466_s15 + $0x28] sm:$0xff]  ;;  %v4379_v58 = vpack.c.bf16 %v371_v53, %v367_v51  ;;  %v370_v60 = vld [vmem:[%s9711_s2 + $0x120] sm:$0xff]  ;;  %v4411_v61 = vpack.c.bf16 %v373_v55, %v369_v54  ;;  %v368_v62 = vld [vmem:[%s9711_s2 + $0x110] sm:$0xff]  ;;  %v9722_v51 = vmov 2  }
  0x23   : > { %4406 = vmatpush1.bf16.msra.mxu1 %v4405_v41  ;;  %4376 = vmatprep.subr.bf16.mxu0 %v4375_v45  ;;  %v372_v63 = vld [vmem:[%s9711_s2 + $0x130] sm:$0xff]  ;;  %v375_v0 = vld [vmem:[%s9711_s2 + $0x148] sm:$0xff]  ;;  %v377_v2 = vld [vmem:[%s9711_s2 + $0x158] sm:$0xff]  ;;  %v4381_v4 = vpack.c.bf16 %v370_v60, %v366_v59  ;;  %v9724_v60 = vmov 3  }
  0x24   : > { %4408 = vmatprep.subr.bf16.mxu1 %v4407_v46  ;;  %v379_v1 = vld [vmem:[%s9711_s2 + $0x168] sm:$0xff]  ;;  %v381_v3 = vld [vmem:[%s9711_s2 + $0x178] sm:$0xff]  ;;  %459 = vperm.xlu1 %4634, %v5531_v57   ;;  %v4413_v6 = vpack.c.bf16 %v372_v63, %v368_v62  ;;  %v374_v10 = vld [vmem:[%s9711_s2 + $0x140] sm:$0xff] }
  0x25   : > { %v5559_v5 = vld [vmem:[%s5466_s15 + $0x38] sm:$0xff]  ;;  %v4383_v9 = vpack.c.bf16 %v379_v1, %v375_v0  ;;  %v378_v11 = vld [vmem:[%s9711_s2 + $0x160] sm:$0xff]  ;;  %v376_v12 = vld [vmem:[%s9711_s2 + $0x150] sm:$0xff]  ;;  %v4415_v13 = vpack.c.bf16 %v381_v3, %v377_v2 }
  0x26   : > { %4378 = vmatpush1.bf16.msra.mxu0 %v4377_v52  ;;  %v380_v15 = vld [vmem:[%s9711_s2 + $0x170] sm:$0xff]  ;;  %v383_v16 = vld [vmem:[%s9711_s2 + $0x188] sm:$0xff]  ;;  %v385_v18 = vld [vmem:[%s9711_s2 + $0x198] sm:$0xff]  ;;  %v4385_v20 = vpack.c.bf16 %v378_v11, %v374_v10 }
  0x27   : > { %4410 = vmatpush1.bf16.msra.mxu1 %v4409_v56  ;;  %4380 = vmatprep.subr.bf16.mxu0 %v4379_v58  ;;  %v387_v17 = vld [vmem:[%s9711_s2 + $0x1a8] sm:$0xff]  ;;  %v389_v19 = vld [vmem:[%s9711_s2 + $0x1b8] sm:$0xff]  ;;  %v4417_v22 = vpack.c.bf16 %v380_v15, %v376_v12  ;;  %v382_v24 = vld [vmem:[%s9711_s2 + $0x180] sm:$0xff] }
  0x28   : > { %4412 = vmatprep.subr.bf16.mxu1 %v4411_v61  ;;  %469 = vperm.xlu1 %4634, %v5559_v5   ;;  %v5587_v21 = vld [vmem:[%s5466_s15 + $0x48] sm:$0xff]  ;;  %v4387_v23 = vpack.c.bf16 %v387_v17, %v383_v16  ;;  %v386_v25 = vld [vmem:[%s9711_s2 + $0x1a0] sm:$0xff]  ;;  %v384_v26 = vld [vmem:[%s9711_s2 + $0x190] sm:$0xff]  ;;  %v4419_v27 = vpack.c.bf16 %v389_v19, %v385_v18  ;;  %v5301_v18 = vmov 0.0|0.0  }
  0x29   : > { %v388_v28 = vld [vmem:[%s9711_s2 + $0x1b0] sm:$0xff]  ;;  %v391_v29 = vld [vmem:[%s9711_s2 + $0x1c8] sm:$0xff]  ;;  %v393_v31 = vld [vmem:[%s9711_s2 + $0x1d8] sm:$0xff]  ;;  %v4389_v35 = vpack.c.bf16 %v386_v25, %v382_v24 }
  0x2a   : > { %4382 = vmatpush1.bf16.msra.mxu0 %v4381_v4  ;;  %v395_v30 = vld [vmem:[%s9711_s2 + $0x1e8] sm:$0xff]  ;;  %v397_v32 = vld [vmem:[%s9711_s2 + $0x1f8] sm:$0xff]  ;;  %v5614_v34 = vld [vmem:[%s5466_s15 + $0x20] sm:$0xff]  ;;  %v4421_v36 = vpack.c.bf16 %v388_v28, %v384_v26 }
  0x2b   : > { %4414 = vmatpush1.bf16.msra.mxu1 %v4413_v6  ;;  %4384 = vmatprep.subr.bf16.mxu0 %v4383_v9  ;;  %v5618_v37 = vld [vmem:[%s5466_s15 + $0x58] sm:$0xff]  ;;  %v4391_v38 = vpack.c.bf16 %v395_v30, %v391_v29  ;;  %v390_v40 = vld [vmem:[%s9711_s2 + $0x1c0] sm:$0xff]  ;;  %v4423_v42 = vpack.c.bf16 %v397_v32, %v393_v31  ;;  %v392_v43 = vld [vmem:[%s9711_s2 + $0x1d0] sm:$0xff] }
  0x2c   : > { %4416 = vmatprep.subr.bf16.mxu1 %v4415_v13  ;;  %479 = vperm.xlu1 %4634, %v5587_v21   ;;  %v394_v41 = vld [vmem:[%s9711_s2 + $0x1e0] sm:$0xff]  ;;  %v396_v44 = vld [vmem:[%s9711_s2 + $0x1f0] sm:$0xff]  ;;  %v5635_v47 = vld [vmem:[%s5466_s15 + $0x68] sm:$0xff] }
  0x2d   : > { %1289 = vperm.xlu0 %4641, %v5614_v34   ;;  %v4393_v45 = vpack.c.bf16 %v394_v41, %v390_v40  ;;  %v4425_v46 = vpack.c.bf16 %v396_v44, %v392_v43  ;;  %v302_v48 = vld [vmem:[%s5642_s18] sm:$0xff]  ;;  %v5649_v50 = vld [vmem:[%s5466_s15 + $0x78] sm:$0xff]  ;;  %v303_v52 = vld [vmem:[%s5642_s18 + $0x8] sm:$0xff] }
  0x2e   : > { %4386 = vmatpush1.bf16.msra.mxu0 %v4385_v20  ;;  %v398_v49 = vld [vmem:[%s5466_s15] sm:$0xff]  ;;  %v5655_v53 = vld [vmem:[%s5466_s15 + $0x8] sm:$0xff]  ;;  %v304_v54 = vld [vmem:[%s5642_s18 + $0x10] sm:$0xff] }
  0x2f   : > { %4418 = vmatpush1.bf16.msra.mxu1 %v4417_v22  ;;  %4388 = vmatprep.subr.bf16.mxu0 %v4387_v23  ;;  %v305_v55 = vld [vmem:[%s5642_s18 + $0x18] sm:$0xff]  ;;  %v5668_v56 = vld [vmem:[%s5466_s15 + $0x30] sm:$0xff]  ;;  %v306_v58 = vld [vmem:[%s5642_s18 + $0x20] sm:$0xff] }
  0x30   : > { %4420 = vmatprep.subr.bf16.mxu1 %v4419_v27  ;;  %489 = vperm.xlu1 %4634, %v5618_v37   ;;  %v5676_v59 = vld [vmem:[%s5466_s15 + $0x50] sm:$0xff]  ;;  %v307_v61 = vld [vmem:[%s5642_s18 + $0x28] sm:$0xff]  ;;  %v309_v63 = vld [vmem:[%s5642_s18 + $0x38] sm:$0xff] }
  0x31   : > { %1293 = vperm.xlu0 %4641, %v5531_v57   ;;  %v308_v62 = vld [vmem:[%s5642_s18 + $0x30] sm:$0xff]  ;;  %v310_v0 = vld [vmem:[%s5642_s18 + $0x40] sm:$0xff]  ;;  %v311_v1 = vld [vmem:[%s5642_s18 + $0x48] sm:$0xff] }
  0x32   : > { %4390 = vmatpush1.bf16.msra.mxu0 %v4389_v35  ;;  %v312_v2 = vld [vmem:[%s5642_s18 + $0x50] sm:$0xff]  ;;  %v313_v3 = vld [vmem:[%s5642_s18 + $0x58] sm:$0xff]  ;;  %v5718_v4 = vld [vmem:[%s5466_s15 + $0x40] sm:$0xff] }
  0x33   : > { %4422 = vmatpush1.bf16.msra.mxu1 %v4421_v36  ;;  %4392 = vmatprep.subr.bf16.mxu0 %v4391_v38  ;;  %v315_v6 = vld [vmem:[%s5642_s18 + $0x68] sm:$0xff]  ;;  %v5733_v9 = vld [vmem:[%s5466_s15 + $0x60] sm:$0xff]  ;;  %v316_v10 = vld [vmem:[%s5642_s18 + $0x70] sm:$0xff] }
  0x34   : > { %4424 = vmatprep.subr.bf16.mxu1 %v4423_v42  ;;  %499 = vperm.xlu1 %4634, %v5635_v47   ;;  %v5742_v11 = vld [vmem:[%s5466_s15 + $0x70] sm:$0xff]  ;;  %v317_v12 = vld [vmem:[%s5642_s18 + $0x78] sm:$0xff]  ;;  %v5750_v13 = vld [vmem:[%s5466_s15 + $0x80] sm:$0xff] }
  0x35   : > { %4644 = vset.pattern.permute.xlu0 %v9722_v51  ;;  %v3578_v15 = vld [vmem:[%s9714_s5] sm:$0xff]  ;;  %v3579_v16 = vld [vmem:[%s9714_s5 + $0x8] sm:$0xff]  ;;  %v3580_v22 = vld [vmem:[%s9714_s5 + $0x10] sm:$0xff] }
  0x36   : > { %4394 = vmatpush1.bf16.msra.mxu0 %v4393_v45  ;;  %1693 = vperm.xlu0 %4644, %v398_v49   ;;  %v318_v17 = vld [vmem:[%s5642_s18 + $0x80] sm:$0xff]  ;;  %v4428_v19 = vpack.c.bf16 %v3579_v16, %v3578_v15  ;;  %v319_v20 = vld [vmem:[%s5642_s18 + $0x88] sm:$0xff]  ;;  %v3581_v23 = vld [vmem:[%s9714_s5 + $0x18] sm:$0xff] }
  0x37   : > { %4426 = vmatpush1.bf16.msra.mxu1 %v4425_v46  ;;  %4475 = vmatprep.subr.bf16.mxu0 %v5301_v18  ;;  %v418_v24 = vld [vmem:[%s5466_s15 + $0xa0] sm:$0xff]  ;;  %v4431_v25 = vpack.c.bf16 %v3581_v23, %v3580_v22  ;;  %v320_v26 = vld [vmem:[%s5642_s18 + $0x90] sm:$0xff]  ;;  %v3611_v28 = vld [vmem:[%s9714_s5 + $0x108] sm:$0xff] }
  0x38   : > { %509 = vperm.xlu1 %4634, %v5649_v50   ;;  %4427 = vmatprep.subr.bf16.mxu1 %v5301_v18  ;;  %v3610_v27 = vld [vmem:[%s9714_s5 + $0x100] sm:$0xff]  ;;  %v321_v29 = vld [vmem:[%s5642_s18 + $0x98] sm:$0xff]  ;;  %v3612_v31 = vld [vmem:[%s9714_s5 + $0x110] sm:$0xff] }
  0x39   : > { %823 = vmatmul.mubr.f32.vlgmr.msra.gmra.mrb[0].mxu0 %v302_v48  ;;  %v4476_v30 = vpack.c.bf16 %v3611_v28, %v3610_v27  ;;  %v3613_v32 = vld [vmem:[%s9714_s5 + $0x118] sm:$0xff]  ;;  %v323_v36 = vld [vmem:[%s5642_s18 + $0xa8] sm:$0xff]  ;;  %v3582_v38 = vld [vmem:[%s9714_s5 + $0x20] sm:$0xff] }
  0x3a   : > { %1080 = vmatmul.mubr.f32.vlgmr.msra.gmra.mrb[0].mxu1 %v302_v48  ;;  %828 = vmatprep.mubr.f32.mxu0 %v5298_v14  ;;  %v4479_v35 = vpack.c.bf16 %v3613_v32, %v3612_v31  ;;  %v3583_v40 = vld [vmem:[%s9714_s5 + $0x28] sm:$0xff]  ;;  %v325_v42 = vld [vmem:[%s5642_s18 + $0xb8] sm:$0xff]  ;;  %v326_v44 = vld [vmem:[%s5642_s18 + $0xc0] sm:$0xff] }
  0x3b   : > { %1085 = vmatprep.mubr.f32.mxu1 %v5298_v14  ;;  %1697 = vperm.xlu0 %4644, %v5655_v53   ;;  %v4434_v41 = vpack.c.bf16 %v3583_v40, %v3582_v38  ;;  %v3615_v43 = vld [vmem:[%s9714_s5 + $0x128] sm:$0xff]  ;;  %v3584_v46 = vld [vmem:[%s9714_s5 + $0x30] sm:$0xff]  ;;  %v3585_v48 = vld [vmem:[%s9714_s5 + $0x38] sm:$0xff] }
  0x3c   : > { %4635 = vset.pattern.permute.xlu1 %v9718_v8  ;;  %4429 = vmatpush1.bf16.msra.mxu1 %v4428_v19  ;;  %v3620_v15 = vld [vmem:[%s9714_s5 + $0x150] sm:$0xff]  ;;  %v3621_v16 = vld [vmem:[%s9714_s5 + $0x158] sm:$0xff]  ;;  %v3590_v22 = vld [vmem:[%s9714_s5 + $0x60] sm:$0xff] }
  0x3d   : > { %829 = vmatmul.mubr.f32.gmra.mrb[2].mxu0 %v303_v52  ;;  %1273 = vperm.xlu1 %4635, %v398_v49   ;;  %v3591_v23 = vld [vmem:[%s9714_s5 + $0x68] sm:$0xff]  ;;  %v3592_v28 = vld [vmem:[%s9714_s5 + $0x70] sm:$0xff]  ;;  %v3625_v31 = vld [vmem:[%s9714_s5 + $0x178] sm:$0xff] }
  0x3e   : > { %1086 = vmatmul.mubr.f32.gmra.mrb[2].mxu1 %v303_v52  ;;  %834 = vmatprep.mubr.f32.mxu0 %v5298_v14  ;;  %v4437_v52 = vpack.c.bf16 %v3585_v48, %v3584_v46  ;;  %v3626_v40 = vld [vmem:[%s9714_s5 + $0x180] sm:$0xff]  ;;  %v3628_v48 = vld [vmem:[%s9714_s5 + $0x190] sm:$0xff] }
  0x3f   : > { %1091 = vmatprep.mubr.f32.mxu1 %v5298_v14  ;;  %1713 = vperm.xlu0 %4644, %v5531_v57  }
  0x40   : > { %4430 = vmatprep.subr.bf16.mxu1 %v5301_v18  ;;  %4477 = vmatpush1.bf16.msra.mxu0 %v4476_v30 }
  0x41   : > { %835 = vmatmul.mubr.f32.gmra.mrb[4].mxu0 %v304_v54  ;;  %1277 = vperm.xlu1 %4635, %v5655_v53  }
  0x42   : > { %1092 = vmatmul.mubr.f32.gmra.mrb[4].mxu1 %v304_v54  ;;  %840 = vmatprep.mubr.f32.mxu0 %v5298_v14  ;;  %v5865_v54 = vld [vmem:[%s5466_s15 + $0x98] sm:$0xff] }
  0x43   : > { %1097 = vmatprep.mubr.f32.mxu1 %v5298_v14  ;;  %1717 = vperm.xlu0 %4644, %v5668_v56  }
  0x44   : > { %4432 = vmatpush1.bf16.msra.mxu1 %v4431_v25  ;;  %4478 = vmatprep.subr.bf16.mxu0 %v5301_v18  ;;  %v4446_v25 = vpack.c.bf16 %v3591_v23, %v3590_v22  ;;  %v6057_v22 = vld [vmem:[%s5466_s15 + $0xd8] sm:$0xff]  ;;  %v331_v23 = vld [vmem:[%s5642_s18 + $0xe8] sm:$0xff] }
  0x45   : > { %841 = vmatmul.mubr.f32.gmra.mrb[6].mxu0 %v305_v55  ;;  %4636 = vset.pattern.permute.xlu1 %v9724_v60 }
  0x46   : > { %1098 = vmatmul.mubr.f32.gmra.mrb[6].mxu1 %v305_v55  ;;  %846 = vmatprep.mubr.f32.mxu0 %v5298_v14  ;;  %v3616_v55 = vld [vmem:[%s9714_s5 + $0x130] sm:$0xff] }
  0x47   : > { %1103 = vmatprep.mubr.f32.mxu1 %v5298_v14  ;;  %2113 = vperm.xlu1 %4636, %v398_v49  }
  0x48   : > { %1733 = vperm.xlu0 %4644, %v5676_v59   ;;  %4480 = vmatpush1.bf16.msra.mxu0 %v4479_v35  ;;  %v3594_v35 = vld [vmem:[%s9714_s5 + $0x80] sm:$0xff] }
  0x49   : > { %847 = vmatmul.mubr.f32.gmra.mrb[8].mxu0 %v306_v58  ;;  %4433 = vmatprep.subr.bf16.mxu1 %v5301_v18 }
  0x4a   : > { %1104 = vmatmul.mubr.f32.gmra.mrb[8].mxu1 %v306_v58  ;;  %852 = vmatprep.mubr.f32.mxu0 %v5298_v14  ;;  %v328_v58 = vld [vmem:[%s5642_s18 + $0xd0] sm:$0xff] }
  0x4b   : > { %1109 = vmatprep.mubr.f32.mxu1 %v5298_v14  ;;  %4637 = vset.pattern.permute.xlu1 %v9718_v8 }
  0x4c   : > { %1281 = vperm.xlu1 %4637, %v5478_v33   ;;  %1737 = vperm.xlu0 %4644, %v5618_v37  }
  0x4d   : > { %853 = vmatmul.mubr.f32.gmra.mrb[10].mxu0 %v307_v61  ;;  %4481 = vmatprep.subr.bf16.mxu0 %v5301_v18 }
  0x4e   : > { %1110 = vmatmul.mubr.f32.gmra.mrb[10].mxu1 %v307_v61  ;;  %858 = vmatprep.mubr.f32.mxu0 %v5298_v14 }
  0x4f   : > { %1115 = vmatprep.mubr.f32.mxu1 %v5298_v14  ;;  %4435 = vmatpush1.bf16.msra.mxu1 %v4434_v41  ;;  %v3627_v41 = vld [vmem:[%s9714_s5 + $0x188] sm:$0xff] }
  0x50   : > { %4638 = vset.pattern.permute.xlu1 %v9722_v51  ;;  %4657 = vset.pattern.permute.xlu0 %v9720_v7  ;;  %v4500_v46 = vpack.c.bf16 %v3627_v41, %v3626_v40  ;;  %v3637_v40 = vld [vmem:[%s9714_s5 + $0x1d8] sm:$0xff] }
  0x51   : > { %859 = vmatmul.mubr.f32.gmra.mrb[12].mxu0 %v308_v62  ;;  %1701 = vperm.xlu1 %4638, %v5478_v33  }
  0x52   : > { %1116 = vmatmul.mubr.f32.gmra.mrb[12].mxu1 %v308_v62  ;;  %864 = vmatprep.mubr.f32.mxu0 %v5298_v14  ;;  %v420_v62 = vld [vmem:[%s5466_s15 + $0xb0] sm:$0xff] }
  0x53   : > { %1121 = vmatprep.mubr.f32.mxu1 %v5298_v14  ;;  %434 = vperm.xlu0 %4657, %v398_v49   ;;  %v327_v49 = vld [vmem:[%s5642_s18 + $0xc8] sm:$0xff] }
  0x54   : > { %4436 = vmatprep.subr.bf16.mxu1 %v5301_v18 }
  0x55   : > { %865 = vmatmul.mubr.f32.gmra.mrb[14].mxu0 %v309_v63  ;;  %4639 = vset.pattern.permute.xlu1 %v9718_v8 }
  0x56   : > { %1122 = vmatmul.mubr.f32.gmra.mrb[14].mxu1 %v309_v63  ;;  %1285 = vperm.xlu1 %4639, %v5491_v39   ;;  %v3586_v63 = vld [vmem:[%s9714_s5 + $0x40] sm:$0xff] }
  0x57   : > { %870 = vmatprep.mubr.f32.mxu0 %v5298_v14  ;;  %1127 = vmatprep.mubr.f32.mxu1 %v5298_v14 }
  0x58   : > { %439 = vperm.xlu0 %4657, %v5655_v53   ;;  %4438 = vmatpush1.bf16.msra.mxu1 %v4437_v52 }
  0x59   : > { %871 = vmatmul.mubr.f32.gmra.mrb[16].mxu0 %v310_v0  ;;  %4439 = vmatprep.subr.bf16.mxu1 %v5301_v18 }
  0x5a   : > { %1128 = vmatmul.mubr.f32.gmra.mrb[16].mxu1 %v310_v0  ;;  %876 = vmatprep.mubr.f32.mxu0 %v5298_v14  ;;  %v3587_v0 = vld [vmem:[%s9714_s5 + $0x48] sm:$0xff] }
  0x5b   : > { %4640 = vset.pattern.permute.xlu1 %v9722_v51  ;;  %1133 = vmatprep.mubr.f32.mxu1 %v5298_v14 }
  0x5c   : > { %1705 = vperm.xlu1 %4640, %v5491_v39   ;;  %454 = vperm.xlu0 %4657, %v5614_v34  }
  0x5d   : > { %877 = vmatmul.mubr.f32.gmra.mrb[18].mxu0 %v311_v1 }
  0x5e   : > { %1134 = vmatmul.mubr.f32.gmra.mrb[18].mxu1 %v311_v1  ;;  %882 = vmatprep.mubr.f32.mxu0 %v5298_v14  ;;  %v329_v1 = vld [vmem:[%s5642_s18 + $0xd8] sm:$0xff] }
  0x5f   : > { %1139 = vmatprep.mubr.f32.mxu1 %v5298_v14 }
  0x60   : > { %4642 = vset.pattern.permute.xlu1 %v9724_v60  ;;  %464 = vperm.xlu0 %4657, %v5668_v56  }
  0x61   : > { %2125 = vperm.xlu1 %4642, %v5491_v39   ;;  %883 = vmatmul.mubr.f32.gmra.mrb[20].mxu0 %v312_v2  ;;  %v314_v39 = vld [vmem:[%s5642_s18 + $0x60] sm:$0xff] }
  0x62   : > { %1140 = vmatmul.mubr.f32.gmra.mrb[20].mxu1 %v312_v2  ;;  %888 = vmatprep.mubr.f32.mxu0 %v5298_v14  ;;  %v3618_v2 = vld [vmem:[%s9714_s5 + $0x140] sm:$0xff] }
  0x63   : > { %1145 = vmatprep.mubr.f32.mxu1 %v5298_v14 }
  0x64   : > { %474 = vperm.xlu0 %4657, %v5718_v4  }
  0x65   : > { %4643 = vset.pattern.permute.xlu1 %v9722_v51  ;;  %889 = vmatmul.mubr.f32.gmra.mrb[22].mxu0 %v313_v3 }
  0x66   : > { %1146 = vmatmul.mubr.f32.gmra.mrb[22].mxu1 %v313_v3  ;;  %1709 = vperm.xlu1 %4643, %v5614_v34   ;;  %v3619_v3 = vld [vmem:[%s9714_s5 + $0x148] sm:$0xff] }
  0x67   : > { %894 = vmatprep.mubr.f32.mxu0 %v5298_v14  ;;  %1151 = vmatprep.mubr.f32.mxu1 %v5298_v14 }
  0x68   : > { %484 = vperm.xlu0 %4657, %v5676_v59  }
  0x69   : > { %895 = vmatmul.mubr.f32.gmra.mrb[24].mxu0 %v314_v39 }
  0x6a   : > { %1152 = vmatmul.mubr.f32.gmra.mrb[24].mxu1 %v314_v39  ;;  %4645 = vset.pattern.permute.xlu1 %v9724_v60 }
  0x6b   : > { %2129 = vperm.xlu1 %4645, %v5614_v34   ;;  %900 = vmatprep.mubr.f32.mxu0 %v5298_v14  ;;  %v322_v34 = vld [vmem:[%s5642_s18 + $0xa0] sm:$0xff] }
  0x6c   : > { %1157 = vmatprep.mubr.f32.mxu1 %v5298_v14  ;;  %494 = vperm.xlu0 %4657, %v5733_v9  }
  0x6d   : > { %901 = vmatmul.mubr.f32.gmra.mrb[26].mxu0 %v315_v6 }
  0x6e   : > { %1158 = vmatmul.mubr.f32.gmra.mrb[26].mxu1 %v315_v6  ;;  %906 = vmatprep.mubr.f32.mxu0 %v5298_v14  ;;  %v4488_v6 = vpack.c.bf16 %v3619_v3, %v3618_v2  ;;  %v6033_v3 = vld [vmem:[%s5466_s15 + $0xc0] sm:$0xff] }
  0x6f   : > { %4646 = vset.pattern.permute.xlu1 %v9718_v8  ;;  %1163 = vmatprep.mubr.f32.mxu1 %v5298_v14 }
  0x70   : > { %1297 = vperm.xlu1 %4646, %v5668_v56   ;;  %504 = vperm.xlu0 %4657, %v5742_v11  }
  0x71   : > { %907 = vmatmul.mubr.f32.gmra.mrb[28].mxu0 %v316_v10 }
  0x72   : > { %1164 = vmatmul.mubr.f32.gmra.mrb[28].mxu1 %v316_v10  ;;  %912 = vmatprep.mubr.f32.mxu0 %v5298_v14  ;;  %v3588_v10 = vld [vmem:[%s9714_s5 + $0x50] sm:$0xff] }
  0x73   : > { %1169 = vmatprep.mubr.f32.mxu1 %v5298_v14 }
  0x74   : > { %4647 = vset.pattern.permute.xlu1 %v9724_v60  ;;  %514 = vperm.xlu0 %4657, %v5750_v13  }
  0x75   : > { %2133 = vperm.xlu1 %4647, %v5531_v57   ;;  %913 = vmatmul.mubr.f32.gmra.mrb[30].mxu0 %v317_v12  ;;  %v5764_v57 = vld [vmem:[%s5466_s15 + $0x88] sm:$0xff] }
  0x76   : > { %1170 = vmatmul.mubr.f32.gmra.mrb[30].mxu1 %v317_v12  ;;  %918 = vmatprep.mubr.f32.mxu0 %v5298_v14  ;;  %v3589_v12 = vld [vmem:[%s9714_s5 + $0x58] sm:$0xff] }
  0x77   : > { %1175 = vmatprep.mubr.f32.mxu1 %v5298_v14 }
  0x78   : > { %519 = vperm.xlu0 %4657, %v5764_v57  }
  0x79   : > { %4648 = vset.pattern.permute.xlu1 %v9718_v8  ;;  %919 = vmatmul.mubr.f32.gmra.mrb[32].mxu0 %v318_v17 }
  0x7a   : > { %1176 = vmatmul.mubr.f32.gmra.mrb[32].mxu1 %v318_v17  ;;  %1301 = vperm.xlu1 %4648, %v5559_v5   ;;  %v4443_v17 = vpack.c.bf16 %v3589_v12, %v3588_v10  ;;  %v3600_v10 = vld [vmem:[%s9714_s5 + $0xb0] sm:$0xff] }
  0x7b   : > { %924 = vmatprep.mubr.f32.mxu0 %v5298_v14  ;;  %1181 = vmatprep.mubr.f32.mxu1 %v5298_v14 }
  0x7c   : > { %534 = vperm.xlu0 %4657, %v418_v24   ;;  %v3623_v24 = vld [vmem:[%s9714_s5 + $0x168] sm:$0xff] }
  0x7d   : > { %925 = vmatmul.mubr.f32.gmra.mrb[34].mxu0 %v319_v20 }
  0x7e   : > { %4649 = vset.pattern.permute.xlu1 %v9722_v51  ;;  %1182 = vmatmul.mubr.f32.gmra.mrb[34].mxu1 %v319_v20  ;;  %v4491_v20 = vpack.c.bf16 %v3621_v16, %v3620_v15  ;;  %v3601_v15 = vld [vmem:[%s9714_s5 + $0xb8] sm:$0xff]  ;;  %v3632_v16 = vld [vmem:[%s9714_s5 + $0x1b0] sm:$0xff] }
  0x7f   : > { %1721 = vperm.xlu1 %4649, %v5559_v5   ;;  %930 = vmatprep.mubr.f32.mxu0 %v5298_v14 }
  0x80   : > { %1187 = vmatprep.mubr.f32.mxu1 %v5298_v14  ;;  %4675 = vset.pattern.permute.xlu0 %v9724_v60 }
  0x81   : > { %931 = vmatmul.mubr.f32.gmra.mrb[36].mxu0 %v320_v26  ;;  %2117 = vperm.xlu0 %4675, %v5655_v53  }
  0x82   : > { %1188 = vmatmul.mubr.f32.gmra.mrb[36].mxu1 %v320_v26  ;;  %936 = vmatprep.mubr.f32.mxu0 %v5298_v14  ;;  %v330_v26 = vld [vmem:[%s5642_s18 + $0xe0] sm:$0xff] }
  0x83   : > { %4650 = vset.pattern.permute.xlu1 %v9718_v8  ;;  %1193 = vmatprep.mubr.f32.mxu1 %v5298_v14 }
  0x84   : > { %1305 = vperm.xlu1 %4650, %v5718_v4  }
  0x85   : > { %937 = vmatmul.mubr.f32.gmra.mrb[38].mxu0 %v321_v29  ;;  %2121 = vperm.xlu0 %4675, %v5478_v33   ;;  %v324_v33 = vld [vmem:[%s5642_s18 + $0xb0] sm:$0xff] }
  0x86   : > { %1194 = vmatmul.mubr.f32.gmra.mrb[38].mxu1 %v321_v29  ;;  %942 = vmatprep.mubr.f32.mxu0 %v5298_v14  ;;  %v3593_v29 = vld [vmem:[%s9714_s5 + $0x78] sm:$0xff] }
  0x87   : > { %1199 = vmatprep.mubr.f32.mxu1 %v5298_v14  ;;  %v4449_v32 = vpack.c.bf16 %v3593_v29, %v3592_v28  ;;  %v3603_v28 = vld [vmem:[%s9714_s5 + $0xc8] sm:$0xff]  ;;  %v3634_v29 = vld [vmem:[%s9714_s5 + $0x1c0] sm:$0xff] }
  0x88   : > { %4651 = vset.pattern.permute.xlu1 %v9722_v51 }
  0x89   : > { %1725 = vperm.xlu1 %4651, %v5718_v4   ;;  %943 = vmatmul.mubr.f32.gmra.mrb[40].mxu0 %v322_v34 }
  0x8a   : > { %1200 = vmatmul.mubr.f32.gmra.mrb[40].mxu1 %v322_v34  ;;  %948 = vmatprep.mubr.f32.mxu0 %v5298_v14 }
  0x8b   : > { %1205 = vmatprep.mubr.f32.mxu1 %v5298_v14  ;;  %2137 = vperm.xlu0 %4675, %v5668_v56   ;;  %v3617_v56 = vld [vmem:[%s9714_s5 + $0x138] sm:$0xff] }
  0x8d   : > { %4652 = vset.pattern.permute.xlu1 %v9724_v60  ;;  %949 = vmatmul.mubr.f32.gmra.mrb[42].mxu0 %v323_v36 }
  0x8e   : > { %2145 = vperm.xlu1 %4652, %v5718_v4   ;;  %1206 = vmatmul.mubr.f32.gmra.mrb[42].mxu1 %v323_v36  ;;  %v4440_v4 = vpack.c.bf16 %v3587_v0, %v3586_v63  ;;  %v3595_v36 = vld [vmem:[%s9714_s5 + $0x88] sm:$0xff]  ;;  %v3630_v0 = vld [vmem:[%s9714_s5 + $0x1a0] sm:$0xff] }
  0x8f   : > { %954 = vmatprep.mubr.f32.mxu0 %v5298_v14  ;;  %1211 = vmatprep.mubr.f32.mxu1 %v5298_v14  ;;  %v3599_v63 = vld [vmem:[%s9714_s5 + $0xa8] sm:$0xff] }
  0x90   : > { %2141 = vperm.xlu0 %4675, %v5559_v5   ;;  %v3614_v5 = vld [vmem:[%s9714_s5 + $0x120] sm:$0xff]  ;;  %4441 = vmatpush1.bf16.msra.mxu1 %v4440_v4 }
  0x91   : > { %955 = vmatmul.mubr.f32.gmra.mrb[44].mxu0 %v324_v33  ;;  %v4482_v45 = vpack.c.bf16 %v3615_v43, %v3614_v5  ;;  %4442 = vmatprep.subr.bf16.mxu1 %v5301_v18  ;;  %v3596_v43 = vld [vmem:[%s9714_s5 + $0x90] sm:$0xff] }
  0x92   : > { %4653 = vset.pattern.permute.xlu1 %v9722_v51  ;;  %1212 = vmatmul.mubr.f32.gmra.mrb[44].mxu1 %v324_v33 }
  0x93   : > { %1729 = vperm.xlu1 %4653, %v5587_v21   ;;  %960 = vmatprep.mubr.f32.mxu0 %v5298_v14 }
  0x94   : > { %2157 = vperm.xlu0 %4675, %v5618_v37   ;;  %1217 = vmatprep.mubr.f32.mxu1 %v5298_v14 }
  0x95   : > { %961 = vmatmul.mubr.f32.gmra.mrb[46].mxu0 %v325_v42  ;;  %4444 = vmatpush1.bf16.msra.mxu1 %v4443_v17  ;;  %v3633_v17 = vld [vmem:[%s9714_s5 + $0x1b8] sm:$0xff] }
  0x96   : > { %1218 = vmatmul.mubr.f32.gmra.mrb[46].mxu1 %v325_v42  ;;  %966 = vmatprep.mubr.f32.mxu0 %v5298_v14  ;;  %v4452_v42 = vpack.c.bf16 %v3595_v36, %v3594_v35  ;;  %v3604_v35 = vld [vmem:[%s9714_s5 + $0xd0] sm:$0xff]  ;;  %v3605_v36 = vld [vmem:[%s9714_s5 + $0xd8] sm:$0xff] }
  0x97   : > { %4654 = vset.pattern.permute.xlu1 %v9724_v60  ;;  %1223 = vmatprep.mubr.f32.mxu1 %v5298_v14 }
  0x98   : > { %2149 = vperm.xlu1 %4654, %v5587_v21   ;;  %2161 = vperm.xlu0 %4675, %v5733_v9  }
  0x99   : > { %967 = vmatmul.mubr.f32.gmra.mrb[48].mxu0 %v326_v44  ;;  %4445 = vmatprep.subr.bf16.mxu1 %v5301_v18 }
  0x9a   : > { %1224 = vmatmul.mubr.f32.gmra.mrb[48].mxu1 %v326_v44  ;;  %972 = vmatprep.mubr.f32.mxu0 %v5298_v14  ;;  %v3597_v44 = vld [vmem:[%s9714_s5 + $0x98] sm:$0xff] }
  0x9b   : > { %1229 = vmatprep.mubr.f32.mxu1 %v5298_v14  ;;  %4483 = vmatpush1.bf16.msra.mxu0 %v4482_v45  ;;  %v5861_v53 = vpop.permute.xlu1 %444  ;;  %v5992_v45 = vld [vmem:[%s5466_s15 + $0x90] sm:$0xff] }
  0x9c   : > { %4655 = vset.pattern.permute.xlu1 %v9718_v8  ;;  %2177 = vperm.xlu0 %4675, %v5750_v13  }
  0x9d   : > { %1317 = vperm.xlu1 %4655, %v5618_v37   ;;  %973 = vmatmul.mubr.f32.gmra.mrb[50].mxu0 %v327_v49  ;;  %v4485_v37 = vpack.c.bf16 %v3617_v56, %v3616_v55  ;;  %v4455_v55 = vpack.c.bf16 %v3597_v44, %v3596_v43  ;;  %v4467_v43 = vpack.c.bf16 %v3605_v36, %v3604_v35 }
  0x9e   : > { %1230 = vmatmul.mubr.f32.gmra.mrb[50].mxu1 %v327_v49  ;;  %978 = vmatprep.mubr.f32.mxu0 %v5298_v14  ;;  %v3629_v49 = vld [vmem:[%s9714_s5 + $0x198] sm:$0xff] }
  0x9f   : > { %1235 = vmatprep.mubr.f32.mxu1 %v5298_v14  ;;  %4484 = vmatprep.subr.bf16.mxu0 %v5301_v18  ;;  %v5878_v61 = vpop.permute.xlu1 %449 }
  0xa0   : > { %2189 = vperm.xlu0 %4675, %v5865_v54   ;;  %4486 = vmatpush1.bf16.msra.mxu0 %v4485_v37  ;;  %v4503_v37 = vpack.c.bf16 %v3629_v49, %v3628_v48  ;;  %v332_v48 = vld [vmem:[%s5642_s18 + $0xf0] sm:$0xff]  ;;  %v3606_v49 = vld [vmem:[%s9714_s5 + $0xe0] sm:$0xff] }
  0xa1   : > { %4656 = vset.pattern.permute.xlu1 %v9724_v60  ;;  %979 = vmatmul.mubr.f32.gmra.mrb[52].mxu0 %v328_v58 }
  0xa2   : > { %2153 = vperm.xlu1 %4656, %v5676_v59   ;;  %1236 = vmatmul.mubr.f32.gmra.mrb[52].mxu1 %v328_v58  ;;  %v6010_v58 = vld [vmem:[%s5466_s15 + $0xa8] sm:$0xff] }
  0xa3   : > { %984 = vmatprep.mubr.f32.mxu0 %v5298_v14  ;;  %1241 = vmatprep.mubr.f32.mxu1 %v5298_v14  ;;  %v5898_v39 = vpop.permute.xlu1 %459 }
  0xa4   : > { %2201 = vperm.xlu0 %4675, %v420_v62   ;;  %4487 = vmatprep.subr.bf16.mxu0 %v5301_v18  ;;  %v3598_v62 = vld [vmem:[%s9714_s5 + $0xa0] sm:$0xff] }
  0xa5   : > { %985 = vmatmul.mubr.f32.gmra.mrb[54].mxu0 %v329_v1  ;;  %4447 = vmatpush1.bf16.msra.mxu1 %v4446_v25  ;;  %v4458_v4 = vpack.c.bf16 %v3599_v63, %v3598_v62  ;;  %v3639_v63 = vld [vmem:[%s9714_s5 + $0x1e8] sm:$0xff] }
  0xa6   : > { %4658 = vset.pattern.permute.xlu1 %v9718_v8  ;;  %1242 = vmatmul.mubr.f32.gmra.mrb[54].mxu1 %v329_v1  ;;  %v3631_v1 = vld [vmem:[%s9714_s5 + $0x1a8] sm:$0xff] }
  0xa7   : > { %1321 = vperm.xlu1 %4658, %v5733_v9   ;;  %v5917_v19 = vpop.permute.xlu1 %469  ;;  %4489 = vmatpush1.bf16.msra.mxu0 %v4488_v6  ;;  %v4506_v6 = vpack.c.bf16 %v3631_v1, %v3630_v0 }
  0xa8   : > { %4686 = vset.pattern.permute.xlu0 %v9718_v8  ;;  %4490 = vmatprep.subr.bf16.mxu0 %v5301_v18 }
  0xa9   : > { %1309 = vperm.xlu0 %4686, %v5587_v21   ;;  %v3622_v21 = vld [vmem:[%s9714_s5 + $0x160] sm:$0xff]  ;;  %990 = vmatprep.mubr.f32.mxu0 %v5298_v14 }
  0xaa   : > { %1247 = vmatprep.mubr.f32.mxu1 %v5298_v14  ;;  %991 = vmatmul.mubr.f32.gmra.mrb[56].mxu0 %v330_v26 }
  0xab   : > { %4659 = vset.pattern.permute.xlu1 %v9722_v51  ;;  %v5938_v27 = vpop.permute.xlu1 %479  ;;  %4492 = vmatpush1.bf16.msra.mxu0 %v4491_v20 }
  0xac   : > { %1741 = vperm.xlu1 %4659, %v5733_v9   ;;  %4493 = vmatprep.subr.bf16.mxu0 %v5301_v18  ;;  %v4494_v9 = vpack.c.bf16 %v3623_v24, %v3622_v21  ;;  %v5949_v30 = vpop.permute.xlu0 %1289  ;;  %v4461_v21 = vpack.c.bf16 %v3601_v15, %v3600_v10  ;;  %v4509_v24 = vpack.c.bf16 %v3633_v17, %v3632_v16  ;;  %v6141_v10 = vld [vmem:[%s9712_s3] sm:$0xff]  ;;  %v6151_v16 = vld [vmem:[%s9712_s3 + $0x8] sm:$0xff] }
  0xad   : > { %1313 = vperm.xlu0 %4686, %v5676_v59   ;;  %v3624_v59 = vld [vmem:[%s9714_s5 + $0x170] sm:$0xff]  ;;  %4448 = vmatprep.subr.bf16.mxu1 %v5301_v18 }
  0xae   : > { %v4497_v33 = vpack.c.bf16 %v3625_v31, %v3624_v59  ;;  %1248 = vmatmul.mubr.f32.gmra.mrb[56].mxu1 %v330_v26  ;;  %996 = vmatprep.mubr.f32.mxu0 %v5298_v14  ;;  %v3602_v26 = vld [vmem:[%s9714_s5 + $0xc0] sm:$0xff] }
  0xaf   : > { %v5959_v34 = vpop.permute.xlu1 %489  ;;  %4495 = vmatpush1.bf16.msra.mxu0 %v4494_v9  ;;  %4450 = vmatpush1.bf16.msra.mxu1 %v4449_v32  ;;  %v3635_v9 = vld [vmem:[%s9714_s5 + $0x1c8] sm:$0xff]  ;;  %v4464_v31 = vpack.c.bf16 %v3603_v28, %v3602_v26  ;;  %v3608_v26 = vld [vmem:[%s9714_s5 + $0xf0] sm:$0xff]  ;;  %v3609_v28 = vld [vmem:[%s9714_s5 + $0xf8] sm:$0xff] }
  0xb0   : > { %4660 = vset.pattern.permute.xlu1 %v9718_v8  ;;  %v5970_v38 = vpop.permute.xlu0 %1293  ;;  %4496 = vmatprep.subr.bf16.mxu0 %v5301_v18 }
  0xb1   : > { %1325 = vperm.xlu1 %4660, %v5635_v47   ;;  %1329 = vperm.xlu0 %4686, %v5742_v11  }
  0xb2   : > { %4451 = vmatprep.subr.bf16.mxu1 %v5301_v18  ;;  %1253 = vmatprep.mubr.f32.mxu1 %v5298_v14 }
  0xb3   : > { %v5980_v5 = vpop.permute.xlu1 %499  ;;  %4498 = vmatpush1.bf16.msra.mxu0 %v4497_v33  ;;  %4453 = vmatpush1.bf16.msra.mxu1 %v4452_v42  ;;  %v3636_v33 = vld [vmem:[%s9714_s5 + $0x1d0] sm:$0xff]  ;;  %v594_v42 = vlaneseq }
  0xb4   : > { %4499 = vmatprep.subr.bf16.mxu0 %v5301_v18  ;;  %4454 = vmatprep.subr.bf16.mxu1 %v5301_v18  ;;  %v4515_v44 = vpack.c.bf16 %v3637_v40, %v3636_v33 }
  0xb5   : > { %4661 = vset.pattern.permute.xlu1 %v9722_v51  ;;  %1333 = vperm.xlu0 %4686, %v5649_v50   ;;  %v6002_v52 = vpop.permute.xlu0 %1693 }
  0xb6   : > { %1745 = vperm.xlu1 %4661, %v5635_v47   ;;  %997 = vmatmul.mubr.f32.gmra.mrb[58].mxu0 %v331_v23 }
  0xb7   : > { %v6005_v56 = vpop.permute.xlu1 %509  ;;  %4501 = vmatpush1.bf16.msra.mxu0 %v4500_v46  ;;  %4456 = vmatpush1.bf16.msra.mxu1 %v4455_v55  ;;  %v3607_v55 = vld [vmem:[%s9714_s5 + $0xe8] sm:$0xff] }
  0xb8   : > { %4502 = vmatprep.subr.bf16.mxu0 %v5301_v18  ;;  %4457 = vmatprep.subr.bf16.mxu1 %v5301_v18  ;;  %v4470_v0 = vpack.c.bf16 %v3607_v55, %v3606_v49  ;;  %v6198_v49 = vld [vmem:[%s5466_s15 + $0xb8] sm:$0xff]  ;;  %v4473_v55 = vpack.c.bf16 %v3609_v28, %v3608_v26 }
  0xb9   : > { %1345 = vperm.xlu0 %4686, %v5992_v45   ;;  %1254 = vmatmul.mubr.f32.gmra.mrb[58].mxu1 %v331_v23  ;;  %9809 = vst [vmem:[#allocation5_spill] sm:$0xff] %v6198_v49 }
  0xba   : > { %4662 = vset.pattern.permute.xlu1 %v9724_v60  ;;  %v6026_v2 = vpop.permute.xlu0 %1697  ;;  %1002 = vmatprep.mubr.f32.mxu0 %v5298_v14 }
  0xbb   : > { %2165 = vperm.xlu1 %4662, %v5635_v47   ;;  %4504 = vmatpush1.bf16.msra.mxu0 %v4503_v37  ;;  %v6119_v37 = vshrl.u32 %v594_v42, 7 }
  0xbc   : > { %v6030_v47 = vpop.permute.xlu1 %1273  ;;  %4505 = vmatprep.subr.bf16.mxu0 %v5301_v18  ;;  %4459 = vmatpush1.bf16.msra.mxu1 %v4458_v4 }
  0xbd   : > { %1357 = vperm.xlu0 %4686, %v6010_v58   ;;  %4460 = vmatprep.subr.bf16.mxu1 %v5301_v18  ;;  %v6157_v23 = vsub.s32 1, %v6119_v37  ;;  %v6183_v36 = vsub.s32 3, %v6119_v37  ;;  %v2246_v33 = vsub.s32 7, %v6119_v37 }
  0xbe   : > { %v6041_v12 = vpop.permute.xlu0 %1713  ;;  %1259 = vmatprep.mubr.f32.mxu1 %v5298_v14  ;;  %1003 = vmatmul.mubr.f32.gmra.mrb[60].mxu0 %v332_v48 }
  0xbf   : > { %4663 = vset.pattern.permute.xlu1 %v9722_v51  ;;  %4507 = vmatpush1.bf16.msra.mxu0 %v4506_v6  ;;  %v6135_v6 = vsub.s32 0, %v6119_v37  ;;  %v2251_v26 = vrot.slane %v6151_v16, %v6183_v36  ;;  %v2255_v28 = vrot.slane %v6151_v16, %v2246_v33 }
  0xc0   : > { %1749 = vperm.xlu1 %4663, %v5742_v11   ;;  %v6054_v20 = vpop.permute.xlu1 %1277  ;;  %4508 = vmatprep.subr.bf16.mxu0 %v5301_v18 }
  0xc1   : > { %1369 = vperm.xlu0 %4686, %v6033_v3   ;;  %4462 = vmatpush1.bf16.msra.mxu1 %v4461_v21  ;;  %v1406_v21 = vsub.s32 5, %v6119_v37 }
  0xc2   : > { %v6062_v25 = vpop.permute.xlu0 %1717  ;;  %4463 = vmatprep.subr.bf16.mxu1 %v5301_v18  ;;  %1260 = vmatmul.mubr.f32.gmra.mrb[60].mxu1 %v332_v48 }
  0xc3   : > { %4510 = vmatpush1.bf16.msra.mxu0 %v4509_v24  ;;  %v597_v24 = vrot.slane %v6141_v10, %v6135_v6  ;;  %1008 = vmatprep.mubr.f32.mxu0 %v5298_v14  ;;  %v1407_v48 = vrot.slane %v6141_v10, %v1406_v21 }
  0xc4   : > { %4664 = vset.pattern.permute.xlu1 %v9724_v60  ;;  %4511 = vmatprep.subr.bf16.mxu0 %v5301_v18 }
  0xc5   : > { %2169 = vperm.xlu1 %4664, %v5742_v11   ;;  %1381 = vperm.xlu0 %4686, %v6057_v22   ;;  %v4512_v11 = vpack.c.bf16 %v3635_v9, %v3634_v29  ;;  %v1822_v29 = vsub.s32 2, %v6119_v37  ;;  %v1826_v9 = vsub.s32 6, %v6119_v37 }
  0xc6   : > { %v6079_v59 = vpop.permute.xlu1 %2113  ;;  %4465 = vmatpush1.bf16.msra.mxu1 %v4464_v31  ;;  %v3640_v31 = vld [vmem:[%s9714_s5 + $0x1f0] sm:$0xff]  ;;  %1265 = vmatprep.mubr.f32.mxu1 %v5298_v14 }
  0xc7   : > { %v6081_v32 = vpop.permute.xlu0 %1733  ;;  %4513 = vmatpush1.bf16.msra.mxu0 %v4512_v11  ;;  %4466 = vmatprep.subr.bf16.mxu1 %v5301_v18  ;;  %v3641_v11 = vld [vmem:[%s9714_s5 + $0x1f8] sm:$0xff] }
  0xc8   : > { %4514 = vmatprep.subr.bf16.mxu0 %v5301_v18 }
  0xc9   : > { %4665 = vset.pattern.permute.xlu1 %v9718_v8  ;;  %4697 = vset.pattern.permute.xlu0 %v9722_v51 }
  0xca   : > { %1337 = vperm.xlu1 %4665, %v5750_v13   ;;  %1753 = vperm.xlu0 %4697, %v5649_v50  }
  0xcb   : > { %v6101_v41 = vpop.permute.xlu1 %1281  ;;  %v6106_v46 = vpop.permute.xlu0 %1737  ;;  %4468 = vmatpush1.bf16.msra.mxu1 %v4467_v43  ;;  %4516 = vmatpush1.bf16.msra.mxu0 %v4515_v44  ;;  %v1403_v43 = vrot.slane %v6141_v10, %v6157_v23  ;;  %v1411_v44 = vrot.slane %v6151_v16, %v6157_v23 }
  0xcc   : > { %4469 = vmatprep.subr.bf16.mxu1 %v5301_v18  ;;  %4517 = vmatprep.subr.bf16.mxu0 %v5301_v18 }
  0xce   : > { %4666 = vset.pattern.permute.xlu1 %v9724_v60  ;;  %1765 = vperm.xlu0 %4697, %v5992_v45  }
  0xcf   : > { %2173 = vperm.xlu1 %4666, %v5649_v50   ;;  %v3638_v50 = vld [vmem:[%s9714_s5 + $0x1e0] sm:$0xff]  ;;  %4471 = vmatpush1.bf16.msra.mxu1 %v4470_v0  ;;  %v1823_v0 = vrot.slane %v6141_v10, %v1822_v29 }
  0xd0   : > { %v6121_v62 = vpop.permute.xlu1 %1701  ;;  %v4518_v4 = vpack.c.bf16 %v3639_v63, %v3638_v50  ;;  %v1415_v50 = vrot.slane %v6151_v16, %v1406_v21  ;;  %v4521_v63 = vpack.c.bf16 %v3641_v11, %v3640_v31  ;;  %4472 = vmatprep.subr.bf16.mxu1 %v5301_v18  ;;  %v6234_v11 = vld [vmem:[%s9713_s4] sm:$0xf] }
  0xd2   : > { %1777 = vperm.xlu0 %4697, %v6010_v58   ;;  %v6132_v1 = vpop.permute.xlu0 %434  ;;  %4519 = vmatpush1.bf16.msra.mxu0 %v4518_v4  ;;  %v1827_v4 = vrot.slane %v6141_v10, %v1826_v9 }
  0xd3   : > { %4667 = vset.pattern.permute.xlu1 %v9722_v51  ;;  %4520 = vmatprep.subr.bf16.mxu0 %v5301_v18  ;;  %v6245_v18 = vrot.slane %v1823_v0, %v1822_v29  ;;  %v6268_v0 = vrot.slane %v2251_v26, %v6183_v36 }
  0xd4   : > { %1757 = vperm.xlu1 %4667, %v5750_v13   ;;  %v600_v13 = vsub.s32 4, %v6119_v37  ;;  %v6202_v37 = vrot.slane %v597_v24, %v6135_v6  ;;  %v2243_v24 = vrot.slane %v6141_v10, %v6183_v36  ;;  %4474 = vmatpush1.bf16.msra.mxu1 %v4473_v55  ;;  %v6254_v55 = vrot.slane %v1415_v50, %v6157_v23 }
  0xd5   : > { %v6143_v15 = vpop.permute.xlu1 %1285  ;;  %9816 = vst [vmem:[#allocation12_spill] sm:$0xff] %v6245_v18  ;;  %v6278_v50 = vrot.slane %v6234_v11, %v1822_v29 }
  0xd6   : > { %1789 = vperm.xlu0 %4697, %v6033_v3   ;;  %v333_v3 = vld [vmem:[%s5642_s18 + $0xf8] sm:$0xff]  ;;  %v601_v40 = vrot.slane %v6141_v10, %v600_v13  ;;  %9810 = vst [vmem:[#allocation6_spill] sm:$0xff] %v6202_v37  ;;  %v609_v14 = vrot.slane %v6151_v16, %v600_v13  ;;  %v2247_v13 = vrot.slane %v6141_v10, %v2246_v33  ;;  %9819 = vst [vmem:[#allocation15_spill] sm:$0xff] %v6254_v55 }
  0xd7   : > { %v6154_v17 = vpop.permute.xlu0 %439  ;;  %1009 = vmatmul.mubr.f32.gmra.mrb[62].mxu0 %v333_v3  ;;  %1266 = vmatmul.mubr.f32.gmra.mrb[62].mxu1 %v333_v3  ;;  %v1835_v3 = vrot.slane %v6151_v16, %v1826_v9  ;;  %v6229_v10 = vrot.slane %v1403_v43, %v6157_v23  ;;  %v6251_v43 = vrot.slane %v1407_v48, %v6157_v23 }
  0xd8   : > { %4668 = vset.pattern.permute.xlu1 %v9718_v8  ;;  %v1831_v8 = vrot.slane %v6151_v16, %v1822_v29  ;;  %v6243_v33 = vrot.slane %v609_v14, %v6135_v6  ;;  %4522 = vmatpush1.bf16.msra.mxu0 %v4521_v63  ;;  %v6262_v14 = vrot.slane %v2243_v24, %v6183_v36 }
  0xd9   : > { %1341 = vperm.xlu1 %4668, %v5764_v57   ;;  %9812 = vst [vmem:[#allocation8_spill] sm:$0xff] %v6229_v10  ;;  %9818 = vst [vmem:[#allocation14_spill] sm:$0xff] %v6251_v43  ;;  %v6265_v63 = vrot.slane %v2247_v13, %v6183_v36  ;;  %v6271_v48 = vrot.slane %v2255_v28, %v6183_v36  ;;  %v6302_v26 = vmul.f32 %v6202_v37, %v5878_v61 }
  0xda   : > { %1801 = vperm.xlu0 %4697, %v6057_v22   ;;  %v605_v22 = vrot.slane %v6151_v16, %v6135_v6  ;;  %v6240_v16 = vrot.slane %v601_v40, %v6135_v6  ;;  %9815 = vst [vmem:[#allocation11_spill] sm:$0xff] %v6243_v33  ;;  %v6258_v40 = vrot.slane %v1835_v3, %v1822_v29  ;;  %9825 = vst [vmem:[#allocation21_spill] sm:$0xff] %v6278_v50 }
  0xdb   : > { %v6180_v35 = vpop.permute.xlu1 %1705  ;;  %v6190_v42 = vpop.permute.xlu0 %454  ;;  %9822 = vst [vmem:[#allocation18_spill] sm:$0xff] %v6265_v63  ;;  %9823 = vst [vmem:[#allocation19_spill] sm:$0xff] %v6271_v48  ;;  %v6284_v3 = vmul.f32 %v6202_v37, %v5861_v53  ;;  %v6314_v60 = vmul.f32 %v6243_v33, %v5878_v61 }
  0xdc   : > { %v6223_v31 = vrot.slane %v605_v22, %v6135_v6  ;;  %9814 = vst [vmem:[#allocation10_spill] sm:$0xff] %v6240_v16  ;;  %v6247_v22 = vrot.slane %v1827_v4, %v1822_v29  ;;  %9821 = vst [vmem:[#allocation17_spill] sm:$0xff] %v6258_v40  ;;  %v6292_v13 = vmul.f32 %v6240_v16, %v5861_v53 }
  0xdd   : > { %4669 = vset.pattern.permute.xlu1 %v9720_v7  ;;  %9826 = vst [vmem:[#allocation22_spill] sm:$0xff] %v6284_v3  ;;  %9830 = vst [vmem:[#allocation26_spill] sm:$0xff] %v6302_v26 }
  0xde   : > { %524 = vperm.xlu1 %4669, %v5992_v45   ;;  %4700 = vset.pattern.permute.xlu0 %v9720_v7  ;;  %9811 = vst [vmem:[#allocation7_spill] sm:$0xff] %v6223_v31  ;;  %v6237_v7 = vrot.slane %v1411_v44, %v6157_v23  ;;  %9817 = vst [vmem:[#allocation13_spill] sm:$0xff] %v6247_v22  ;;  %v6256_v44 = vrot.slane %v1831_v8, %v1822_v29 }
  0xdf   : > { %549 = vperm.xlu0 %4700, %v6198_v49   ;;  %v6226_v9 = vpop.permute.xlu0 %464  ;;  %v6275_v8 = vrot.slane %v6234_v11, %v6135_v6  ;;  %v6288_v24 = vmul.f32 %v6223_v31, %v5861_v53  ;;  %9828 = vst [vmem:[#allocation24_spill] sm:$0xff] %v6292_v13  ;;  %v6296_v6 = vmul.f32 %v6243_v33, %v5861_v53  ;;  %9833 = vst [vmem:[#allocation29_spill] sm:$0xff] %v6314_v60  ;;  %v9834_v53 = vmov 3  }
  0xe0   : > { %v6217_v21 = vpop.permute.xlu1 %2125  ;;  %9813 = vst [vmem:[#allocation9_spill] sm:$0xff] %v6237_v7  ;;  %9820 = vst [vmem:[#allocation16_spill] sm:$0xff] %v6256_v44  ;;  %v6306_v28 = vmul.f32 %v6223_v31, %v5878_v61  ;;  %v6319_v49 = vmul.f32 %v6202_v37, %v5898_v39  ;;  %v6323_v26 = vmul.f32 %v6223_v31, %v5898_v39 }
  0xe1   : > { %9824 = vst [vmem:[#allocation20_spill] sm:$0xff] %v6275_v8  ;;  %9827 = vst [vmem:[#allocation23_spill] sm:$0xff] %v6288_v24  ;;  %v6478_v60 = vmul.f32 %v6247_v22, %v6026_v2  ;;  %v6515_v13 = vmul.f32 %v6256_v44, %v6041_v12  ;;  %v6526_v24 = vmul.f32 %v6229_v10, %v6054_v20 }
  0xe2   : > { %4670 = vset.pattern.permute.xlu1 %v9722_v51  ;;  %9829 = vst [vmem:[#allocation25_spill] sm:$0xff] %v6296_v6  ;;  %9831 = vst [vmem:[#allocation27_spill] sm:$0xff] %v6306_v28  ;;  %v6310_v51 = vmul.f32 %v6240_v16, %v5878_v61  ;;  %v6327_v28 = vmul.f32 %v6240_v16, %v5898_v39  ;;  %v6336_v61 = vmul.f32 %v6202_v37, %v5917_v19 }
  0xe3   : > { %1761 = vperm.xlu1 %4670, %v5764_v57   ;;  %v6298_v29 = vpop.permute.xlu0 %474  ;;  %9835 = vst [vmem:[#allocation30_spill] sm:$0xff] %v6319_v49  ;;  %9836 = vst [vmem:[#allocation31_spill] sm:$0xff] %v6323_v26  ;;  %v6340_v49 = vmul.f32 %v6223_v31, %v5917_v19  ;;  %v6344_v26 = vmul.f32 %v6240_v16, %v5917_v19  ;;  %v6503_v6 = vmul.f32 %v6254_v55, %v6030_v47 }
  0xe4   : > { %9832 = vst [vmem:[#allocation28_spill] sm:$0xff] %v6310_v51  ;;  %9837 = vst [vmem:[#allocation32_spill] sm:$0xff] %v6327_v28  ;;  %v6331_v51 = vmul.f32 %v6243_v33, %v5898_v39  ;;  %v6348_v28 = vmul.f32 %v6243_v33, %v5917_v19  ;;  %v6352_v39 = vmul.f32 %v6202_v37, %v5938_v27 }
  0xe5   : > { %v6280_v4 = vpop.permute.xlu1 %1709  ;;  %9839 = vst [vmem:[#allocation34_spill] sm:$0xff] %v6336_v61  ;;  %9840 = vst [vmem:[#allocation35_spill] sm:$0xff] %v6340_v49  ;;  %v6360_v61 = vmul.f32 %v6240_v16, %v5938_v27  ;;  %v6364_v49 = vmul.f32 %v6243_v33, %v5938_v27 }
  0xe6   : > { %9838 = vst [vmem:[#allocation33_spill] sm:$0xff] %v6331_v51  ;;  %9841 = vst [vmem:[#allocation36_spill] sm:$0xff] %v6344_v26  ;;  %v6396_v51 = vmul.f32 %v6240_v16, %v5959_v34 }
  0xe7   : > { %4671 = vset.pattern.permute.xlu1 %v9834_v53  ;;  %9842 = vst [vmem:[#allocation37_spill] sm:$0xff] %v6348_v28  ;;  %9843 = vst [vmem:[#allocation38_spill] sm:$0xff] %v6352_v39  ;;  %v6368_v19 = vpop.permute.xlu0 %484  ;;  %v6372_v28 = vmul.f32 %v6229_v10, %v5949_v30  ;;  %v6376_v39 = vmul.f32 %v6237_v7, %v5949_v30 }
  0xe8   : > { %2181 = vperm.xlu1 %4671, %v5764_v57   ;;  %v6356_v57 = vmul.f32 %v6223_v31, %v5938_v27  ;;  %9845 = vst [vmem:[#allocation40_spill] sm:$0xff] %v6360_v61  ;;  %9846 = vst [vmem:[#allocation41_spill] sm:$0xff] %v6364_v49  ;;  %v6384_v27 = vmul.f32 %v6254_v55, %v5949_v30  ;;  %v6388_v49 = vmul.f32 %v6202_v37, %v5959_v34 }
  0xe9   : > { %9847 = vst [vmem:[#allocation42_spill] sm:$0xff] %v6372_v28  ;;  %9848 = vst [vmem:[#allocation43_spill] sm:$0xff] %v6376_v39  ;;  %v6392_v61 = vmul.f32 %v6223_v31, %v5959_v34  ;;  %v6400_v39 = vmul.f32 %v6243_v33, %v5959_v34  ;;  %v6422_v34 = vmul.f32 %v6202_v37, %v5980_v5 }
  0xea   : > { %9844 = vst [vmem:[#allocation39_spill] sm:$0xff] %v6356_v57  ;;  %v6366_v26 = vpop.permute.xlu1 %2129  ;;  %v6380_v57 = vmul.f32 %v6251_v43, %v5949_v30  ;;  %9850 = vst [vmem:[#allocation45_spill] sm:$0xff] %v6384_v27  ;;  %v6405_v30 = vmul.f32 %v6229_v10, %v5970_v38  ;;  %v6466_v27 = vmul.f32 %v6240_v16, %v6005_v56 }
  0xeb   : > { %9851 = vst [vmem:[#allocation46_spill] sm:$0xff] %v6388_v49  ;;  %9852 = vst [vmem:[#allocation47_spill] sm:$0xff] %v6392_v61  ;;  %v6409_v49 = vmul.f32 %v6237_v7, %v5970_v38  ;;  %v6413_v61 = vmul.f32 %v6251_v43, %v5970_v38  ;;  %v6474_v28 = vmul.f32 %v6245_v18, %v6026_v2 }
  0xec   : > { %9849 = vst [vmem:[#allocation44_spill] sm:$0xff] %v6380_v57  ;;  %9853 = vst [vmem:[#allocation48_spill] sm:$0xff] %v6396_v51  ;;  %v9855_v57 = vmov 0   ;;  %v6417_v51 = vmul.f32 %v6254_v55, %v5970_v38  ;;  %v6438_v38 = vmul.f32 %v6245_v18, %v6002_v52 }
  0xed   : > { %9854 = vst [vmem:[#allocation49_spill] sm:$0xff] %v6400_v39  ;;  %4672 = vset.pattern.permute.xlu1 %v9855_v57  ;;  %9856 = vst [vmem:[#allocation50_spill] sm:$0xff] %v6405_v30  ;;  %v6426_v39 = vmul.f32 %v6223_v31, %v5980_v5  ;;  %v6462_v30 = vmul.f32 %v6223_v31, %v6005_v56 }
  0xee   : > { %9857 = vst [vmem:[#allocation51_spill] sm:$0xff] %v6409_v49  ;;  %9858 = vst [vmem:[#allocation52_spill] sm:$0xff] %v6413_v61  ;;  %529 = vperm.xlu1 %4672, %v5865_v54   ;;  %v6430_v49 = vmul.f32 %v6240_v16, %v5980_v5  ;;  %v6434_v61 = vmul.f32 %v6243_v33, %v5980_v5 }
  0xef   : > { %9859 = vst [vmem:[#allocation53_spill] sm:$0xff] %v6417_v51  ;;  %9860 = vst [vmem:[#allocation54_spill] sm:$0xff] %v6422_v34  ;;  %v6442_v51 = vmul.f32 %v6247_v22, %v6002_v52  ;;  %v6446_v34 = vmul.f32 %v6256_v44, %v6002_v52  ;;  %v6454_v5 = vpop.permute.xlu1 %1297 }
  0xf0   : > { %9861 = vst [vmem:[#allocation55_spill] sm:$0xff] %v6426_v39  ;;  %9862 = vst [vmem:[#allocation56_spill] sm:$0xff] %v6430_v49  ;;  %v6450_v39 = vmul.f32 %v6258_v40, %v6002_v52  ;;  %v6452_v49 = vpop.permute.xlu0 %494  ;;  %v6470_v52 = vmul.f32 %v6243_v33, %v6005_v56 }
  0xf1   : > { %9863 = vst [vmem:[#allocation57_spill] sm:$0xff] %v6434_v61  ;;  %v6458_v61 = vmul.f32 %v6202_v37, %v6005_v56  ;;  %9866 = vst [vmem:[#allocation60_spill] sm:$0xff] %v6462_v30  ;;  %v6486_v30 = vmul.f32 %v6258_v40, %v6026_v2  ;;  %v6491_v56 = vmul.f32 %v6229_v10, %v6030_v47 }
  0xf2   : > { %9864 = vst [vmem:[#allocation58_spill] sm:$0xff] %v6450_v39  ;;  %9867 = vst [vmem:[#allocation61_spill] sm:$0xff] %v6466_v27  ;;  %v9872_v27 = vmov 1   ;;  %v6519_v39 = vmul.f32 %v6258_v40, %v6041_v12 }
  0xf3   : > { %9865 = vst [vmem:[#allocation59_spill] sm:$0xff] %v6458_v61  ;;  %9868 = vst [vmem:[#allocation62_spill] sm:$0xff] %v6470_v52  ;;  %v6482_v61 = vmul.f32 %v6256_v44, %v6026_v2  ;;  %4673 = vset.pattern.permute.xlu1 %v9872_v27  ;;  %v6495_v52 = vmul.f32 %v6237_v7, %v6030_v47  ;;  %v6507_v2 = vmul.f32 %v6245_v18, %v6041_v12 }
  0xf4   : > { %9869 = vst [vmem:[#allocation63_spill] sm:$0xff] %v6478_v60  ;;  %9871 = vst [vmem:[#allocation65_spill] sm:$0xff] %v6486_v30  ;;  %v6499_v60 = vmul.f32 %v6251_v43, %v6030_v47  ;;  %v6511_v30 = vmul.f32 %v6247_v22, %v6041_v12  ;;  %1349 = vperm.xlu1 %4673, %v5865_v54   ;;  %v6522_v47 = vpop.permute.xlu0 %504  ;;  %v6538_v12 = vrot.slane %v6234_v11, %v6157_v23  ;;  %v6548_v3 = vpop.permute.xlu1 %2133 }
  0xf5   : > { %9870 = vst [vmem:[#allocation64_spill] sm:$0xff] %v6482_v61  ;;  %9873 = vst [vmem:[#allocation66_spill] sm:$0xff] %v6507_v2  ;;  %v6530_v2 = vmul.f32 %v6237_v7, %v6054_v20  ;;  %v6552_v61 = vmul.f32 %v6254_v55, %v6054_v20  ;;  %v6560_v23 = vmul.f32 %v6256_v44, %v6062_v25 }
  0xf6   : > { %9874 = vst [vmem:[#allocation67_spill] sm:$0xff] %v6511_v30  ;;  %9875 = vst [vmem:[#allocation68_spill] sm:$0xff] %v6515_v13  ;;  %v6534_v30 = vmul.f32 %v6251_v43, %v6054_v20  ;;  %v6546_v13 = vmul.f32 %v6247_v22, %v6062_v25  ;;  %v6572_v20 = vmul.f32 %v6268_v0, %v6079_v59 }
  0xf7   : > { %9876 = vst [vmem:[#allocation69_spill] sm:$0xff] %v6519_v39  ;;  %9877 = vst [vmem:[#allocation70_spill] sm:$0xff] %v6522_v47  ;;  %v6542_v39 = vmul.f32 %v6245_v18, %v6062_v25 }
  0xf8   : > { %9878 = vst [vmem:[#allocation71_spill] sm:$0xff] %v6534_v30  ;;  %9879 = vst [vmem:[#allocation72_spill] sm:$0xff] %v6538_v12  ;;  %v6556_v30 = vrot.slane %v6234_v11, %v6183_v36  ;;  %v6564_v12 = vmul.f32 %v6258_v40, %v6062_v25  ;;  %v6576_v36 = vmul.f32 %v6245_v18, %v6081_v32  ;;  %4674 = vset.pattern.permute.xlu1 %v9834_v53  ;;  %v6583_v25 = vpop.permute.xlu0 %514 }
  0xf9   : > { %9880 = vst [vmem:[#allocation73_spill] sm:$0xff] %v6542_v39  ;;  %9881 = vst [vmem:[#allocation74_spill] sm:$0xff] %v6546_v13  ;;  %v6568_v13 = vmul.f32 %v6262_v14, %v6079_v59  ;;  %v6580_v11 = vmul.f32 %v6247_v22, %v6081_v32  ;;  %2185 = vperm.xlu1 %4674, %v5992_v45   ;;  %v6624_v45 = vmul.f32 %v6254_v55, %v6101_v41 }
  0xfa   : > { %9882 = vst [vmem:[#allocation75_spill] sm:$0xff] %v6556_v30  ;;  %9883 = vst [vmem:[#allocation76_spill] sm:$0xff] %v6560_v23  ;;  %v6587_v30 = vmul.f32 %v6265_v63, %v6079_v59  ;;  %v6595_v23 = vmul.f32 %v6256_v44, %v6081_v32  ;;  %v6632_v39 = vmul.f32 %v6258_v40, %v6106_v46 }
  0xfb   : > { %9884 = vst [vmem:[#allocation77_spill] sm:$0xff] %v6564_v12  ;;  %9885 = vst [vmem:[#allocation78_spill] sm:$0xff] %v6576_v36  ;;  %v6591_v12 = vmul.f32 %v6271_v48, %v6079_v59  ;;  %v6599_v36 = vmul.f32 %v6258_v40, %v6081_v32  ;;  %v6612_v59 = vmul.f32 %v6245_v18, %v6106_v46 }
  0xfc   : > { %9886 = vst [vmem:[#allocation79_spill] sm:$0xff] %v6580_v11  ;;  %9887 = vst [vmem:[#allocation80_spill] sm:$0xff] %v6583_v25  ;;  %v6604_v25 = vmul.f32 %v6229_v10, %v6101_v41  ;;  %v6608_v11 = vmul.f32 %v6237_v7, %v6101_v41  ;;  %v6620_v32 = vmul.f32 %v6251_v43, %v6101_v41  ;;  %v6644_v41 = vpop.permute.xlu0 %519 }
  0xfd   : > { %9888 = vst [vmem:[#allocation81_spill] sm:$0xff] %v6587_v30  ;;  %9889 = vst [vmem:[#allocation82_spill] sm:$0xff] %v6591_v12  ;;  %v6642_v12 = vmul.f32 %v6256_v44, %v6121_v62  ;;  %v6706_v30 = vmul.f32 %v6245_v18, %v6180_v35 }
  0xfe   : > { %9890 = vst [vmem:[#allocation83_spill] sm:$0xff] %v6595_v23  ;;  %9891 = vst [vmem:[#allocation84_spill] sm:$0xff] %v6599_v36  ;;  %v6616_v23 = vmul.f32 %v6247_v22, %v6106_v46  ;;  %v6628_v36 = vmul.f32 %v6256_v44, %v6106_v46  ;;  %v6652_v46 = vmul.f32 %v6223_v31, %v6132_v1 }
  0xff   : > { %9892 = vst [vmem:[#allocation85_spill] sm:$0xff] %v6604_v25  ;;  %9893 = vst [vmem:[#allocation86_spill] sm:$0xff] %v6608_v11  ;;  %v6710_v11 = vmul.f32 %v6256_v44, %v6180_v35  ;;  %v6734_v25 = vmul.f32 %v6262_v14, %v6217_v21 }
 0x100   : > { %9894 = vst [vmem:[#allocation87_spill] sm:$0xff] %v6612_v59  ;;  %9895 = vst [vmem:[#allocation88_spill] sm:$0xff] %v6616_v23  ;;  %v6634_v59 = vpop.permute.xlu1 %1301  ;;  %v6638_v23 = vmul.f32 %v6245_v18, %v6121_v62 }
 0x101   : > { %9896 = vst [vmem:[#allocation89_spill] sm:$0xff] %v6620_v32  ;;  %9897 = vst [vmem:[#allocation90_spill] sm:$0xff] %v6624_v45  ;;  %v6648_v45 = vmul.f32 %v6202_v37, %v6132_v1  ;;  %v6673_v32 = vmul.f32 %v6229_v10, %v6143_v15 }
 0x102   : > { %9898 = vst [vmem:[#allocation91_spill] sm:$0xff] %v6628_v36  ;;  %9899 = vst [vmem:[#allocation92_spill] sm:$0xff] %v6632_v39  ;;  %v6656_v39 = vmul.f32 %v6247_v22, %v6121_v62  ;;  %v6660_v36 = vmul.f32 %v6258_v40, %v6121_v62  ;;  %v6682_v62 = vmul.f32 %v6202_v37, %v6154_v17 }
 0x103   : > { %9900 = vst [vmem:[#allocation93_spill] sm:$0xff] %v6638_v23  ;;  %9901 = vst [vmem:[#allocation94_spill] sm:$0xff] %v6642_v12  ;;  %v9905_v23 = vmov 2   ;;  %v6669_v12 = vmul.f32 %v6243_v33, %v6132_v1 }
 0x104   : > { %9902 = vst [vmem:[#allocation95_spill] sm:$0xff] %v6644_v41  ;;  %9903 = vst [vmem:[#allocation96_spill] sm:$0xff] %v6656_v39  ;;  %4676 = vset.pattern.permute.xlu1 %v9905_v23  ;;  %v6665_v41 = vmul.f32 %v6240_v16, %v6132_v1  ;;  %v6677_v39 = vmul.f32 %v6237_v7, %v6143_v15  ;;  %v6690_v1 = vmul.f32 %v6251_v43, %v6143_v15 }
 0x105   : > { %9904 = vst [vmem:[#allocation97_spill] sm:$0xff] %v6660_v36  ;;  %9906 = vst [vmem:[#allocation98_spill] sm:$0xff] %v6673_v32  ;;  %1769 = vperm.xlu1 %4676, %v5865_v54   ;;  %v6686_v36 = vmul.f32 %v6223_v31, %v6154_v17  ;;  %v6694_v32 = vmul.f32 %v6254_v55, %v6143_v15  ;;  %v6702_v54 = vmul.f32 %v6243_v33, %v6154_v17  ;;  %v6714_v15 = vpop.permute.xlu0 %534 }
 0x106   : > { %9907 = vst [vmem:[#allocation99_spill] sm:$0xff] %v6677_v39  ;;  %9908 = vst [vmem:[#allocation100_spill] sm:$0xff] %v6690_v1  ;;  %v6698_v39 = vmul.f32 %v6240_v16, %v6154_v17  ;;  %v6712_v1 = vpop.permute.xlu1 %1721  ;;  %v6722_v17 = vmul.f32 %v6258_v40, %v6180_v35 }
 0x107   : > { %9909 = vst [vmem:[#allocation101_spill] sm:$0xff] %v6694_v32  ;;  %9910 = vst [vmem:[#allocation102_spill] sm:$0xff] %v6706_v30  ;;  %v6718_v32 = vmul.f32 %v6247_v22, %v6180_v35  ;;  %v6726_v30 = vmul.f32 %v6202_v37, %v6190_v42  ;;  %v6742_v35 = vmul.f32 %v6240_v16, %v6190_v42 }
 0x108   : > { %9911 = vst [vmem:[#allocation103_spill] sm:$0xff] %v6710_v11  ;;  %9912 = vst [vmem:[#allocation104_spill] sm:$0xff] %v6714_v15  ;;  %v6730_v11 = vmul.f32 %v6223_v31, %v6190_v42  ;;  %v6738_v15 = vmul.f32 %v6268_v0, %v6217_v21 }
 0x109   : > { %9913 = vst [vmem:[#allocation105_spill] sm:$0xff] %v6718_v32  ;;  %9914 = vst [vmem:[#allocation106_spill] sm:$0xff] %v6722_v17  ;;  %v6746_v17 = vmul.f32 %v6243_v33, %v6190_v42  ;;  %4677 = vset.pattern.permute.xlu1 %v9872_v27  ;;  %v6751_v32 = vmul.f32 %v6265_v63, %v6217_v21  ;;  %v6766_v42 = vld [vmem:[%s5466_s15 + $0xa0] sm:$0xff] }
 0x10a   : > { %9915 = vst [vmem:[#allocation107_spill] sm:$0xff] %v6734_v25  ;;  %9916 = vst [vmem:[#allocation108_spill] sm:$0xff] %v6738_v15  ;;  %v6755_v25 = vmul.f32 %v6271_v48, %v6217_v21  ;;  %v6759_v15 = vmul.f32 %v6202_v37, %v6226_v9  ;;  %1353 = vperm.xlu1 %4677, %v6766_v42   ;;  %v6775_v21 = vmul.f32 %v6256_v44, %v6280_v4 }
 0x10b   : > { %9917 = vst [vmem:[#allocation109_spill] sm:$0xff] %v6742_v35  ;;  %9918 = vst [vmem:[#allocation110_spill] sm:$0xff] %v6746_v17  ;;  %v6763_v35 = vmul.f32 %v6223_v31, %v6226_v9  ;;  %v6771_v17 = vmul.f32 %v6245_v18, %v6280_v4 }
 0x10c   : > { %9919 = vst [vmem:[#allocation111_spill] sm:$0xff] %v6751_v32  ;;  %9920 = vst [vmem:[#allocation112_spill] sm:$0xff] %v6755_v25  ;;  %v6779_v25 = vmul.f32 %v6240_v16, %v6226_v9  ;;  %v6791_v32 = vmul.f32 %v6258_v40, %v6280_v4 }
 0x10d   : > { %9921 = vst [vmem:[#allocation113_spill] sm:$0xff] %v6759_v15  ;;  %9922 = vst [vmem:[#allocation114_spill] sm:$0xff] %v6763_v35  ;;  %v6783_v15 = vmul.f32 %v6243_v33, %v6226_v9  ;;  %v6787_v35 = vmul.f32 %v6247_v22, %v6280_v4  ;;  %v6803_v9 = vmul.f32 %v6262_v14, %v6366_v26 }
 0x10e   : > { %9923 = vst [vmem:[#allocation115_spill] sm:$0xff] %v6771_v17  ;;  %9924 = vst [vmem:[#allocation116_spill] sm:$0xff] %v6775_v21  ;;  %v6795_v17 = vmul.f32 %v6202_v37, %v6298_v29  ;;  %v6799_v21 = vmul.f32 %v6223_v31, %v6298_v29  ;;  %v6811_v4 = vmul.f32 %v6240_v16, %v6298_v29  ;;  %4678 = vset.pattern.permute.xlu1 %v9855_v57 }
 0x10f   : > { %9925 = vst [vmem:[#allocation117_spill] sm:$0xff] %v6779_v25  ;;  %9926 = vst [vmem:[#allocation118_spill] sm:$0xff] %v6783_v15  ;;  %v2118_v25 = vpop.permute.xlu0 %2117  ;;  %v6807_v15 = vmul.f32 %v6268_v0, %v6366_v26  ;;  %539 = vperm.xlu1 %4678, %v6010_v58  }
 0x110   : > { %9927 = vst [vmem:[#allocation119_spill] sm:$0xff] %v6787_v35  ;;  %9928 = vst [vmem:[#allocation120_spill] sm:$0xff] %v6791_v32  ;;  %v1306_v32 = vpop.permute.xlu1 %1305  ;;  %v6823_v35 = vmul.f32 %v6271_v48, %v6366_v26 }
 0x111   : > { %9929 = vst [vmem:[#allocation121_spill] sm:$0xff] %v6795_v17  ;;  %9930 = vst [vmem:[#allocation122_spill] sm:$0xff] %v6799_v21  ;;  %v6815_v17 = vmul.f32 %v6243_v33, %v6298_v29  ;;  %v6819_v21 = vmul.f32 %v6265_v63, %v6366_v26  ;;  %v6836_v29 = vmul.f32 %v6229_v10, %v6454_v5 }
 0x112   : > { %9931 = vst [vmem:[#allocation123_spill] sm:$0xff] %v6807_v15  ;;  %9932 = vst [vmem:[#allocation124_spill] sm:$0xff] %v6811_v4  ;;  %v6827_v15 = vmul.f32 %v6202_v37, %v6368_v19  ;;  %v6831_v4 = vmul.f32 %v6223_v31, %v6368_v19  ;;  %v6844_v26 = vmul.f32 %v6240_v16, %v6368_v19 }
 0x113   : > { %9933 = vst [vmem:[#allocation125_spill] sm:$0xff] %v6815_v17  ;;  %9934 = vst [vmem:[#allocation126_spill] sm:$0xff] %v6819_v21  ;;  %v6840_v17 = vmul.f32 %v6237_v7, %v6454_v5  ;;  %v6861_v21 = vmul.f32 %v6202_v37, %v6452_v49  ;;  %4679 = vset.pattern.permute.xlu1 %v9905_v23 }
 0x114   : > { %9935 = vst [vmem:[#allocation127_spill] sm:$0xff] %v6823_v35  ;;  %9936 = vst [vmem:[#allocation128_spill] sm:$0xff] %v6827_v15  ;;  %v6848_v15 = vmul.f32 %v6243_v33, %v6368_v19  ;;  %v6857_v35 = vmul.f32 %v6254_v55, %v6454_v5  ;;  %v2122_v19 = vpop.permute.xlu0 %2121  ;;  %1773 = vperm.xlu1 %4679, %v6766_v42  }
 0x115   : > { %9937 = vst [vmem:[#allocation129_spill] sm:$0xff] %v6831_v4  ;;  %9938 = vst [vmem:[#allocation130_spill] sm:$0xff] %v6844_v26  ;;  %v6853_v4 = vmul.f32 %v6251_v43, %v6454_v5  ;;  %v6865_v26 = vmul.f32 %v6223_v31, %v6452_v49  ;;  %v6877_v5 = vmul.f32 %v6265_v63, %v6548_v3 }
 0x116   : > { %9939 = vst [vmem:[#allocation131_spill] sm:$0xff] %v6848_v15  ;;  %9941 = vst [vmem:[#allocation133_spill] sm:$0xff] %v6857_v35  ;;  %v6869_v15 = vmul.f32 %v6262_v14, %v6548_v3  ;;  %v6889_v35 = vmul.f32 %v6237_v7, %v6634_v59 }
 0x117   : > { %9940 = vst [vmem:[#allocation132_spill] sm:$0xff] %v6853_v4  ;;  %9942 = vst [vmem:[#allocation134_spill] sm:$0xff] %v6861_v21  ;;  %v6873_v4 = vmul.f32 %v6268_v0, %v6548_v3  ;;  %v6881_v21 = vmul.f32 %v6271_v48, %v6548_v3  ;;  %v6901_v3 = vmul.f32 %v6245_v18, %v6712_v1 }
 0x118   : > { %9943 = vst [vmem:[#allocation135_spill] sm:$0xff] %v6865_v26  ;;  %9944 = vst [vmem:[#allocation136_spill] sm:$0xff] %v6869_v15  ;;  %v6885_v26 = vmul.f32 %v6229_v10, %v6634_v59  ;;  %v6893_v15 = vmul.f32 %v6240_v16, %v6452_v49  ;;  %v6913_v16 = vmul.f32 %v6254_v55, %v6634_v59  ;;  %4680 = vset.pattern.permute.xlu1 %v9834_v53 }
 0x119   : > { %9945 = vst [vmem:[#allocation137_spill] sm:$0xff] %v6873_v4  ;;  %9946 = vst [vmem:[#allocation138_spill] sm:$0xff] %v6881_v21  ;;  %v6897_v4 = vmul.f32 %v6243_v33, %v6452_v49  ;;  %v6905_v21 = vmul.f32 %v6256_v44, %v6712_v1  ;;  %v6919_v49 = vmul.f32 %v6265_v63, %v2118_v25  ;;  %v1726_v33 = vpop.permute.xlu1 %1725  ;;  %2193 = vperm.xlu1 %4680, %v6766_v42  }
 0x11a   : > { %9947 = vst [vmem:[#allocation139_spill] sm:$0xff] %v6885_v26  ;;  %9948 = vst [vmem:[#allocation140_spill] sm:$0xff] %v6889_v35  ;;  %v6909_v26 = vmul.f32 %v6251_v43, %v6634_v59  ;;  %v6931_v59 = vmul.f32 %v6268_v0, %v2118_v25  ;;  %v824_v35 = vpop.f32.mrb[0].mxu0 }
 0x11b   : > { %9949 = vst [vmem:[#allocation141_spill] sm:$0xff] %v6893_v15  ;;  %9950 = vst [vmem:[#allocation142_spill] sm:$0xff] %v6897_v4  ;;  %v6916_v15 = vmul.f32 %v6262_v14, %v2118_v25  ;;  %v6924_v4 = vmul.f32 %v6247_v22, %v6712_v1 }
 0x11c   : > { %9951 = vst [vmem:[#allocation143_spill] sm:$0xff] %v6901_v3  ;;  %9952 = vst [vmem:[#allocation144_spill] sm:$0xff] %v6905_v21  ;;  %v6928_v21 = vmul.f32 %v6258_v40, %v6712_v1  ;;  %v6934_v3 = vmul.f32 %v6271_v48, %v2118_v25  ;;  %v6944_v1 = vmul.f32 %v6251_v43, %v1306_v32 }
 0x11d   : > { %9953 = vst [vmem:[#allocation145_spill] sm:$0xff] %v6909_v26  ;;  %9954 = vst [vmem:[#allocation146_spill] sm:$0xff] %v6913_v16  ;;  %v6938_v16 = vmul.f32 %v6229_v10, %v1306_v32  ;;  %v6941_v26 = vmul.f32 %v6237_v7, %v1306_v32  ;;  %v6951_v25 = vmul.f32 %v6202_v37, %v6522_v47  ;;  %4681 = vset.pattern.permute.xlu1 %v9855_v57 }
 0x11e   : > { %9955 = vst [vmem:[#allocation147_spill] sm:$0xff] %v6924_v4  ;;  %9956 = vst [vmem:[#allocation148_spill] sm:$0xff] %v6928_v21  ;;  %v2138_v4 = vpop.permute.xlu0 %2137  ;;  %v6947_v21 = vmul.f32 %v6254_v55, %v1306_v32  ;;  %v6955_v10 = vmul.f32 %v6223_v31, %v6522_v47  ;;  %v6958_v7 = vmul.f32 %v6262_v14, %v2122_v19  ;;  %v1081_v55 = vpop.f32.mrb[0].mxu1 }
 0x11f   : > { %9957 = vst [vmem:[#allocation149_spill] sm:$0xff] %v6938_v16  ;;  %9958 = vst [vmem:[#allocation150_spill] sm:$0xff] %v6941_v26  ;;  %v6961_v26 = vmul.f32 %v6265_v63, %v2122_v19  ;;  %v6964_v43 = vmul.f32 %v6268_v0, %v2122_v19  ;;  %v825_v32 = vadd.f32 %v824_v35, %v6648_v45  ;;  %v1083_v31 = vpop.f32.mrb[1].mxu1 }
 0x120   : > { %9959 = vst [vmem:[#allocation151_spill] sm:$0xff] %v6944_v1  ;;  %9960 = vst [vmem:[#allocation152_spill] sm:$0xff] %v6947_v21  ;;  %v6968_v21 = vmul.f32 %v6271_v48, %v2122_v19  ;;  %v1082_v37 = vadd.f32 %v1081_v55, %v6652_v46  ;;  %v6975_v47 = vmul.f32 %v6256_v44, %v1726_v33  ;;  %v6978_v1 = vld [vmem:[%s5466_s15 + $0xd0] sm:$0xff]  ;;  %v2146_v19 = vpop.permute.xlu1 %2145 }
 0x121   : > { %9961 = vst [vmem:[#allocation153_spill] sm:$0xff] %v6951_v25  ;;  %9962 = vst [vmem:[#allocation154_spill] sm:$0xff] %v6955_v10  ;;  %v826_v25 = vpop.f32.mrb[1].mxu0  ;;  %v6972_v10 = vmul.f32 %v6245_v18, %v1726_v33  ;;  %v1564_v16 = vadd.f32 %v6491_v56, %v825_v32  ;;  %v6984_v35 = vmul.f32 %v6247_v22, %v1726_v33  ;;  %564 = vperm.xlu0 %4700, %v6978_v1  }
 0x122   : > { %9963 = vst [vmem:[#allocation155_spill] sm:$0xff] %v6975_v47  ;;  %9964 = vst [vmem:[#allocation156_spill] sm:$0xff] %v6978_v1  ;;  %v827_v45 = vadd.f32 %v826_v25, %v6665_v41  ;;  %v6987_v55 = vmul.f32 %v6258_v40, %v1726_v33  ;;  %v1566_v46 = vadd.f32 %v6495_v52, %v1082_v37  ;;  %v830_v41 = vpop.f32.mrb[2].mxu0  ;;  %v9974_v1 = vld [vmem:[#allocation23_spill] sm:$0xff] }
 0x123   : > { %9965 = vst [vmem:[#allocation157_spill] sm:$0xff] %v6984_v35  ;;  %v1084_v44 = vadd.f32 %v1083_v31, %v6669_v12  ;;  %v6992_v47 = vmul.f32 %v6262_v14, %v2138_v4  ;;  %v6995_v56 = vmul.f32 %v6265_v63, %v2138_v4  ;;  %v1984_v25 = vadd.f32 %v6438_v38, %v1564_v16  ;;  %v1087_v31 = vpop.f32.mrb[2].mxu1  ;;  %v832_v52 = vpop.f32.mrb[3].mxu0 }
 0x124   : > { %9966 = vst [vmem:[#allocation158_spill] sm:$0xff] %v6987_v55  ;;  %v7000_v32 = vmul.f32 %v6268_v0, %v2138_v4  ;;  %v7003_v33 = vmul.f32 %v6271_v48, %v2138_v4  ;;  %v831_v37 = vadd.f32 %v830_v41, %v6682_v62  ;;  %v1986_v12 = vadd.f32 %v6446_v34, %v1566_v46  ;;  %v1089_v38 = vpop.f32.mrb[3].mxu1  ;;  %v2142_v35 = vpop.permute.xlu0 %2141 }
 0x125   : > { %v1565_v55 = vadd.f32 %v6499_v60, %v827_v45  ;;  %v1088_v42 = vadd.f32 %v1087_v31, %v6686_v36  ;;  %v833_v16 = vadd.f32 %v832_v52, %v6698_v39  ;;  %v2404_v4 = vadd.f32 %v6568_v13, %v1984_v25  ;;  %v836_v45 = vpop.f32.mrb[4].mxu0  ;;  %v1093_v46 = vpop.f32.mrb[4].mxu1  ;;  %v7029_v25 = vld [vmem:[%s5466_s15 + $0xb0] sm:$0xff] }
 0x126   : > { %v1568_v40 = vadd.f32 %v6526_v24, %v831_v37  ;;  %v7014_v62 = vmul.f32 %v6262_v14, %v2146_v19  ;;  %v7017_v41 = vmul.f32 %v6268_v0, %v2146_v19  ;;  %v2406_v34 = vadd.f32 %v6572_v20, %v1986_v12  ;;  %544 = vperm.xlu1 %4681, %v7029_v25   ;;  %v838_v20 = vpop.f32.mrb[5].mxu0  ;;  %v9971_v37 = vld [vmem:[#allocation64_spill] sm:$0xff]  ;;  %v1095_v52 = vpop.f32.mrb[5].mxu1 }
 0x127   : > { %v1567_v60 = vadd.f32 %v6503_v6, %v1084_v44  ;;  %v1570_v36 = vadd.f32 %v6530_v2, %v1088_v42  ;;  %v1090_v39 = vadd.f32 %v1089_v38, %v6702_v54  ;;  %v7025_v13 = vadd.f32 %v6275_v8, %v2404_v4  ;;  %v9973_v38 = vld [vmem:[#allocation22_spill] sm:$0xff] }
 0x128   : > { %9967 = vst [vmem:[#allocation159_spill] sm:$0xff] %v7014_v62  ;;  %9968 = vst [vmem:[#allocation160_spill] sm:$0xff] %v7017_v41  ;;  %v1988_v24 = vadd.f32 %v6474_v28, %v1568_v40  ;;  %v7033_v44 = vmul.f32 %v6265_v63, %v2146_v19  ;;  %v7036_v6 = vmul.f32 %v6271_v48, %v2146_v19  ;;  %v9972_v28 = vld [vmem:[#allocation71_spill] sm:$0xff]  ;;  %v9988_v41 = vld [vmem:[#allocation89_spill] sm:$0xff] }
 0x129   : > { %v7039_v2 = vadd.f32 %v6278_v50, %v2406_v34  ;;  %v1985_v54 = vadd.f32 %v6442_v51, %v1565_v55  ;;  %v1990_v40 = vadd.f32 %v9971_v37, %v1570_v36  ;;  %v1569_v31 = vadd.f32 %v9972_v28, %v833_v16  ;;  %v2158_v55 = vpop.permute.xlu0 %2157  ;;  %v842_v16 = vpop.f32.mrb[6].mxu0  ;;  %v427_v36 = vld [vmem:[%s5466_s15 + $0xe8] sm:$0xff]  ;;  %v9977_v37 = vld [vmem:[#allocation85_spill] sm:$0xff]  ;;  %v9979_v28 = vld [vmem:[#allocation24_spill] sm:$0xff] }
 0x12a   : > { %9969 = vst [vmem:[#allocation161_spill] sm:$0xff] %v7033_v44  ;;  %9970 = vst [vmem:[#allocation162_spill] sm:$0xff] %v7036_v6  ;;  %v4228_v12 = vmul.f32 -1.442695, %v7025_v13  ;;  %v1571_v42 = vadd.f32 %v6552_v61, %v1090_v39  ;;  %v837_v4 = vadd.f32 %v836_v45, %v9973_v38  ;;  %v1094_v19 = vadd.f32 %v1093_v46, %v9974_v1  ;;  %v9975_v6 = vld [vmem:[#allocation58_spill] sm:$0xff]  ;;  %v1099_v46 = vpop.f32.mrb[6].mxu1  ;;  %v7067_v44 = vpop.permute.xlu1 %1729 }
 0x12b   : > { %v4230_v8 = vmul.f32 -1.442695, %v7039_v2  ;;  %v1987_v34 = vadd.f32 %v9975_v6, %v1567_v60  ;;  %v7051_v50 = vmul.f32 %v6262_v14, %v2142_v35  ;;  %v7054_v51 = vmul.f32 %v6265_v63, %v2142_v35  ;;  %v9978_v39 = vld [vmem:[#allocation86_spill] sm:$0xff]  ;;  %4682 = vset.pattern.permute.xlu1 %v9872_v27  ;;  %v844_v60 = vpop.f32.mrb[7].mxu0  ;;  %579 = vperm.xlu0 %4700, %v427_v36   ;;  %v9987_v36 = vld [vmem:[#allocation65_spill] sm:$0xff] }
 0x12c   : > { %4715 = vpow2.f32 %v4228_v12  ;;  %v1572_v61 = vadd.f32 %v9977_v37, %v837_v4  ;;  %v1574_v45 = vadd.f32 %v9978_v39, %v1094_v19  ;;  %v839_v1 = vadd.f32 %v838_v20, %v9979_v28  ;;  %9982 = vst [vmem:[#allocation23_spill] sm:$0xff] %v7067_v44  ;;  %v9983_v12 = vld [vmem:[#allocation25_spill] sm:$0xff]  ;;  %v1101_v37 = vpop.f32.mrb[7].mxu1  ;;  %1361 = vperm.xlu1 %4682, %v7029_v25   ;;  %v9986_v39 = vld [vmem:[#allocation63_spill] sm:$0xff] }
 0x12d   : > { %9976 = vst [vmem:[#allocation64_spill] sm:$0xff] %v7054_v51  ;;  %4717 = vpow2.f32 %v4230_v8  ;;  %v7062_v6 = vmul.f32 %v6268_v0, %v2142_v35  ;;  %v7065_v38 = vmul.f32 %v6271_v48, %v2142_v35  ;;  %v1096_v4 = vadd.f32 %v1095_v52, %v9983_v12  ;;  %v9984_v20 = vld [vmem:[#allocation81_spill] sm:$0xff]  ;;  %v9989_v51 = vld [vmem:[#allocation82_spill] sm:$0xff] }
 0x12e   : > { %v7072_v19 = vadd.f32 %v9984_v20, %v1985_v54  ;;  %v1989_v28 = vadd.f32 %v9986_v39, %v1569_v31  ;;  %v1991_v8 = vadd.f32 %v9987_v36, %v1571_v42  ;;  %v1573_v62 = vadd.f32 %v9988_v41, %v839_v1  ;;  %v9992_v12 = vld [vmem:[#allocation26_spill] sm:$0xff]  ;;  %v9993_v54 = vld [vmem:[#allocation93_spill] sm:$0xff]  ;;  %v9996_v36 = vld [vmem:[#allocation27_spill] sm:$0xff] }
 0x12f   : > { %9980 = vst [vmem:[#allocation71_spill] sm:$0xff] %v7062_v6  ;;  %9981 = vst [vmem:[#allocation22_spill] sm:$0xff] %v7065_v38  ;;  %v7078_v6 = vadd.f32 %v9989_v51, %v1987_v34  ;;  %v7081_v35 = vadd.f32 %v6916_v15, %v1988_v24  ;;  %v7084_v52 = vadd.f32 %v6931_v59, %v1990_v40  ;;  %v848_v38 = vpop.f32.mrb[8].mxu0  ;;  %v9995_v39 = vld [vmem:[#allocation90_spill] sm:$0xff]  ;;  %v1105_v34 = vpop.f32.mrb[8].mxu1  ;;  %4703 = vset.pattern.permute.xlu0 %v9834_v53  ;;  %v9997_v15 = vld [vmem:[#allocation96_spill] sm:$0xff] }
 0x130   : > { %9985 = vst [vmem:[#allocation58_spill] sm:$0xff] %v7072_v19  ;;  %v843_v44 = vadd.f32 %v842_v16, %v9992_v12  ;;  %v1992_v20 = vadd.f32 %v9993_v54, %v1572_v61  ;;  %v9994_v19 = vld [vmem:[#allocation94_spill] sm:$0xff]  ;;  %v1575_v42 = vadd.f32 %v9995_v39, %v1096_v4  ;;  %v1100_v41 = vadd.f32 %v1099_v46, %v9996_v36  ;;  %v850_v51 = vpop.f32.mrb[9].mxu0  ;;  %v9999_v1 = vld [vmem:[#allocation28_spill] sm:$0xff]  ;;  %v10000_v12 = vld [vmem:[#allocation29_spill] sm:$0xff]  ;;  %v2162_v61 = vpop.permute.xlu0 %2161 }
 0x131   : > { %9990 = vst [vmem:[#allocation85_spill] sm:$0xff] %v7081_v35  ;;  %9991 = vst [vmem:[#allocation86_spill] sm:$0xff] %v7084_v52  ;;  %v1994_v31 = vadd.f32 %v9994_v19, %v1574_v45  ;;  %v1993_v24 = vadd.f32 %v9997_v15, %v1573_v62  ;;  %v9998_v59 = vld [vmem:[#allocation98_spill] sm:$0xff]  ;;  %v845_v16 = vadd.f32 %v844_v60, %v9999_v1  ;;  %v1107_v54 = vpop.f32.mrb[9].mxu1  ;;  %4683 = vset.pattern.permute.xlu1 %v9834_v53  ;;  %v10002_v62 = vld [vmem:[#allocation99_spill] sm:$0xff]  ;;  %v854_v36 = vpop.f32.mrb[10].mxu0 }
 0x132   : > { %v1576_v40 = vadd.f32 %v9998_v59, %v843_v44  ;;  %v1102_v52 = vadd.f32 %v1101_v37, %v10000_v12  ;;  %v7098_v45 = vadd.f32 %v6919_v49, %v1989_v28  ;;  %v7101_v46 = vadd.f32 %v6934_v3, %v1991_v8  ;;  %2197 = vperm.xlu1 %4683, %v6010_v58   ;;  %v7109_v44 = vld [vmem:[%s5466_s15 + $0xc8] sm:$0xff]  ;;  %v7117_v49 = vpop.permute.xlu1 %2149  ;;  %v10005_v28 = vld [vmem:[#allocation100_spill] sm:$0xff]  ;;  %v10006_v8 = vld [vmem:[#allocation101_spill] sm:$0xff]  ;;  %v1111_v1 = vpop.f32.mrb[10].mxu1 }
 0x133   : > { %v7104_v4 = vmul.f32 %v6262_v14, %v2158_v55  ;;  %v1578_v19 = vadd.f32 %v10002_v62, %v1100_v41  ;;  %v7112_v60 = vmul.f32 %v6265_v63, %v2158_v55  ;;  %v7115_v37 = vmul.f32 %v6268_v0, %v2158_v55  ;;  %2213 = vperm.xlu0 %4703, %v7109_v44   ;;  %v10012_v62 = vld [vmem:[#allocation102_spill] sm:$0xff]  ;;  %v10054_v35 = vld [vmem:[#allocation68_spill] sm:$0xff] }
 0x134   : > { %v1577_v3 = vadd.f32 %v10005_v28, %v845_v16  ;;  %v1579_v39 = vadd.f32 %v10006_v8, %v1102_v52  ;;  %v7123_v41 = vadd.f32 %v6958_v7, %v1992_v20  ;;  %v7126_v58 = vadd.f32 %v6964_v43, %v1994_v31  ;;  %v10011_v16 = vld [vmem:[#allocation97_spill] sm:$0xff]  ;;  %v856_v7 = vpop.f32.mrb[11].mxu0  ;;  %v1113_v20 = vpop.f32.mrb[11].mxu1  ;;  %v10013_v43 = vld [vmem:[#allocation103_spill] sm:$0xff] }
 0x135   : > { %10001 = vst [vmem:[#allocation24_spill] sm:$0xff] %v7104_v4  ;;  %10003 = vst [vmem:[#allocation25_spill] sm:$0xff] %v7112_v60  ;;  %v7129_v15 = vmul.f32 %v6271_v48, %v2158_v55  ;;  %v849_v59 = vadd.f32 %v848_v38, %v6726_v30  ;;  %v7133_v12 = vadd.f32 %v6961_v26, %v1993_v24  ;;  %v10016_v30 = vld [vmem:[#allocation110_spill] sm:$0xff] }
 0x136   : > { %10004 = vst [vmem:[#allocation81_spill] sm:$0xff] %v7115_v37  ;;  %10007 = vst [vmem:[#allocation63_spill] sm:$0xff] %v7123_v41  ;;  %v1995_v52 = vadd.f32 %v10011_v16, %v1575_v42  ;;  %v1996_v28 = vadd.f32 %v10012_v62, %v1576_v40  ;;  %v1106_v8 = vadd.f32 %v1105_v34, %v6730_v11  ;;  %v4716_v60 = vpop.eup %4715  ;;  %4684 = vset.pattern.permute.xlu1 %v9905_v23  ;;  %v10017_v42 = vld [vmem:[#allocation105_spill] sm:$0xff]  ;;  %v10018_v40 = vld [vmem:[#allocation106_spill] sm:$0xff]  ;;  %v7146_v37 = vpop.permute.xlu0 %2177 }
 0x137   : > { %10008 = vst [vmem:[#allocation65_spill] sm:$0xff] %v7126_v58  ;;  %10009 = vst [vmem:[#allocation89_spill] sm:$0xff] %v7129_v15  ;;  %v1998_v31 = vadd.f32 %v10013_v43, %v1578_v19  ;;  %v10014_v58 = vld [vmem:[#allocation42_spill] sm:$0xff]  ;;  %v10015_v15 = vld [vmem:[#allocation109_spill] sm:$0xff]  ;;  %v1108_v38 = vadd.f32 %v1107_v54, %v10016_v30  ;;  %v4718_v26 = vpop.eup %4717  ;;  %v3066_v24 = vadd.f32 1.0, %v4716_v60  ;;  %v1997_v16 = vadd.f32 %v10017_v42, %v1577_v3  ;;  %v860_v19 = vpop.f32.mrb[12].mxu0 }
 0x138   : > { %10010 = vst [vmem:[#allocation82_spill] sm:$0xff] %v7133_v12  ;;  %v1580_v55 = vadd.f32 %v10014_v58, %v849_v59  ;;  %v851_v41 = vadd.f32 %v850_v51, %v10015_v15  ;;  %v1999_v62 = vadd.f32 %v10018_v40, %v1579_v39  ;;  %v10019_v11 = vld [vmem:[#allocation43_spill] sm:$0xff]  ;;  %1781 = vperm.xlu1 %4684, %v7029_v25   ;;  %v3068_v58 = vadd.f32 1.0, %v4718_v26  ;;  %v10021_v54 = vld [vmem:[#allocation44_spill] sm:$0xff]  ;;  %v10022_v59 = vld [vmem:[#allocation45_spill] sm:$0xff]  ;;  %v1117_v60 = vpop.f32.mrb[12].mxu1  ;;  %v7163_v25 = vpop.permute.xlu1 %1317 }
 0x139   : > { %v1582_v34 = vadd.f32 %v10019_v11, %v1106_v8  ;;  %v7150_v51 = vmul.f32 %v6262_v14, %v2162_v61  ;;  %v1583_v43 = vadd.f32 %v10022_v59, %v1108_v38  ;;  %v862_v30 = vpop.f32.mrb[13].mxu0  ;;  %v7155_v3 = vadd.f32 %v6968_v21, %v1995_v52  ;;  %v10026_v26 = vld [vmem:[#allocation115_spill] sm:$0xff]  ;;  %v1119_v40 = vpop.f32.mrb[13].mxu1  ;;  %v10029_v38 = vld [vmem:[#allocation108_spill] sm:$0xff]  ;;  %v10052_v12 = vld [vmem:[#allocation113_spill] sm:$0xff] }
 0x13a   : > { %v1581_v15 = vadd.f32 %v10021_v54, %v851_v41  ;;  %v7158_v39 = vmul.f32 %v6265_v63, %v2162_v61  ;;  %v7161_v8 = vmul.f32 %v6268_v0, %v2162_v61  ;;  %v2000_v42 = vadd.f32 %v10026_v26, %v1580_v55  ;;  %v10027_v41 = vld [vmem:[#allocation107_spill] sm:$0xff] }
 0x13b   : > { %10020 = vst [vmem:[#allocation26_spill] sm:$0xff] %v7150_v51  ;;  %10023 = vst [vmem:[#allocation93_spill] sm:$0xff] %v7155_v3  ;;  %4719 = vrcp.f32 %v3066_v24  ;;  %v7167_v11 = vadd.f32 %v10027_v41, %v1996_v28  ;;  %v7170_v54 = vadd.f32 %v10029_v38, %v1998_v31  ;;  %v7173_v21 = vmul.f32 %v6271_v48, %v2162_v61  ;;  %v10032_v52 = vld [vmem:[#allocation111_spill] sm:$0xff]  ;;  %v10036_v51 = vld [vmem:[#allocation30_spill] sm:$0xff]  ;;  %v7183_v24 = vpop.f32.mrb[14].mxu0  ;;  %v7192_v38 = vpop.f32.mrb[14].mxu1 }
 0x13c   : > { %10024 = vst [vmem:[#allocation94_spill] sm:$0xff] %v7158_v39  ;;  %10025 = vst [vmem:[#allocation90_spill] sm:$0xff] %v7161_v8  ;;  %4721 = vrcp.f32 %v3068_v58  ;;  %v7176_v59 = vadd.f32 %v10032_v52, %v1997_v16  ;;  %v10034_v39 = vld [vmem:[#allocation112_spill] sm:$0xff]  ;;  %v855_v55 = vadd.f32 %v854_v36, %v10036_v51  ;;  %4685 = vset.pattern.permute.xlu1 %v9872_v27  ;;  %v10039_v61 = vld [vmem:[#allocation31_spill] sm:$0xff] }
 0x13d   : > { %10028 = vst [vmem:[#allocation27_spill] sm:$0xff] %v7167_v11  ;;  %10030 = vst [vmem:[#allocation96_spill] sm:$0xff] %v7170_v54  ;;  %v7179_v8 = vadd.f32 %v10034_v39, %v1999_v62  ;;  %v10037_v28 = vld [vmem:[#allocation116_spill] sm:$0xff]  ;;  %v7188_v31 = vmul.f32 %v6262_v14, %v7146_v37  ;;  %v1112_v58 = vadd.f32 %v1111_v1, %v10039_v61  ;;  %v10041_v62 = vld [vmem:[#allocation5_spill] sm:$0xff]  ;;  %v7195_v39 = vpop.f32.mrb[15].mxu0  ;;  %v2190_v1 = vpop.permute.xlu0 %2189 }
 0x13e   : > { %10031 = vst [vmem:[#allocation98_spill] sm:$0xff] %v7173_v21  ;;  %10033 = vst [vmem:[#allocation28_spill] sm:$0xff] %v7176_v59  ;;  %v2002_v26 = vadd.f32 %v10037_v28, %v1582_v34  ;;  %v10040_v41 = vld [vmem:[#allocation32_spill] sm:$0xff]  ;;  %1365 = vperm.xlu1 %4685, %v10041_v62   ;;  %v7198_v36 = vadd.f32 %v6803_v9, %v2000_v42  ;;  %v7202_v34 = vmul.f32 %v6265_v63, %v7146_v37  ;;  %v10044_v51 = vld [vmem:[#allocation50_spill] sm:$0xff]  ;;  %v1125_v61 = vpop.f32.mrb[15].mxu1 }
 0x13f   : > { %10035 = vst [vmem:[#allocation29_spill] sm:$0xff] %v7179_v8  ;;  %10038 = vst [vmem:[#allocation99_spill] sm:$0xff] %v7188_v31  ;;  %v857_v16 = vadd.f32 %v856_v7, %v10040_v41  ;;  %v1584_v52 = vadd.f32 %v10044_v51, %v855_v55  ;;  %v10045_v28 = vld [vmem:[#allocation33_spill] sm:$0xff]  ;;  %v10046_v7 = vld [vmem:[#allocation119_spill] sm:$0xff]  ;;  %v861_v55 = vadd.f32 %v860_v19, %v10052_v12 }
 0x140   : > { %10042 = vst [vmem:[#allocation100_spill] sm:$0xff] %v7198_v36  ;;  %10043 = vst [vmem:[#allocation101_spill] sm:$0xff] %v7202_v34  ;;  %v1114_v31 = vadd.f32 %v1113_v20, %v10045_v28  ;;  %v2001_v41 = vadd.f32 %v10046_v7, %v1581_v15  ;;  %v10047_v21 = vld [vmem:[#allocation120_spill] sm:$0xff]  ;;  %v10048_v11 = vld [vmem:[#allocation51_spill] sm:$0xff]  ;;  %v7211_v36 = vpop.permute.xlu1 %2153  ;;  %v872_v28 = vpop.f32.mrb[16].mxu0 }
 0x141   : > { %v2003_v54 = vadd.f32 %v10047_v21, %v1583_v43  ;;  %v1586_v8 = vadd.f32 %v10048_v11, %v1112_v58  ;;  %v10049_v59 = vld [vmem:[#allocation52_spill] sm:$0xff]  ;;  %v10050_v9 = vld [vmem:[#allocation66_spill] sm:$0xff]  ;;  %v10051_v3 = vld [vmem:[#allocation53_spill] sm:$0xff]  ;;  %v1588_v19 = vadd.f32 %v6836_v29, %v861_v55 }
 0x142   : > { %v1585_v4 = vadd.f32 %v10049_v59, %v857_v16  ;;  %v2004_v42 = vadd.f32 %v10050_v9, %v1584_v52  ;;  %v1587_v34 = vadd.f32 %v10051_v3, %v1114_v31  ;;  %v10053_v20 = vld [vmem:[#allocation114_spill] sm:$0xff]  ;;  %v10055_v7 = vld [vmem:[#allocation67_spill] sm:$0xff]  ;;  %v10056_v21 = vld [vmem:[#allocation117_spill] sm:$0xff]  ;;  %v1129_v16 = vpop.f32.mrb[16].mxu1  ;;  %4687 = vset.pattern.permute.xlu1 %v9855_v57  ;;  %v874_v52 = vpop.f32.mrb[17].mxu0 }
 0x143   : > { %v1118_v51 = vadd.f32 %v1117_v60, %v10053_v20  ;;  %v2006_v15 = vadd.f32 %v10054_v35, %v1586_v8  ;;  %v863_v11 = vadd.f32 %v862_v30, %v10056_v21  ;;  %v10057_v58 = vld [vmem:[#allocation118_spill] sm:$0xff]  ;;  %v10058_v9 = vld [vmem:[#allocation123_spill] sm:$0xff]  ;;  %v10060_v31 = vld [vmem:[#allocation69_spill] sm:$0xff]  ;;  %v1131_v35 = vpop.f32.mrb[17].mxu1  ;;  %v7237_v30 = vmul.f32 %v6271_v48, %v7146_v37 }
 0x144   : > { %v2005_v43 = vadd.f32 %v10055_v7, %v1585_v4  ;;  %v1120_v59 = vadd.f32 %v1119_v40, %v10057_v58  ;;  %v7222_v3 = vadd.f32 %v10058_v9, %v2002_v26  ;;  %v2007_v12 = vadd.f32 %v10060_v31, %v1587_v34  ;;  %v7228_v8 = vld [vmem:[%s5466_s15 + $0xc0] sm:$0xff]  ;;  %v10063_v40 = vld [vmem:[#allocation132_spill] sm:$0xff]  ;;  %v10065_v29 = vld [vmem:[#allocation126_spill] sm:$0xff]  ;;  %v2202_v31 = vpop.permute.xlu0 %2201 }
 0x145   : > { %v1590_v60 = vadd.f32 %v6840_v17, %v1118_v51  ;;  %554 = vperm.xlu1 %4687, %v7228_v8   ;;  %v7233_v4 = vmul.f32 %v6268_v0, %v7146_v37  ;;  %10062 = vst [vmem:[#allocation103_spill] sm:$0xff] %v7237_v30  ;;  %v1589_v26 = vadd.f32 %v10063_v40, %v863_v11  ;;  %v10064_v34 = vld [vmem:[#allocation133_spill] sm:$0xff]  ;;  %v10067_v17 = vld [vmem:[#allocation127_spill] sm:$0xff]  ;;  %v10070_v58 = vld [vmem:[#allocation76_spill] sm:$0xff] }
 0x146   : > { %10059 = vst [vmem:[#allocation97_spill] sm:$0xff] %v7222_v3  ;;  %v1591_v20 = vadd.f32 %v10064_v34, %v1120_v59  ;;  %v7242_v55 = vadd.f32 %v10065_v29, %v2001_v41  ;;  %v7245_v51 = vadd.f32 %v10067_v17, %v2003_v54  ;;  %v10069_v7 = vld [vmem:[#allocation73_spill] sm:$0xff]  ;;  %v4720_v3 = vpop.eup %4719  ;;  %v7252_v37 = vmul.f32 %v6262_v14, %v2190_v1  ;;  %v10073_v59 = vld [vmem:[#allocation74_spill] sm:$0xff]  ;;  %v7259_v54 = vpop.f32.mrb[18].mxu1  ;;  %v10088_v30 = vld [vmem:[#allocation36_spill] sm:$0xff] }
 0x147   : > { %10061 = vst [vmem:[#allocation102_spill] sm:$0xff] %v7233_v4  ;;  %v2008_v21 = vadd.f32 %v10069_v7, %v1588_v19  ;;  %v2010_v9 = vadd.f32 %v10070_v58, %v1590_v60  ;;  %v7249_v4 = vpop.f32.mrb[18].mxu0  ;;  %v7255_v11 = vmul.f32 %v6265_v63, %v2190_v1  ;;  %v2009_v41 = vadd.f32 %v10073_v59, %v1589_v26  ;;  %v10074_v40 = vld [vmem:[#allocation77_spill] sm:$0xff]  ;;  %v4722_v19 = vpop.eup %4721  ;;  %v10075_v60 = vld [vmem:[#allocation136_spill] sm:$0xff] }
 0x148   : > { %10066 = vst [vmem:[#allocation42_spill] sm:$0xff] %v7242_v55  ;;  %10068 = vst [vmem:[#allocation109_spill] sm:$0xff] %v7245_v51  ;;  %v2011_v34 = vadd.f32 %v10074_v40, %v1591_v20  ;;  %v7261_v29 = vpop.f32.mrb[19].mxu0  ;;  %v7264_v17 = vadd.f32 %v10075_v60, %v2004_v42  ;;  %v10077_v7 = vld [vmem:[#allocation137_spill] sm:$0xff]  ;;  %v7275_v26 = vpop.permute.xlu1 %1321  ;;  %v7281_v59 = vadd.f32 %v6877_v5, %v2005_v43  ;;  %v10082_v42 = vld [vmem:[#allocation138_spill] sm:$0xff] }
 0x149   : > { %10071 = vst [vmem:[#allocation110_spill] sm:$0xff] %v7252_v37  ;;  %10072 = vst [vmem:[#allocation105_spill] sm:$0xff] %v7255_v11  ;;  %v7267_v58 = vadd.f32 %v10077_v7, %v2006_v15  ;;  %v7270_v37 = vmul.f32 %v6268_v0, %v2190_v1  ;;  %v7273_v11 = vmul.f32 %v6271_v48, %v2190_v1  ;;  %v7277_v20 = vpop.f32.mrb[19].mxu1  ;;  %4688 = vset.pattern.permute.xlu1 %v9905_v23  ;;  %v10085_v60 = vld [vmem:[#allocation34_spill] sm:$0xff]  ;;  %v10089_v43 = vld [vmem:[#allocation37_spill] sm:$0xff] }
 0x14a   : > { %10076 = vst [vmem:[#allocation106_spill] sm:$0xff] %v7264_v17  ;;  %10081 = vst [vmem:[#allocation115_spill] sm:$0xff] %v7281_v59  ;;  %v7284_v40 = vadd.f32 %v10082_v42, %v2007_v12  ;;  %v7287_v15 = vmul.f32 %v6262_v14, %v2202_v31  ;;  %v867_v7 = vadd.f32 %v7183_v24, %v10085_v60  ;;  %1785 = vperm.xlu1 %4688, %v10041_v62   ;;  %v7300_v42 = vpop.f32.mrb[20].mxu0  ;;  %v10097_v17 = vld [vmem:[#allocation121_spill] sm:$0xff]  ;;  %v10129_v55 = vld [vmem:[#allocation22_spill] sm:$0xff] }
 0x14b   : > { %10078 = vst [vmem:[#allocation43_spill] sm:$0xff] %v7267_v58  ;;  %10079 = vst [vmem:[#allocation44_spill] sm:$0xff] %v7270_v37  ;;  %v7293_v1 = vmul.f32 %v4720_v3, %v7025_v13  ;;  %v10087_v37 = vld [vmem:[#allocation35_spill] sm:$0xff]  ;;  %v869_v5 = vadd.f32 %v7195_v39, %v10088_v30  ;;  %v1126_v12 = vadd.f32 %v1125_v61, %v10089_v43  ;;  %v7312_v58 = vpop.f32.mrb[20].mxu1  ;;  %v10095_v39 = vld [vmem:[#allocation145_spill] sm:$0xff] }
 0x14c   : > { %10080 = vst [vmem:[#allocation45_spill] sm:$0xff] %v7273_v11  ;;  %10083 = vst [vmem:[#allocation107_spill] sm:$0xff] %v7284_v40  ;;  %v1124_v11 = vadd.f32 %v7192_v38, %v10087_v37  ;;  %v7306_v24 = vadd.f32 %v6992_v47, %v2008_v21  ;;  %v7309_v60 = vmul.f32 %v6265_v63, %v2202_v31  ;;  %v10093_v13 = vld [vmem:[#allocation139_spill] sm:$0xff]  ;;  %v10094_v38 = vld [vmem:[#allocation140_spill] sm:$0xff] }
 0x14d   : > { %10084 = vst [vmem:[#allocation108_spill] sm:$0xff] %v7287_v15  ;;  %10086 = vst [vmem:[#allocation111_spill] sm:$0xff] %v7293_v1  ;;  %v7303_v15 = vmul.f32 %v4722_v19, %v7039_v2  ;;  %v1592_v3 = vadd.f32 %v10093_v13, %v867_v7  ;;  %v1593_v30 = vadd.f32 %v10095_v39, %v869_v5  ;;  %v10096_v61 = vld [vmem:[#allocation146_spill] sm:$0xff]  ;;  %v7318_v2 = vpop.f32.mrb[21].mxu0  ;;  %v7320_v19 = vpop.f32.mrb[21].mxu1  ;;  %v10100_v7 = vld [vmem:[#allocation124_spill] sm:$0xff] }
 0x14e   : > { %10091 = vst [vmem:[#allocation30_spill] sm:$0xff] %v7306_v24  ;;  %10092 = vst [vmem:[#allocation116_spill] sm:$0xff] %v7309_v60  ;;  %v1594_v37 = vadd.f32 %v10094_v38, %v1124_v11  ;;  %v1595_v43 = vadd.f32 %v10096_v61, %v1126_v12  ;;  %v873_v40 = vadd.f32 %v872_v28, %v10097_v17  ;;  %v10099_v21 = vld [vmem:[#allocation122_spill] sm:$0xff]  ;;  %v10101_v24 = vld [vmem:[#allocation125_spill] sm:$0xff]  ;;  %4689 = vset.pattern.permute.xlu1 %v9834_v53  ;;  %v1742_v5 = vpop.permute.xlu1 %1741 }
 0x14f   : > { %10090 = vst [vmem:[#allocation112_spill] sm:$0xff] %v7303_v15  ;;  %v7323_v47 = vadd.f32 %v7000_v32, %v2010_v9  ;;  %v1130_v60 = vadd.f32 %v1129_v16, %v10099_v21  ;;  %v875_v13 = vadd.f32 %v874_v52, %v10100_v7  ;;  %v1132_v59 = vadd.f32 %v1131_v35, %v10101_v24  ;;  %v10105_v32 = vld [vmem:[#allocation149_spill] sm:$0xff]  ;;  %v7340_v16 = vpop.f32.mrb[22].mxu0  ;;  %v10106_v52 = vld [vmem:[#allocation143_spill] sm:$0xff]  ;;  %v10107_v12 = vld [vmem:[#allocation144_spill] sm:$0xff] }
 0x150   : > { %v7330_v11 = vadd.f32 %v6995_v56, %v2009_v41  ;;  %v7333_v28 = vadd.f32 %v7003_v33, %v2011_v34  ;;  %v7336_v17 = vmul.f32 %v6268_v0, %v2202_v31  ;;  %v1596_v9 = vadd.f32 %v10105_v32, %v873_v40  ;;  %2205 = vperm.xlu1 %4689, %v10041_v62   ;;  %v10108_v38 = vld [vmem:[#allocation150_spill] sm:$0xff]  ;;  %v10109_v41 = vld [vmem:[#allocation151_spill] sm:$0xff]  ;;  %v7346_v33 = vpop.f32.mrb[22].mxu1  ;;  %v7348_v34 = vpop.f32.mrb[23].mxu0  ;;  %v10112_v62 = vld [vmem:[#allocation148_spill] sm:$0xff] }
 0x151   : > { %10098 = vst [vmem:[#allocation31_spill] sm:$0xff] %v7323_v47  ;;  %v2012_v35 = vadd.f32 %v10106_v52, %v1592_v3  ;;  %v2014_v24 = vadd.f32 %v10107_v12, %v1594_v37  ;;  %v1598_v56 = vadd.f32 %v10108_v38, %v1130_v60  ;;  %v1597_v39 = vadd.f32 %v10109_v41, %v875_v13  ;;  %v10111_v40 = vld [vmem:[#allocation147_spill] sm:$0xff]  ;;  %v1310_v32 = vpop.permute.xlu0 %1309  ;;  %v7356_v52 = vpop.f32.mrb[23].mxu1  ;;  %v10115_v12 = vld [vmem:[#allocation38_spill] sm:$0xff]  ;;  %v10116_v38 = vld [vmem:[#allocation16_spill] sm:$0xff] }
 0x152   : > { %10102 = vst [vmem:[#allocation32_spill] sm:$0xff] %v7330_v11  ;;  %10103 = vst [vmem:[#allocation5_spill] sm:$0xff] %v7333_v28  ;;  %v7351_v61 = vmul.f32 %v6271_v48, %v2202_v31  ;;  %v2013_v21 = vadd.f32 %v10111_v40, %v1593_v30  ;;  %v2015_v7 = vadd.f32 %v10112_v62, %v1595_v43  ;;  %v10118_v43 = vld [vmem:[#allocation17_spill] sm:$0xff]  ;;  %v10121_v40 = vld [vmem:[#allocation8_spill] sm:$0xff]  ;;  %v7387_v11 = vpop.f32.mrb[24].mxu1 }
 0x153   : > { %10104 = vst [vmem:[#allocation50_spill] sm:$0xff] %v7336_v17  ;;  %v10113_v17 = vld [vmem:[#allocation152_spill] sm:$0xff]  ;;  %v7359_v60 = vmul.f32 %v6245_v18, %v1742_v5  ;;  %v7362_v37 = vmul.f32 %v6247_v22, %v1742_v5  ;;  %v2016_v13 = vadd.f32 %v6972_v10, %v1596_v9  ;;  %v879_v31 = vadd.f32 %v7249_v4, %v10115_v12  ;;  %v10123_v10 = vld [vmem:[#allocation71_spill] sm:$0xff]  ;;  %v10125_v4 = vld [vmem:[#allocation157_spill] sm:$0xff] }
 0x154   : > { %10110 = vst [vmem:[#allocation33_spill] sm:$0xff] %v7351_v61  ;;  %v1599_v3 = vadd.f32 %v10113_v17, %v1132_v59  ;;  %v7368_v30 = vmul.f32 %v10116_v38, %v1742_v5  ;;  %v7371_v41 = vmul.f32 %v10118_v43, %v1742_v5  ;;  %v10120_v59 = vld [vmem:[#allocation155_spill] sm:$0xff]  ;;  %v1472_v62 = vmul.f32 %v10121_v40, %v1310_v32  ;;  %v7376_v61 = vpop.f32.mrb[24].mxu0  ;;  %v10136_v1 = vld [vmem:[#allocation14_spill] sm:$0xff] }
 0x155   : > { %10114 = vst [vmem:[#allocation119_spill] sm:$0xff] %v7362_v37  ;;  %v2018_v17 = vadd.f32 %v10120_v59, %v1598_v56  ;;  %4690 = vset.pattern.permute.xlu1 %v9855_v57  ;;  %v7379_v47 = vadd.f32 %v7051_v50, %v2012_v35  ;;  %v7382_v9 = vadd.f32 %v10123_v10, %v2014_v24  ;;  %v10126_v28 = vld [vmem:[#allocation39_spill] sm:$0xff]  ;;  %v7390_v56 = vpop.f32.mrb[25].mxu0  ;;  %v10127_v59 = vld [vmem:[#allocation64_spill] sm:$0xff]  ;;  %v10131_v35 = vld [vmem:[#allocation158_spill] sm:$0xff]  ;;  %v7462_v37 = vpop.permute.xlu1 %1325 }
 0x156   : > { %10117 = vst [vmem:[#allocation120_spill] sm:$0xff] %v7368_v30  ;;  %10119 = vst [vmem:[#allocation51_spill] sm:$0xff] %v7371_v41  ;;  %v2017_v12 = vadd.f32 %v10125_v4, %v1597_v39  ;;  %v1136_v5 = vadd.f32 %v7259_v54, %v10126_v28  ;;  %559 = vperm.xlu1 %4690, %v7109_v44   ;;  %v7393_v51 = vadd.f32 %v10127_v59, %v2013_v21  ;;  %v10132_v10 = vld [vmem:[#allocation9_spill] sm:$0xff]  ;;  %v7400_v39 = vpop.f32.mrb[25].mxu1  ;;  %v10133_v4 = vld [vmem:[#allocation159_spill] sm:$0xff] }
 0x157   : > { %10122 = vst [vmem:[#allocation52_spill] sm:$0xff] %v7379_v47  ;;  %10124 = vst [vmem:[#allocation66_spill] sm:$0xff] %v7382_v9  ;;  %v7396_v50 = vadd.f32 %v10129_v55, %v2015_v7  ;;  %v2019_v24 = vadd.f32 %v10131_v35, %v1599_v3  ;;  %v1474_v9 = vmul.f32 %v10132_v10, %v1310_v32  ;;  %v10135_v47 = vld [vmem:[#allocation40_spill] sm:$0xff]  ;;  %v1314_v55 = vpop.permute.xlu0 %1313  ;;  %v10139_v7 = vld [vmem:[#allocation23_spill] sm:$0xff] }
 0x158   : > { %10128 = vst [vmem:[#allocation53_spill] sm:$0xff] %v7393_v51  ;;  %v7403_v54 = vadd.f32 %v10133_v4, %v2016_v13  ;;  %v1600_v28 = vadd.f32 %v1472_v62, %v879_v31  ;;  %v881_v15 = vadd.f32 %v7261_v29, %v10135_v47  ;;  %v1473_v41 = vmul.f32 %v10136_v1, %v1310_v32  ;;  %v10137_v21 = vld [vmem:[#allocation160_spill] sm:$0xff]  ;;  %v7415_v51 = vpop.f32.mrb[26].mxu0  ;;  %v10141_v13 = vld [vmem:[#allocation161_spill] sm:$0xff]  ;;  %v10144_v47 = vld [vmem:[#allocation15_spill] sm:$0xff] }
 0x159   : > { %10130 = vst [vmem:[#allocation113_spill] sm:$0xff] %v7396_v50  ;;  %v7409_v59 = vadd.f32 %v10137_v21, %v2018_v17  ;;  %v1892_v3 = vmul.f32 %v6245_v18, %v10139_v7  ;;  %v2312_v35 = vmul.f32 %v6262_v14, %v7117_v49  ;;  %v1602_v50 = vadd.f32 %v1474_v9, %v1136_v5  ;;  %v10143_v62 = vld [vmem:[#allocation41_spill] sm:$0xff]  ;;  %v10145_v17 = vld [vmem:[#allocation128_spill] sm:$0xff]  ;;  %v10148_v9 = vld [vmem:[#allocation162_spill] sm:$0xff] }
 0x15a   : > { %10134 = vst [vmem:[#allocation114_spill] sm:$0xff] %v7403_v54  ;;  %10140 = vst [vmem:[#allocation67_spill] sm:$0xff] %v7415_v51  ;;  %v7418_v31 = vadd.f32 %v10141_v13, %v2017_v12  ;;  %v1138_v29 = vadd.f32 %v7277_v20, %v10143_v62  ;;  %v1475_v4 = vmul.f32 %v10144_v47, %v1310_v32  ;;  %4691 = vset.pattern.permute.xlu1 %v9872_v27  ;;  %v7428_v54 = vpop.f32.mrb[27].mxu0 }
 0x15b   : > { %10138 = vst [vmem:[#allocation68_spill] sm:$0xff] %v7409_v59  ;;  %v885_v21 = vadd.f32 %v7300_v42, %v10145_v17  ;;  %v7425_v59 = vpop.f32.mrb[26].mxu1  ;;  %10147 = vst [vmem:[#allocation123_spill] sm:$0xff] %v7428_v54  ;;  %v7431_v5 = vadd.f32 %v10148_v9, %v2019_v24  ;;  %v1894_v12 = vmul.f32 %v10116_v38, %v10139_v7  ;;  %1373 = vperm.xlu1 %4691, %v7109_v44   ;;  %v10151_v17 = vld [vmem:[#allocation129_spill] sm:$0xff] }
 0x15c   : > { %10142 = vst [vmem:[#allocation117_spill] sm:$0xff] %v7418_v31  ;;  %10146 = vst [vmem:[#allocation118_spill] sm:$0xff] %v7425_v59  ;;  %v1601_v13 = vadd.f32 %v1473_v41, %v881_v15  ;;  %v1476_v20 = vmul.f32 %v10121_v40, %v1314_v55  ;;  %v7436_v62 = vpop.f32.mrb[27].mxu1  ;;  %v2020_v42 = vadd.f32 %v1892_v3, %v1600_v28  ;;  %v10152_v3 = vld [vmem:[#allocation58_spill] sm:$0xff]  ;;  %v10153_v59 = vld [vmem:[#allocation72_spill] sm:$0xff] }
 0x15d   : > { %10149 = vst [vmem:[#allocation69_spill] sm:$0xff] %v7431_v5  ;;  %10150 = vst [vmem:[#allocation132_spill] sm:$0xff] %v7436_v62  ;;  %v2314_v32 = vmul.f32 %v6268_v0, %v7117_v49  ;;  %v1142_v31 = vadd.f32 %v7312_v58, %v10151_v17  ;;  %v1478_v24 = vmul.f32 %v10132_v10, %v1314_v55  ;;  %v7448_v62 = vpop.f32.mrb[28].mxu0  ;;  %v10154_v58 = vld [vmem:[#allocation75_spill] sm:$0xff] }
 0x15e   : > { %v2022_v9 = vadd.f32 %v1894_v12, %v1602_v50  ;;  %v1893_v5 = vmul.f32 %v6247_v22, %v10139_v7  ;;  %v2313_v15 = vmul.f32 %v6265_v63, %v7117_v49  ;;  %v1604_v41 = vadd.f32 %v1476_v20, %v885_v21  ;;  %v7458_v50 = vpop.f32.mrb[28].mxu1  ;;  %v7460_v12 = vpop.f32.mrb[29].mxu0 }
 0x15f   : > { %v1603_v54 = vadd.f32 %v1475_v4, %v1138_v29  ;;  %v1606_v28 = vadd.f32 %v1478_v24, %v1142_v31  ;;  %v7452_v51 = vadd.f32 %v10153_v59, %v10152_v3  ;;  %v7456_v17 = vadd.f32 %v10154_v58, %v7078_v6  ;;  %10155 = vst [vmem:[#allocation133_spill] sm:$0xff] %v7460_v12  ;;  %v10156_v29 = vld [vmem:[#allocation78_spill] sm:$0xff]  ;;  %v7471_v20 = vpop.f32.mrb[29].mxu1  ;;  %v10159_v24 = vld [vmem:[#allocation83_spill] sm:$0xff] }
 0x160   : > { %v2021_v30 = vadd.f32 %v1893_v5, %v1601_v13  ;;  %v1895_v21 = vmul.f32 %v10118_v43, %v10139_v7  ;;  %v2315_v31 = vmul.f32 %v6271_v48, %v7117_v49  ;;  %v7469_v4 = vadd.f32 %v10156_v29, %v1604_v41  ;;  %10157 = vst [vmem:[#allocation126_spill] sm:$0xff] %v7471_v20  ;;  %v10161_v41 = vld [vmem:[#allocation130_spill] sm:$0xff] }
 0x161   : > { %4692 = vset.pattern.permute.xlu1 %v9834_v53  ;;  %v7474_v6 = vadd.f32 %v2312_v35, %v2020_v42  ;;  %v7477_v3 = vadd.f32 %v10159_v24, %v1606_v28  ;;  %v4229_v5 = vmul.f32 -1.442695, %v7452_v51  ;;  %v4231_v13 = vmul.f32 -1.442695, %v7456_v17  ;;  %v7489_v42 = vpop.f32.mrb[30].mxu0 }
 0x162   : > { %2209 = vperm.xlu1 %4692, %v7228_v8   ;;  %v7482_v7 = vadd.f32 %v2314_v32, %v2022_v9  ;;  %v2316_v49 = vmul.f32 %v6262_v14, %v7211_v36  ;;  %v887_v29 = vadd.f32 %v7318_v2, %v10161_v41  ;;  %v1477_v35 = vmul.f32 %v10136_v1, %v1314_v55  ;;  %v7495_v32 = vpop.f32.mrb[30].mxu1  ;;  %v7500_v41 = vpop.f32.mrb[31].mxu0 }
 0x163   : > { %10158 = vst [vmem:[#allocation127_spill] sm:$0xff] %v7474_v6  ;;  %10162 = vst [vmem:[#allocation76_spill] sm:$0xff] %v7489_v42  ;;  %v2023_v28 = vadd.f32 %v1895_v21, %v1603_v54  ;;  %v2318_v24 = vmul.f32 %v6268_v0, %v7211_v36  ;;  %4723 = vpow2.f32 %v4229_v5  ;;  %v10163_v6 = vld [vmem:[#allocation131_spill] sm:$0xff]  ;;  %v7497_v9 = vadd.f32 %v2313_v15, %v2021_v30  ;;  %v7502_v20 = vpop.f32.mrb[31].mxu1  ;;  %v10168_v54 = vld [vmem:[#allocation46_spill] sm:$0xff]  ;;  %v1746_v15 = vpop.permute.xlu1 %1745 }
 0x164   : > { %10160 = vst [vmem:[#allocation73_spill] sm:$0xff] %v7482_v7  ;;  %v1144_v8 = vadd.f32 %v7320_v19, %v10163_v6  ;;  %10164 = vst [vmem:[#allocation74_spill] sm:$0xff] %v7495_v32  ;;  %4725 = vpow2.f32 %v4231_v13  ;;  %v1605_v7 = vadd.f32 %v1477_v35, %v887_v29  ;;  %v1479_v2 = vmul.f32 %v10144_v47, %v1314_v55  ;;  %v10169_v42 = vld [vmem:[#allocation47_spill] sm:$0xff]  ;;  %v10206_v32 = vld [vmem:[#allocation24_spill] sm:$0xff] }
 0x165   : > { %10165 = vst [vmem:[#allocation77_spill] sm:$0xff] %v7497_v9  ;;  %10166 = vst [vmem:[#allocation136_spill] sm:$0xff] %v7500_v41  ;;  %v891_v21 = vadd.f32 %v7340_v16, %v10168_v54  ;;  %v1480_v5 = vmul.f32 %v10121_v40, %v7163_v25  ;;  %v1148_v19 = vadd.f32 %v7346_v33, %v10169_v42  ;;  %v10170_v55 = vld [vmem:[#allocation79_spill] sm:$0xff]  ;;  %v7523_v33 = vpop.f32.mrb[32].mxu0  ;;  %v10172_v54 = vld [vmem:[#allocation48_spill] sm:$0xff] }
 0x166   : > { %10167 = vst [vmem:[#allocation137_spill] sm:$0xff] %v7502_v20  ;;  %v1482_v30 = vmul.f32 %v10132_v10, %v7163_v25  ;;  %4693 = vset.pattern.permute.xlu1 %v9905_v23  ;;  %v2025_v6 = vadd.f32 %v10170_v55, %v1605_v7  ;;  %v1607_v13 = vadd.f32 %v1479_v2, %v1144_v8  ;;  %10171 = vst [vmem:[#allocation138_spill] sm:$0xff] %v7523_v33  ;;  %v7529_v8 = vpop.f32.mrb[32].mxu1  ;;  %v10180_v20 = vld [vmem:[#allocation49_spill] sm:$0xff]  ;;  %v10196_v41 = vld [vmem:[#allocation135_spill] sm:$0xff] }
 0x167   : > { %v7516_v29 = vadd.f32 %v10153_v59, %v7098_v45  ;;  %v7520_v16 = vadd.f32 %v10154_v58, %v7101_v46  ;;  %1793 = vperm.xlu1 %4693, %v7109_v44   ;;  %v1608_v35 = vadd.f32 %v1480_v5, %v891_v21  ;;  %v893_v9 = vadd.f32 %v7348_v34, %v10172_v54  ;;  %v7531_v45 = vpop.f32.mrb[33].mxu0  ;;  %v10176_v46 = vld [vmem:[#allocation84_spill] sm:$0xff]  ;;  %v7538_v21 = vpop.f32.mrb[33].mxu1  ;;  %v10178_v5 = vld [vmem:[#allocation87_spill] sm:$0xff] }
 0x168   : > { %v1610_v42 = vadd.f32 %v1482_v30, %v1148_v19  ;;  %v1481_v7 = vmul.f32 %v10136_v1, %v7163_v25  ;;  %10173 = vst [vmem:[#allocation34_spill] sm:$0xff] %v7529_v8  ;;  %10174 = vst [vmem:[#allocation35_spill] sm:$0xff] %v7531_v45  ;;  %v7533_v2 = vadd.f32 %v2315_v31, %v2023_v28  ;;  %v10179_v34 = vld [vmem:[#allocation91_spill] sm:$0xff] }
 0x169   : > { %v2027_v55 = vadd.f32 %v10176_v46, %v1607_v13  ;;  %v4233_v44 = vmul.f32 -1.442695, %v7516_v29  ;;  %v4235_v33 = vmul.f32 -1.442695, %v7520_v16  ;;  %10177 = vst [vmem:[#allocation37_spill] sm:$0xff] %v7538_v21  ;;  %v2028_v19 = vadd.f32 %v10178_v5, %v1608_v35  ;;  %v10181_v13 = vld [vmem:[#allocation85_spill] sm:$0xff] }
 0x16a   : > { %10175 = vst [vmem:[#allocation36_spill] sm:$0xff] %v7533_v2  ;;  %v7542_v30 = vadd.f32 %v10179_v34, %v1610_v42  ;;  %v1609_v54 = vadd.f32 %v1481_v7, %v893_v9  ;;  %v1150_v8 = vadd.f32 %v7356_v52, %v10180_v20  ;;  %v7547_v31 = vmul.f32 %v6245_v18, %v1746_v15  ;;  %v10182_v46 = vld [vmem:[#allocation20_spill] sm:$0xff]  ;;  %v7556_v35 = vpop.f32.mrb[34].mxu0  ;;  %v10190_v21 = vld [vmem:[#allocation21_spill] sm:$0xff] }
 0x16b   : > { %4727 = vpow2.f32 %v4233_v44  ;;  %v1483_v28 = vmul.f32 %v10144_v47, %v7163_v25  ;;  %v7553_v2 = vadd.f32 %v10182_v46, %v10181_v13  ;;  %4694 = vset.pattern.permute.xlu1 %v9872_v27  ;;  %10183 = vst [vmem:[#allocation139_spill] sm:$0xff] %v7556_v35  ;;  %v7559_v9 = vmul.f32 %v6247_v22, %v1746_v15  ;;  %v10184_v20 = vld [vmem:[#allocation88_spill] sm:$0xff]  ;;  %v7568_v25 = vpop.f32.mrb[34].mxu1  ;;  %v7570_v44 = vpop.f32.mrb[35].mxu0  ;;  %v10189_v35 = vld [vmem:[#allocation86_spill] sm:$0xff] }
 0x16c   : > { %v7562_v52 = vmul.f32 %v10116_v38, %v1746_v15  ;;  %4729 = vpow2.f32 %v4235_v33  ;;  %v7565_v42 = vadd.f32 %v10184_v20, %v1609_v54  ;;  %v10185_v7 = vld [vmem:[#allocation156_spill] sm:$0xff]  ;;  %10186 = vst [vmem:[#allocation140_spill] sm:$0xff] %v7568_v25  ;;  %10187 = vst [vmem:[#allocation145_spill] sm:$0xff] %v7570_v44  ;;  %v7573_v5 = vadd.f32 %v2316_v49, %v7469_v4  ;;  %v7580_v33 = vpop.f32.mrb[35].mxu1 }
 0x16d   : > { %1377 = vperm.xlu1 %4694, %v10185_v7   ;;  %v1611_v34 = vadd.f32 %v1483_v28, %v1150_v8  ;;  %v4232_v13 = vmul.f32 -1.442695, %v7553_v2  ;;  %v7578_v45 = vadd.f32 %v10190_v21, %v10189_v35  ;;  %10191 = vst [vmem:[#allocation121_spill] sm:$0xff] %v7580_v33  ;;  %v4724_v54 = vpop.eup %4723  ;;  %v7583_v20 = vadd.f32 %v2318_v24, %v7477_v3  ;;  %v10193_v44 = vld [vmem:[#allocation92_spill] sm:$0xff]  ;;  %v7596_v3 = vpop.f32.mrb[36].mxu0 }
 0x16e   : > { %10188 = vst [vmem:[#allocation146_spill] sm:$0xff] %v7573_v5  ;;  %v7586_v25 = vmul.f32 %v10118_v43, %v1746_v15  ;;  %v2317_v4 = vmul.f32 %v6265_v63, %v7211_v36  ;;  %v2319_v49 = vmul.f32 %v6271_v48, %v7211_v36  ;;  %v4726_v8 = vpop.eup %4725  ;;  %v3067_v28 = vadd.f32 1.0, %v4724_v54  ;;  %10194 = vst [vmem:[#allocation124_spill] sm:$0xff] %v7596_v3  ;;  %v10195_v15 = vld [vmem:[#allocation134_spill] sm:$0xff]  ;;  %v7605_v54 = vpop.f32.mrb[36].mxu1 }
 0x16f   : > { %10192 = vst [vmem:[#allocation122_spill] sm:$0xff] %v7583_v20  ;;  %v7593_v35 = vadd.f32 %v10193_v44, %v1611_v34  ;;  %4731 = vpow2.f32 %v4232_v13  ;;  %v4234_v33 = vmul.f32 -1.442695, %v7578_v45  ;;  %v3069_v24 = vadd.f32 1.0, %v4726_v8  ;;  %10197 = vst [vmem:[#allocation125_spill] sm:$0xff] %v7605_v54  ;;  %v7607_v44 = vpop.f32.mrb[37].mxu0 }
 0x170   : > { %v897_v20 = vadd.f32 %v7376_v61, %v10195_v15  ;;  %v1484_v5 = vmul.f32 %v10121_v40, %v7275_v26  ;;  %v1154_v36 = vadd.f32 %v7387_v11, %v10196_v41  ;;  %10198 = vst [vmem:[#allocation149_spill] sm:$0xff] %v7607_v44  ;;  %4733 = vrcp.f32 %v3067_v28  ;;  %v10200_v8 = vld [vmem:[#allocation82_spill] sm:$0xff]  ;;  %v7618_v15 = vld [vmem:[%s5466_s15 + $0xd8] sm:$0xff]  ;;  %v7621_v11 = vpop.f32.mrb[37].mxu1  ;;  %v10202_v44 = vld [vmem:[#allocation93_spill] sm:$0xff] }
 0x171   : > { %4695 = vset.pattern.permute.xlu1 %v9855_v57  ;;  %v7609_v34 = vadd.f32 %v2317_v4, %v2025_v6  ;;  %v1486_v13 = vmul.f32 %v10132_v10, %v7275_v26  ;;  %v7615_v61 = vadd.f32 %v10153_v59, %v10200_v8  ;;  %10201 = vst [vmem:[#allocation144_spill] sm:$0xff] %v7621_v11  ;;  %4735 = vrcp.f32 %v3069_v24  ;;  %v10203_v4 = vld [vmem:[#allocation141_spill] sm:$0xff]  ;;  %v10208_v24 = vld [vmem:[#allocation142_spill] sm:$0xff] }
 0x172   : > { %569 = vperm.xlu1 %4695, %v7618_v15   ;;  %v1612_v41 = vadd.f32 %v1484_v5, %v897_v20  ;;  %v7625_v6 = vadd.f32 %v10154_v58, %v10202_v44  ;;  %v899_v28 = vadd.f32 %v7390_v56, %v10203_v4  ;;  %v7629_v54 = vadd.f32 %v2319_v49, %v2027_v55  ;;  %v7642_v56 = vpop.f32.mrb[38].mxu1  ;;  %v7645_v55 = vld [vmem:[%s5466_s15 + $0xe0] sm:$0xff]  ;;  %v10213_v4 = vld [vmem:[#allocation63_spill] sm:$0xff] }
 0x173   : > { %10199 = vst [vmem:[#allocation143_spill] sm:$0xff] %v7609_v34  ;;  %4737 = vpow2.f32 %v4234_v33  ;;  %v1614_v8 = vadd.f32 %v1486_v13, %v1154_v36  ;;  %v4237_v3 = vmul.f32 -1.442695, %v7615_v61  ;;  %v7632_v34 = vpop.f32.mrb[38].mxu0  ;;  %v7635_v12 = vadd.f32 %v10206_v32, %v2028_v19  ;;  %10209 = vst [vmem:[#allocation148_spill] sm:$0xff] %v7642_v56  ;;  %v10211_v36 = vld [vmem:[#allocation81_spill] sm:$0xff]  ;;  %v2166_v32 = vpop.permute.xlu1 %2165  ;;  %2225 = vperm.xlu0 %4703, %v7645_v55  }
 0x174   : > { %10204 = vst [vmem:[#allocation150_spill] sm:$0xff] %v7629_v54  ;;  %10205 = vst [vmem:[#allocation151_spill] sm:$0xff] %v7632_v34  ;;  %v4239_v5 = vmul.f32 -1.442695, %v7625_v6  ;;  %v1485_v20 = vmul.f32 %v10136_v1, %v7275_v26  ;;  %v1156_v44 = vadd.f32 %v7400_v39, %v10208_v24  ;;  %v7647_v33 = vpop.f32.mrb[39].mxu0  ;;  %v7651_v13 = vadd.f32 %v10211_v36, %v7542_v30  ;;  %v7660_v39 = vpop.f32.mrb[39].mxu1 }
 0x175   : > { %10207 = vst [vmem:[#allocation147_spill] sm:$0xff] %v7635_v12  ;;  %10210 = vst [vmem:[#allocation152_spill] sm:$0xff] %v7647_v33  ;;  %v4728_v49 = vpop.eup %4727  ;;  %4739 = vpow2.f32 %v4237_v3  ;;  %v1487_v19 = vmul.f32 %v10144_v47, %v7275_v26  ;;  %v7657_v34 = vadd.f32 %v10182_v46, %v10213_v4  ;;  %v7663_v56 = vpop.permute.xlu0 %1329  ;;  %v2032_v36 = vadd.f32 %v7359_v60, %v1612_v41  ;;  %v10215_v33 = vld [vmem:[#allocation120_spill] sm:$0xff]  ;;  %v10219_v60 = vld [vmem:[#allocation65_spill] sm:$0xff] }
 0x176   : > { %10212 = vst [vmem:[#allocation38_spill] sm:$0xff] %v7651_v13  ;;  %4696 = vset.pattern.permute.xlu1 %v9905_v23  ;;  %10214 = vst [vmem:[#allocation17_spill] sm:$0xff] %v7660_v39  ;;  %v4730_v24 = vpop.eup %4729  ;;  %v3071_v30 = vadd.f32 1.0, %v4728_v49  ;;  %4741 = vpow2.f32 %v4239_v5  ;;  %v1613_v3 = vadd.f32 %v1485_v20, %v899_v28  ;;  %v2034_v4 = vadd.f32 %v10215_v33, %v1614_v8  ;;  %v7669_v11 = vpop.f32.mrb[40].mxu0  ;;  %v10217_v39 = vld [vmem:[#allocation25_spill] sm:$0xff] }
 0x177   : > { %1797 = vperm.xlu1 %4696, %v10185_v7   ;;  %v3073_v26 = vadd.f32 1.0, %v4730_v24  ;;  %v1615_v13 = vadd.f32 %v1487_v19, %v1156_v44  ;;  %v4236_v12 = vmul.f32 -1.442695, %v7657_v34  ;;  %10216 = vst [vmem:[#allocation155_spill] sm:$0xff] %v7669_v11  ;;  %v7673_v54 = vadd.f32 %v10217_v39, %v7565_v42  ;;  %v7682_v28 = vpop.f32.mrb[40].mxu1  ;;  %v7693_v44 = vpop.f32.mrb[41].mxu0  ;;  %4708 = vset.pattern.permute.xlu0 %v9872_v27 }
 0x178   : > { %4743 = vrcp.f32 %v3071_v30  ;;  %v7676_v49 = vmul.f32 %v6262_v14, %v2166_v32  ;;  %v7680_v41 = vadd.f32 %v10190_v21, %v10219_v60  ;;  %10221 = vst [vmem:[#allocation39_spill] sm:$0xff] %v7682_v28  ;;  %v7685_v5 = vmul.f32 %v6265_v63, %v2166_v32  ;;  %10222 = vst [vmem:[#allocation64_spill] sm:$0xff] %v7693_v44  ;;  %v7695_v33 = vpop.f32.mrb[41].mxu1  ;;  %v10224_v39 = vld [vmem:[#allocation119_spill] sm:$0xff]  ;;  %v10225_v60 = vld [vmem:[#allocation89_spill] sm:$0xff] }
 0x179   : > { %10218 = vst [vmem:[#allocation71_spill] sm:$0xff] %v7673_v54  ;;  %v4732_v8 = vpop.eup %4731  ;;  %4745 = vrcp.f32 %v3073_v26  ;;  %v7688_v20 = vmul.f32 %v6268_v0, %v2166_v32  ;;  %v7691_v42 = vmul.f32 %v6271_v48, %v2166_v32  ;;  %10223 = vst [vmem:[#allocation22_spill] sm:$0xff] %v7695_v33  ;;  %v2033_v24 = vadd.f32 %v10224_v39, %v1613_v3  ;;  %v10227_v32 = vld [vmem:[#allocation26_spill] sm:$0xff]  ;;  %v10231_v54 = vld [vmem:[#allocation51_spill] sm:$0xff]  ;;  %v1750_v48 = vpop.permute.xlu1 %1749 }
 0x17a   : > { %10220 = vst [vmem:[#allocation157_spill] sm:$0xff] %v7680_v41  ;;  %v3070_v19 = vadd.f32 1.0, %v4732_v8  ;;  %4747 = vpow2.f32 %v4236_v12  ;;  %v4238_v30 = vmul.f32 -1.442695, %v7680_v41  ;;  %v4734_v26 = vpop.eup %4733  ;;  %v7703_v28 = vadd.f32 %v10225_v60, %v7593_v35  ;;  %v10229_v44 = vld [vmem:[#allocation90_spill] sm:$0xff]  ;;  %v7714_v39 = vpop.permute.xlu0 %1333  ;;  %v10233_v35 = vld [vmem:[#allocation67_spill] sm:$0xff] }
 0x17b   : > { %4698 = vset.pattern.permute.xlu1 %v9834_v53  ;;  %v7706_v11 = vadd.f32 %v10227_v32, %v2032_v36  ;;  %v7709_v33 = vadd.f32 %v10229_v44, %v2034_v4  ;;  %v2035_v8 = vadd.f32 %v10231_v54, %v1615_v13  ;;  %v4736_v12 = vpop.eup %4735  ;;  %v3451_v3 = vmul.f32 %v4734_v26, %v7452_v51  ;;  %v10232_v41 = vld [vmem:[#allocation54_spill] sm:$0xff]  ;;  %v10236_v54 = vld [vmem:[#allocation55_spill] sm:$0xff]  ;;  %v10238_v32 = vld [vmem:[#allocation29_spill] sm:$0xff] }
 0x17c   : > { %10226 = vst [vmem:[#allocation158_spill] sm:$0xff] %v7703_v28  ;;  %2217 = vperm.xlu1 %4698, %v10185_v7   ;;  %4749 = vrcp.f32 %v3070_v19  ;;  %v903_v60 = vadd.f32 %v10233_v35, %v10232_v41  ;;  %v10234_v28 = vld [vmem:[#allocation28_spill] sm:$0xff]  ;;  %v3453_v44 = vmul.f32 %v4736_v12, %v7456_v17  ;;  %v10237_v13 = vld [vmem:[#allocation118_spill] sm:$0xff]  ;;  %v7727_v51 = vadd.f32 %v10154_v58, %v10238_v32  ;;  %v10242_v17 = vld [vmem:[#allocation111_spill] sm:$0xff] }
 0x17d   : > { %10228 = vst [vmem:[#allocation159_spill] sm:$0xff] %v7706_v11  ;;  %10230 = vst [vmem:[#allocation40_spill] sm:$0xff] %v7709_v33  ;;  %v7720_v36 = vadd.f32 %v10153_v59, %v10234_v28  ;;  %v4738_v4 = vpop.eup %4737  ;;  %4751 = vpow2.f32 %v4238_v30  ;;  %v1160_v7 = vadd.f32 %v10237_v13, %v10236_v54  ;;  %3713 = vmatprep.mubr.f32.mxu1 %v3451_v3  ;;  %v10240_v26 = vld [vmem:[#allocation94_spill] sm:$0xff]  ;;  %v10244_v32 = vld [vmem:[#allocation56_spill] sm:$0xff] }
 0x17e   : > { %10239 = vst [vmem:[#allocation23_spill] sm:$0xff] %v7727_v51  ;;  %v3072_v19 = vadd.f32 1.0, %v4738_v4  ;;  %v7730_v33 = vadd.f32 %v10240_v26, %v2033_v24  ;;  %v7733_v41 = vmul.f32 %v6245_v18, %v1750_v48  ;;  %3938 = vmatprep.mubr.f32.mxu0 %v3453_v44  ;;  %3714 = vmatmul.mubr.f32.vlgmr.msra.gmra.mrb[64].mxu1 %v10242_v17  ;;  %v10243_v4 = vld [vmem:[#allocation112_spill] sm:$0xff]  ;;  %v4243_v13 = vmul.f32 -1.442695, %v7727_v51  ;;  %v10245_v44 = vld [vmem:[#allocation123_spill] sm:$0xff]  ;;  %v7750_v18 = vpop.permute.xlu0 %1345 }
 0x17f   : > { %10235 = vst [vmem:[#allocation160_spill] sm:$0xff] %v7720_v36  ;;  %v4241_v28 = vmul.f32 -1.442695, %v7720_v36  ;;  %v4740_v35 = vpop.eup %4739  ;;  %v7738_v30 = vmul.f32 %v6247_v22, %v1750_v48  ;;  %v1488_v12 = vmul.f32 %v10121_v40, %v7462_v37  ;;  %v1490_v3 = vmul.f32 %v10132_v10, %v7462_v37  ;;  %3939 = vmatmul.mubr.f32.vlgmr.msra.gmra.mrb[64].mxu0 %v10243_v4  ;;  %v10247_v4 = vld [vmem:[#allocation132_spill] sm:$0xff]  ;;  %v10248_v36 = vld [vmem:[#allocation27_spill] sm:$0xff] }
 0x180   : > { %10241 = vst [vmem:[#allocation161_spill] sm:$0xff] %v7730_v33  ;;  %v4742_v24 = vpop.eup %4741  ;;  %4753 = vrcp.f32 %v3072_v19  ;;  %v3075_v54 = vadd.f32 1.0, %v4740_v35  ;;  %v905_v26 = vadd.f32 %v10245_v44, %v10244_v32  ;;  %4699 = vset.pattern.permute.xlu1 %v9855_v57  ;;  %v1489_v19 = vmul.f32 %v10136_v1, %v7462_v37  ;;  %v10246_v35 = vld [vmem:[#allocation57_spill] sm:$0xff] }
 0x181   : > { %v3077_v17 = vadd.f32 1.0, %v4742_v24  ;;  %v1616_v11 = vadd.f32 %v1488_v12, %v903_v60  ;;  %v1618_v33 = vadd.f32 %v1490_v3, %v1160_v7  ;;  %4755 = vpow2.f32 %v4241_v28  ;;  %574 = vperm.xlu1 %4699, %v7645_v55   ;;  %v10249_v28 = vld [vmem:[#allocation96_spill] sm:$0xff] }
 0x182   : > { %v4744_v22 = vpop.eup %4743  ;;  %4757 = vrcp.f32 %v3075_v54  ;;  %v1162_v51 = vadd.f32 %v10247_v4, %v10246_v35  ;;  %v7758_v32 = vadd.f32 %v10182_v46, %v10248_v36  ;;  %v1491_v7 = vmul.f32 %v10144_v47, %v7462_v37 }
 0x183   : > { %v4746_v24 = vpop.eup %4745  ;;  %v3455_v60 = vmul.f32 %v4744_v22, %v7516_v29  ;;  %4759 = vrcp.f32 %v3077_v17  ;;  %v7765_v12 = vadd.f32 %v10190_v21, %v10249_v28  ;;  %v1617_v44 = vadd.f32 %v1489_v19, %v905_v26  ;;  %v10250_v17 = vld [vmem:[#allocation98_spill] sm:$0xff] }
 0x184   : > { %v4748_v3 = vpop.eup %4747  ;;  %v3457_v54 = vmul.f32 %v4746_v24, %v7520_v16  ;;  %4761 = vpow2.f32 %v4243_v13  ;;  %v4240_v35 = vmul.f32 -1.442695, %v7758_v32  ;;  %v7770_v4 = vmul.f32 %v10116_v38, %v1750_v48 }
 0x185   : > { %3718 = vmatprep.mubr.f32.mxu1 %v3455_v60  ;;  %v3074_v36 = vadd.f32 1.0, %v4748_v3  ;;  %v2036_v22 = vadd.f32 %v7547_v31, %v1616_v11  ;;  %v4242_v37 = vmul.f32 -1.442695, %v7765_v12  ;;  %4701 = vset.pattern.permute.xlu1 %v9872_v27  ;;  %v7776_v28 = vadd.f32 %v10250_v17, %v2035_v8  ;;  %v10252_v11 = vld [vmem:[#allocation153_spill] sm:$0xff]  ;;  %v7786_v3 = vpop.permute.xlu0 %1357  ;;  %v2170_v17 = vpop.permute.xlu1 %2169 }
 0x186   : > { %v4750_v29 = vpop.eup %4749  ;;  %3943 = vmatprep.mubr.f32.mxu0 %v3457_v54  ;;  %v7779_v16 = vmul.f32 %v10118_v43, %v1750_v48  ;;  %v1619_v13 = vadd.f32 %v1491_v7, %v1162_v51  ;;  %4763 = vpow2.f32 %v4240_v35  ;;  %1385 = vperm.xlu1 %4701, %v7645_v55   ;;  %v2038_v31 = vadd.f32 %v7562_v52, %v1618_v33  ;;  %v10256_v52 = vld [vmem:[#allocation109_spill] sm:$0xff]  ;;  %v10257_v33 = vld [vmem:[#allocation70_spill] sm:$0xff] }
 0x187   : > { %10251 = vst [vmem:[#allocation41_spill] sm:$0xff] %v7776_v28  ;;  %v4752_v26 = vpop.eup %4751  ;;  %v3454_v19 = vmul.f32 %v4750_v29, %v7553_v2  ;;  %4765 = vrcp.f32 %v3074_v36  ;;  %v909_v24 = vadd.f32 %v7448_v62, %v10252_v11  ;;  %10253 = vst [vmem:[#allocation15_spill] sm:$0xff] %v7786_v3  ;;  %v2037_v8 = vadd.f32 %v7559_v9, %v1617_v44  ;;  %v10255_v2 = vld [vmem:[#allocation42_spill] sm:$0xff] }
 0x188   : > { %v3076_v60 = vadd.f32 1.0, %v4752_v26  ;;  %4767 = vpow2.f32 %v4242_v37  ;;  %v1492_v48 = vmul.f32 %v10121_v40, %v7663_v56  ;;  %v7792_v51 = vadd.f32 %v7676_v49, %v2036_v22  ;;  %v10258_v54 = vld [vmem:[#allocation10_spill] sm:$0xff] }
 0x189   : > { %3719 = vmatmul.mubr.f32.gmra.mrb[66].mxu1 %v3454_v19  ;;  %v7796_v7 = vadd.f32 %v10153_v59, %v10255_v2  ;;  %v7800_v62 = vadd.f32 %v10154_v58, %v10256_v52  ;;  %v687_v35 = vmul.f32 %v10258_v54, %v10257_v33  ;;  %v2039_v44 = vadd.f32 %v7586_v25, %v1619_v13  ;;  %v10259_v36 = vld [vmem:[#allocation154_spill] sm:$0xff]  ;;  %v10262_v2 = vld [vmem:[#allocation11_spill] sm:$0xff] }
 0x18a   : > { %10254 = vst [vmem:[#allocation128_spill] sm:$0xff] %v7792_v51  ;;  %v4754_v9 = vpop.eup %4753  ;;  %4769 = vrcp.f32 %v3076_v60  ;;  %v1166_v37 = vadd.f32 %v7458_v50, %v10259_v36  ;;  %v1494_v49 = vmul.f32 %v10132_v10, %v7663_v56  ;;  %4702 = vset.pattern.permute.xlu1 %v9834_v53  ;;  %v1620_v26 = vadd.f32 %v1492_v48, %v909_v24  ;;  %v10263_v48 = vld [vmem:[#allocation133_spill] sm:$0xff] }
 0x18b   : > { %v4756_v22 = vpop.eup %4755  ;;  %v3456_v29 = vmul.f32 %v4754_v9, %v7578_v45  ;;  %v4245_v19 = vmul.f32 -1.442695, %v7796_v7  ;;  %v4247_v11 = vmul.f32 -1.442695, %v7800_v62  ;;  %2221 = vperm.xlu1 %4702, %v7618_v15   ;;  %v7815_v13 = vadd.f32 %v7688_v20, %v2038_v31  ;;  %v7830_v31 = vpop.permute.xlu0 %1369 }
 0x18c   : > { %v4758_v25 = vpop.eup %4757  ;;  %v3079_v50 = vadd.f32 1.0, %v4756_v22  ;;  %v7818_v60 = vadd.f32 %v7685_v5, %v2037_v8  ;;  %v689_v52 = vmul.f32 %v10262_v2, %v10257_v33  ;;  %v911_v9 = vadd.f32 %v10263_v48, %v687_v35  ;;  %10265 = vst [vmem:[#allocation72_spill] sm:$0xff] %v7830_v31 }
 0x18d   : > { %10260 = vst [vmem:[#allocation162_spill] sm:$0xff] %v7815_v13  ;;  %v4760_v45 = vpop.eup %4759  ;;  %3944 = vmatmul.mubr.f32.gmra.mrb[66].mxu0 %v3456_v29  ;;  %v3459_v24 = vmul.f32 %v4758_v25, %v7615_v61  ;;  %4771 = vpow2.f32 %v4245_v19  ;;  %v1493_v15 = vmul.f32 %v10136_v1, %v7663_v56  ;;  %v7828_v5 = vadd.f32 %v7691_v42, %v2039_v44  ;;  %v10266_v29 = vld [vmem:[#allocation126_spill] sm:$0xff]  ;;  %v10267_v44 = vld [vmem:[#allocation100_spill] sm:$0xff]  ;;  %v10268_v25 = vld [vmem:[#allocation97_spill] sm:$0xff] }
 0x18e   : > { %10261 = vst [vmem:[#allocation129_spill] sm:$0xff] %v7818_v60  ;;  %v4762_v36 = vpop.eup %4761  ;;  %v3461_v20 = vmul.f32 %v4760_v45, %v7625_v6  ;;  %4773 = vrcp.f32 %v3079_v50  ;;  %v2332_v8 = vmul.f32 %v6262_v14, %v2170_v17  ;;  %v2040_v61 = vadd.f32 %v7733_v41, %v1620_v26 }
 0x18f   : > { %10264 = vst [vmem:[#allocation58_spill] sm:$0xff] %v7828_v5  ;;  %3723 = vmatprep.mubr.f32.mxu1 %v3459_v24  ;;  %v3081_v33 = vadd.f32 1.0, %v4762_v36  ;;  %v1622_v22 = vadd.f32 %v1494_v49, %v1166_v37  ;;  %4775 = vpow2.f32 %v4247_v11  ;;  %4704 = vset.pattern.permute.xlu1 %v9905_v23  ;;  %v1168_v6 = vadd.f32 %v10266_v29, %v689_v52  ;;  %v10269_v36 = vld [vmem:[#allocation19_spill] sm:$0xff] }
 0x190   : > { %v4764_v35 = vpop.eup %4763  ;;  %3948 = vmatprep.mubr.f32.mxu0 %v3461_v20  ;;  %v1495_v42 = vmul.f32 %v10144_v47, %v7663_v56  ;;  %v7840_v19 = vadd.f32 %v10182_v46, %v10267_v44  ;;  %v7844_v50 = vadd.f32 %v10190_v21, %v10268_v25  ;;  %v2333_v49 = vmul.f32 %v6265_v63, %v2170_v17  ;;  %v10273_v44 = vld [vmem:[#allocation157_spill] sm:$0xff] }
 0x191   : > { %v4766_v41 = vpop.eup %4765  ;;  %4777 = vrcp.f32 %v3081_v33  ;;  %v3078_v37 = vadd.f32 1.0, %v4764_v35  ;;  %v1621_v26 = vadd.f32 %v1493_v15, %v911_v9  ;;  %1805 = vperm.xlu1 %4704, %v7645_v55   ;;  %v2334_v56 = vmul.f32 %v6268_v0, %v2170_v17  ;;  %v10272_v15 = vld [vmem:[#allocation115_spill] sm:$0xff] }
 0x192   : > { %v4768_v11 = vpop.eup %4767  ;;  %v3458_v52 = vmul.f32 %v4766_v41, %v7657_v34  ;;  %v4244_v45 = vmul.f32 -1.442695, %v7840_v19  ;;  %v4246_v24 = vmul.f32 -1.442695, %v7844_v50  ;;  %v7853_v20 = vmul.f32 %v10269_v36, %v2170_v17  ;;  %v7858_v34 = vpop.permute.xlu0 %1381  ;;  %v10274_v41 = vld [vmem:[#allocation107_spill] sm:$0xff] }
 0x193   : > { %4779 = vrcp.f32 %v3078_v37  ;;  %v3080_v48 = vadd.f32 1.0, %v4768_v11  ;;  %v2042_v33 = vadd.f32 %v7770_v4, %v1622_v22  ;;  %v7856_v55 = vadd.f32 %v2332_v8, %v2040_v61  ;;  %10271 = vst [vmem:[#allocation78_spill] sm:$0xff] %v7858_v34  ;;  %v10275_v8 = vld [vmem:[#allocation59_spill] sm:$0xff]  ;;  %v10276_v61 = vld [vmem:[#allocation76_spill] sm:$0xff]  ;;  %v7877_v37 = vld [vmem:[%s5466_s15 + $0xe8] sm:$0xff] }
 0x194   : > { %v4770_v35 = vpop.eup %4769  ;;  %3724 = vmatmul.mubr.f32.gmra.mrb[68].mxu1 %v3458_v52  ;;  %v1623_v9 = vadd.f32 %v1495_v42, %v1168_v6  ;;  %4781 = vpow2.f32 %v4244_v45  ;;  %v7862_v29 = vadd.f32 %v10153_v59, %v10272_v15  ;;  %v2041_v17 = vadd.f32 %v7738_v30, %v1621_v26  ;;  %v10277_v26 = vld [vmem:[#allocation60_spill] sm:$0xff]  ;;  %v10278_v11 = vld [vmem:[#allocation74_spill] sm:$0xff]  ;;  %v10282_v34 = vld [vmem:[#allocation43_spill] sm:$0xff] }
 0x195   : > { %10270 = vst [vmem:[#allocation75_spill] sm:$0xff] %v7856_v55  ;;  %v3460_v25 = vmul.f32 %v4770_v35, %v10273_v44  ;;  %4783 = vrcp.f32 %v3080_v48  ;;  %v7868_v4 = vadd.f32 %v10154_v58, %v10274_v41  ;;  %4705 = vset.pattern.permute.xlu1 %v9872_v27  ;;  %v915_v22 = vadd.f32 %v10276_v61, %v10275_v8  ;;  %v10279_v48 = vld [vmem:[#allocation106_spill] sm:$0xff]  ;;  %v10280_v41 = vld [vmem:[#allocation61_spill] sm:$0xff]  ;;  %v10281_v8 = vld [vmem:[#allocation136_spill] sm:$0xff] }
 0x196   : > { %4785 = vpow2.f32 %v4246_v24  ;;  %v1496_v6 = vmul.f32 %v10121_v40, %v7714_v39  ;;  %v4249_v42 = vmul.f32 -1.442695, %v7862_v29  ;;  %1389 = vperm.xlu1 %4705, %v7877_v37   ;;  %v1172_v52 = vadd.f32 %v10278_v11, %v10277_v26  ;;  %v10283_v11 = vld [vmem:[#allocation160_spill] sm:$0xff] }
 0x197   : > { %v4772_v30 = vpop.eup %4771  ;;  %3949 = vmatmul.mubr.f32.gmra.mrb[68].mxu0 %v3460_v25  ;;  %v1498_v45 = vmul.f32 %v10132_v10, %v7714_v39  ;;  %v4251_v24 = vmul.f32 -1.442695, %v7868_v4  ;;  %v7887_v35 = vadd.f32 %v10182_v46, %v10279_v48  ;;  %v917_v61 = vadd.f32 %v10281_v8, %v10280_v41  ;;  %v1754_v41 = vpop.permute.xlu0 %1753 }
 0x198   : > { %v4774_v15 = vpop.eup %4773  ;;  %v3083_v44 = vadd.f32 1.0, %v4772_v30  ;;  %4787 = vpow2.f32 %v4249_v42  ;;  %v7893_v25 = vadd.f32 %v10190_v21, %v10282_v34  ;;  %v1497_v3 = vmul.f32 %v10136_v1, %v7714_v39 }
 0x199   : > { %v4776_v26 = vpop.eup %4775  ;;  %v3463_v31 = vmul.f32 %v4774_v15, %v10283_v11  ;;  %4789 = vpow2.f32 %v4251_v24  ;;  %v4248_v48 = vmul.f32 -1.442695, %v7887_v35  ;;  %v7899_v55 = vadd.f32 %v2334_v56, %v2042_v33  ;;  %v10286_v11 = vld [vmem:[#allocation23_spill] sm:$0xff]  ;;  %v10287_v56 = vld [vmem:[#allocation62_spill] sm:$0xff]  ;;  %v10288_v33 = vld [vmem:[#allocation137_spill] sm:$0xff] }
 0x19a   : > { %4791 = vrcp.f32 %v3083_v44  ;;  %v3085_v42 = vadd.f32 1.0, %v4776_v26  ;;  %v4250_v30 = vmul.f32 -1.442695, %v7893_v25  ;;  %4706 = vset.pattern.permute.xlu1 %v9855_v57  ;;  %v7903_v8 = vadd.f32 %v2333_v49, %v2041_v17 }
 0x19b   : > { %10284 = vst [vmem:[#allocation83_spill] sm:$0xff] %v7899_v55  ;;  %v4778_v34 = vpop.eup %4777  ;;  %3728 = vmatprep.mubr.f32.mxu1 %v3463_v31  ;;  %v2043_v24 = vadd.f32 %v7779_v16, %v1623_v9  ;;  %v1624_v15 = vadd.f32 %v1496_v6, %v915_v22  ;;  %4793 = vpow2.f32 %v4248_v48  ;;  %v1174_v44 = vadd.f32 %v10288_v33, %v10287_v56  ;;  %v10289_v31 = vld [vmem:[#allocation12_spill] sm:$0xff]  ;;  %v7913_v9 = vpop.permute.xlu1 %1337  ;;  %v10290_v22 = vld [vmem:[#allocation13_spill] sm:$0xff] }
 0x19c   : > { %10285 = vst [vmem:[#allocation130_spill] sm:$0xff] %v7903_v8  ;;  %v3465_v13 = vmul.f32 %v4778_v34, %v10286_v11  ;;  %4795 = vrcp.f32 %v3085_v42  ;;  %v1499_v26 = vmul.f32 %v10144_v47, %v7714_v39  ;;  %v1626_v51 = vadd.f32 %v1498_v45, %v1172_v52  ;;  %v10291_v42 = vld [vmem:[#allocation80_spill] sm:$0xff]  ;;  %v10292_v34 = vld [vmem:[#allocation6_spill] sm:$0xff]  ;;  %v7920_v39 = vld [vmem:[%s5466_s15 + $0xf0] sm:$0xff]  ;;  %v7922_v52 = vpop.f32.mrb[42].mxu0  ;;  %v7937_v56 = vpop.f32.mrb[42].mxu1 }
 0x19d   : > { %v4780_v55 = vpop.eup %4779  ;;  %v1625_v5 = vadd.f32 %v1497_v3, %v917_v61  ;;  %4797 = vpow2.f32 %v4250_v30  ;;  %v1916_v49 = vmul.f32 %v10289_v31, %v1754_v41  ;;  %v1917_v6 = vmul.f32 %v10290_v22, %v1754_v41  ;;  %10293 = vst [vmem:[#allocation131_spill] sm:$0xff] %v7922_v52  ;;  %v10295_v61 = vld [vmem:[#allocation32_spill] sm:$0xff]  ;;  %1393 = vperm.xlu0 %4708, %v7920_v39   ;;  %v7939_v33 = vpop.f32.mrb[43].mxu0 }
 0x19e   : > { %v4782_v17 = vpop.eup %4781  ;;  %3953 = vmatprep.mubr.f32.mxu0 %v3465_v13  ;;  %v3462_v16 = vmul.f32 %v4780_v55, %v7758_v32  ;;  %v1918_v48 = vmul.f32 %v10116_v38, %v1754_v41  ;;  %v694_v11 = vmul.f32 %v10292_v34, %v10291_v42  ;;  %v7925_v45 = vadd.f32 %v7853_v20, %v2043_v24  ;;  %v10296_v55 = vld [vmem:[#allocation5_spill] sm:$0xff] }
 0x19f   : > { %v4784_v3 = vpop.eup %4783  ;;  %v3082_v13 = vadd.f32 1.0, %v4782_v17  ;;  %v7929_v32 = vadd.f32 %v10153_v59, %v10295_v61  ;;  %v7933_v30 = vadd.f32 %v10154_v58, %v10296_v55  ;;  %584 = vperm.xlu1 %4706, %v7920_v39   ;;  %10297 = vst [vmem:[#allocation47_spill] sm:$0xff] %v7937_v56  ;;  %10298 = vst [vmem:[#allocation79_spill] sm:$0xff] %v7939_v33  ;;  %v10299_v61 = vld [vmem:[#allocation7_spill] sm:$0xff]  ;;  %v7945_v55 = vpop.f32.mrb[43].mxu1 }
 0x1a0   : > { %10294 = vst [vmem:[#allocation46_spill] sm:$0xff] %v7925_v45  ;;  %v4786_v52 = vpop.eup %4785  ;;  %3729 = vmatmul.mubr.f32.gmra.mrb[70].mxu1 %v3462_v16  ;;  %v3464_v20 = vmul.f32 %v4784_v3, %v7765_v12  ;;  %v1627_v24 = vadd.f32 %v1499_v26, %v1174_v44  ;;  %v1919_v17 = vmul.f32 %v10118_v43, %v1754_v41  ;;  %10300 = vst [vmem:[#allocation48_spill] sm:$0xff] %v7945_v55  ;;  %v10301_v12 = vld [vmem:[#allocation138_spill] sm:$0xff] }
 0x1a1   : > { %v696_v45 = vmul.f32 %v10299_v61, %v10291_v42  ;;  %4799 = vrcp.f32 %v3082_v13  ;;  %v3084_v8 = vadd.f32 1.0, %v4786_v52  ;;  %v7947_v60 = vadd.f32 %v1916_v49, %v1624_v15  ;;  %v10302_v15 = vld [vmem:[#allocation30_spill] sm:$0xff]  ;;  %4711 = vset.pattern.permute.xlu0 %v9905_v23 }
 0x1a2   : > { %v4253_v56 = vmul.f32 -1.442695, %v7929_v32  ;;  %v4788_v28 = vpop.eup %4787  ;;  %3954 = vmatmul.mubr.f32.gmra.mrb[70].mxu0 %v3464_v20  ;;  %v7950_v33 = vadd.f32 %v1917_v6, %v1625_v5  ;;  %v7952_v16 = vadd.f32 %v1918_v48, %v1626_v51  ;;  %v921_v44 = vadd.f32 %v10301_v12, %v694_v11  ;;  %v10303_v6 = vld [vmem:[#allocation34_spill] sm:$0xff]  ;;  %1813 = vperm.xlu0 %4711, %v7920_v39   ;;  %v10304_v20 = vld [vmem:[#allocation31_spill] sm:$0xff] }
 0x1a3   : > { %v1500_v41 = vmul.f32 %v10121_v40, %v7913_v9  ;;  %v4790_v26 = vpop.eup %4789  ;;  %4801 = vrcp.f32 %v3084_v8  ;;  %v3087_v3 = vadd.f32 1.0, %v4788_v28  ;;  %v4255_v52 = vmul.f32 -1.442695, %v7933_v30  ;;  %4707 = vset.pattern.permute.xlu1 %v9905_v23 }
 0x1a4   : > { %v7960_v49 = vadd.f32 %v10182_v46, %v10302_v15  ;;  %v4792_v51 = vpop.eup %4791  ;;  %v3089_v5 = vadd.f32 1.0, %v4790_v26  ;;  %v1178_v48 = vadd.f32 %v10303_v6, %v696_v45  ;;  %4803 = vpow2.f32 %v4253_v56  ;;  %1809 = vperm.xlu1 %4707, %v7877_v37   ;;  %v2174_v6 = vpop.permute.xlu1 %2173 }
 0x1a5   : > { %v695_v11 = vmul.f32 %v10258_v54, %v10291_v42  ;;  %v4794_v28 = vpop.eup %4793  ;;  %v3467_v8 = vmul.f32 %v4792_v51, %v7796_v7  ;;  %4805 = vrcp.f32 %v3087_v3  ;;  %v7973_v23 = vadd.f32 %v10190_v21, %v10304_v20 }
 0x1a6   : > { %v4252_v13 = vmul.f32 -1.442695, %v7960_v49  ;;  %v4796_v12 = vpop.eup %4795  ;;  %4807 = vrcp.f32 %v3089_v5  ;;  %v3086_v45 = vadd.f32 1.0, %v4794_v28  ;;  %v1502_v56 = vmul.f32 %v10132_v10, %v7913_v9 }
 0x1a7   : > { %v697_v26 = vmul.f32 %v10262_v2, %v10291_v42  ;;  %v4798_v15 = vpop.eup %4797  ;;  %3733 = vmatprep.mubr.f32.mxu1 %v3467_v8  ;;  %v3469_v7 = vmul.f32 %v4796_v12, %v7800_v62  ;;  %v7980_v3 = vadd.f32 %v1919_v17, %v1627_v24  ;;  %4809 = vpow2.f32 %v4255_v52  ;;  %v10305_v42 = vld [vmem:[#allocation35_spill] sm:$0xff]  ;;  %v10306_v24 = vld [vmem:[#allocation53_spill] sm:$0xff] }
 0x1a8   : > { %v4254_v51 = vmul.f32 -1.442695, %v7973_v23  ;;  %4811 = vrcp.f32 %v3086_v45  ;;  %v3088_v20 = vadd.f32 1.0, %v4798_v15  ;;  %v7983_v5 = vadd.f32 %v1500_v41, %v921_v44  ;;  %4709 = vset.pattern.permute.xlu1 %v9834_v53  ;;  %v10307_v44 = vld [vmem:[#allocation37_spill] sm:$0xff] }
 0x1a9   : > { %v7985_v28 = vadd.f32 %v1502_v56, %v1178_v48  ;;  %3958 = vmatprep.mubr.f32.mxu0 %v3469_v7  ;;  %v923_v55 = vadd.f32 %v10305_v42, %v695_v11  ;;  %v1501_v62 = vmul.f32 %v10136_v1, %v7913_v9  ;;  %4813 = vpow2.f32 %v4252_v13  ;;  %2229 = vperm.xlu1 %4709, %v7877_v37   ;;  %v10308_v48 = vld [vmem:[#allocation113_spill] sm:$0xff]  ;;  %v10309_v13 = vld [vmem:[#allocation52_spill] sm:$0xff]  ;;  %v10310_v56 = vld [vmem:[#allocation66_spill] sm:$0xff] }
 0x1aa   : > { %v7993_v17 = vadd.f32 %v10153_v59, %v10306_v24  ;;  %4815 = vrcp.f32 %v3088_v20  ;;  %v1180_v41 = vadd.f32 %v10307_v44, %v697_v26  ;;  %v2336_v52 = vmul.f32 %v6262_v14, %v2174_v6 }
 0x1ab   : > { %v8000_v8 = vadd.f32 %v10154_v58, %v10308_v48  ;;  %v4800_v11 = vpop.eup %4799  ;;  %4817 = vpow2.f32 %v4254_v51  ;;  %v8005_v45 = vadd.f32 %v10182_v46, %v10309_v13  ;;  %v8009_v37 = vadd.f32 %v10190_v21, %v10310_v56  ;;  %v1758_v48 = vpop.permute.xlu1 %1757 }
 0x1ac   : > { %v4257_v12 = vmul.f32 -1.442695, %v7993_v17  ;;  %v3466_v26 = vmul.f32 %v4800_v11, %v7840_v19  ;;  %v1503_v15 = vmul.f32 %v10144_v47, %v7913_v9  ;;  %v2337_v7 = vmul.f32 %v6265_v63, %v2174_v6  ;;  %v8030_v63 = vld [vmem:[%s5466_s15 + $0xf8] sm:$0xff]  ;;  %s286_s15 = sand.u32 1, %s5286_s25  }
 0x1ad   : > { %v4259_v20 = vmul.f32 -1.442695, %v8000_v8  ;;  %v4802_v51 = vpop.eup %4801  ;;  %v8016_v42 = vadd.f32 %v1501_v62, %v923_v55  ;;  %v4256_v24 = vmul.f32 -1.442695, %v8005_v45  ;;  %v4258_v44 = vmul.f32 -1.442695, %v8009_v37  ;;  %4710 = vset.pattern.permute.xlu1 %v9855_v57  ;;  %1817 = vperm.xlu0 %4711, %v8030_v63  }
 0x1ae   : > { %4819 = vpow2.f32 %v4257_v12  ;;  %v4804_v19 = vpop.eup %4803  ;;  %3734 = vmatmul.mubr.f32.gmra.mrb[72].mxu1 %v3466_v26  ;;  %v3468_v9 = vmul.f32 %v4802_v51, %v7844_v50  ;;  %v8022_v11 = vadd.f32 %v1503_v15, %v1180_v41  ;;  %v2338_v13 = vmul.f32 %v6268_v0, %v2174_v6  ;;  %v8032_v57 = vpop.f32.mrb[44].mxu0  ;;  %v10314_v15 = vld [vmem:[#allocation117_spill] sm:$0xff]  ;;  %589 = vperm.xlu1 %4710, %v8030_v63   ;;  %s4223_s22 = sshll.u32 %s286_s15, 8  ;;  %s9668_s28 = scalar_lea.sflag [#allocation3], %s286_s15 }
 0x1af   : > { %4821 = vpow2.f32 %v4259_v20  ;;  %v4806_v55 = vpop.eup %4805  ;;  %v3091_v62 = vadd.f32 1.0, %v4804_v19  ;;  %v2339_v12 = vmul.f32 %v10269_v36, %v2174_v6  ;;  %v8027_v56 = vadd.f32 %v2336_v52, %v7947_v60  ;;  %10312 = vst [vmem:[#allocation87_spill] sm:$0xff] %v8032_v57  ;;  %v8043_v60 = vpop.f32.mrb[44].mxu1  ;;  %s9415_s23 = scalar_lea.vmem [#allocation2], %s4223_s22 }
 0x1b0   : > { %4823 = vpow2.f32 %v4256_v24  ;;  %v4808_v26 = vpop.eup %4807  ;;  %3959 = vmatmul.mubr.f32.gmra.mrb[72].mxu0 %v3468_v9  ;;  %v3471_v50 = vmul.f32 %v4806_v55, %v7862_v29  ;;  %v8036_v41 = vadd.f32 %v2337_v7, %v7950_v33  ;;  %v8040_v20 = vadd.f32 %v10153_v59, %v10314_v15  ;;  %10315 = vst [vmem:[#allocation49_spill] sm:$0xff] %v8043_v60  ;;  %v8045_v6 = vpop.f32.mrb[45].mxu0  ;;  %v10317_v24 = vld [vmem:[#allocation69_spill] sm:$0xff]  ;;  %v10318_v33 = vld [vmem:[#allocation114_spill] sm:$0xff]  ;;  %v10320_v60 = vld [vmem:[#allocation68_spill] sm:$0xff]  ;;  %s4145_s8 = sshll.u32 %s9415_s23, 4  ;;  %s9663_s8 = int_to_ptr.vmem [resolvable:$true] %s4145_s8 }
 0x1b1   : > { %10311 = vst [vmem:[#allocation84_spill] sm:$0xff] %v8027_v56  ;;  %4825 = vpow2.f32 %v4258_v44  ;;  %10316 = vst [vmem:[#allocation85_spill] sm:$0xff] %v8045_v6  ;;  %v4810_v52 = vpop.eup %4809  ;;  %v3473_v51 = vmul.f32 %v4808_v26, %v7868_v4  ;;  %v8050_v29 = vadd.f32 %v10154_v58, %v10317_v24  ;;  %v8054_v7 = vadd.f32 %v10182_v46, %v10318_v33  ;;  %v8057_v44 = vpop.f32.mrb[45].mxu1  ;;  %v10321_v56 = vld [vmem:[#allocation95_spill] sm:$0xff]  ;;  %s5232_s21 = scalar_lea.vmem %s9663_s8, 4096  ;;  %p5239_p0 = scmp.lt.s32.totalorder %s9663_s8, %s5237_s17 }
 0x1b2   : > { %10313 = vst [vmem:[#allocation91_spill] sm:$0xff] %v8036_v41  ;;  %4827 = vrcp.f32 %v3091_v62  ;;  %10319 = vst [vmem:[#allocation20_spill] sm:$0xff] %v8057_v44  ;;  %v4812_v19 = vpop.eup %4811  ;;  %3738 = vmatprep.mubr.f32.mxu1 %v3471_v50  ;;  %v3093_v9 = vadd.f32 1.0, %v4810_v52  ;;  %v1920_v55 = vmul.f32 %v10289_v31, %v1758_v48  ;;  %v1921_v4 = vmul.f32 %v10290_v22, %v1758_v48  ;;  %v8066_v44 = vpop.permute.xlu1 %1341  ;;  %p5233_p11 = scmp.ne.s32.totalorder %s9663_s8, %s5232_s21  ;;  %p5240_p1 = scmp.lt.s32.totalorder %s5238_s19, %s5232_s21 }
 0x1b3   : > { %v4261_v62 = vmul.f32 -1.442695, %v8040_v20  ;;  %v4814_v26 = vpop.eup %4813  ;;  %3963 = vmatprep.mubr.f32.mxu0 %v3473_v51  ;;  %v3470_v15 = vmul.f32 %v4812_v19, %v7887_v35  ;;  %v1922_v24 = vmul.f32 %v10116_v38, %v1758_v48  ;;  %v1923_v33 = vmul.f32 %v10118_v43, %v1758_v48  ;;  %4712 = vset.pattern.permute.xlu1 %v9872_v27 }
 0x1b4   : > { %v4263_v6 = vmul.f32 -1.442695, %v8050_v29  ;;  %v4816_v50 = vpop.eup %4815  ;;  %4829 = vrcp.f32 %v3093_v9  ;;  %v3090_v52 = vadd.f32 1.0, %v4814_v26  ;;  %v8070_v57 = vadd.f32 %v10190_v21, %v10320_v60  ;;  %1397 = vperm.xlu1 %4712, %v8030_v63   ;;  %4714 = vset.pattern.permute.xlu0 %v9834_v53  ;;  %p5234_p12 = pnand %p5233_p11, %p5383_p5  ;;  %p5241_p2 = por %p5240_p1, %p5239_p0 }
 0x1b5   : > { %v698_v51 = vmul.f32 %v10292_v34, %v10321_v56  ;;  %v4818_v35 = vpop.eup %4817  ;;  %3739 = vmatmul.mubr.f32.gmra.mrb[74].mxu1 %v3470_v15  ;;  %v3472_v48 = vmul.f32 %v4816_v50, %v7893_v25  ;;  %4831 = vpow2.f32 %v4261_v62  ;;  %v4260_v19 = vmul.f32 -1.442695, %v8054_v7 }
 0x1b6   : > { %v700_v9 = vmul.f32 %v10299_v61, %v10321_v56  ;;  %4833 = vrcp.f32 %v3090_v52  ;;  %v3092_v60 = vadd.f32 1.0, %v4818_v35  ;;  %v8081_v26 = vadd.f32 %v2338_v13, %v7952_v16  ;;  %v10328_v35 = vld [vmem:[#allocation140_spill] sm:$0xff]  ;;  %p5235_p13 = pneg %p5234_p12 }
 0x1b7   : > { %v8084_v41 = vadd.f32 %v2339_v12, %v7980_v3  ;;  %3964 = vmatmul.mubr.f32.gmra.mrb[74].mxu0 %v3472_v48  ;;  %v8088_v25 = vadd.f32 %v1920_v55, %v7983_v5  ;;  %v8091_v62 = vadd.f32 %v1921_v4, %v8016_v42  ;;  %v8094_v15 = vadd.f32 %v1922_v24, %v7985_v28  ;;  %v10327_v5 = vld [vmem:[#allocation139_spill] sm:$0xff]  ;;  %v8104_v4 = vpop.permute.xlu1 %524  ;;  %v10329_v24 = vld [vmem:[#allocation77_spill] sm:$0xff] }
 0x1b8   : > { %10322 = vst [vmem:[#allocation88_spill] sm:$0xff] %v8081_v26  ;;  %v4820_v27 = vpop.eup %4819  ;;  %4835 = vpow2.f32 %v4263_v6  ;;  %v8097_v3 = vadd.f32 %v1923_v33, %v8022_v11  ;;  %v4262_v13 = vmul.f32 -1.442695, %v8070_v57  ;;  %v927_v55 = vadd.f32 %v10327_v5, %v698_v51  ;;  %4713 = vset.pattern.permute.xlu1 %v9834_v53  ;;  %v10333_v5 = vld [vmem:[#allocation143_spill] sm:$0xff]  ;;  %p5242_p3 = pnand %p5241_p2, %p5235_p13 }
 0x1b9   : > { %10323 = vst [vmem:[#allocation156_spill] sm:$0xff] %v8088_v25  ;;  %10324 = vst [vmem:[#allocation86_spill] sm:$0xff] %v8091_v62  ;;  %v4822_v50 = vpop.eup %4821  ;;  %4837 = vrcp.f32 %v3092_v60  ;;  %v3095_v16 = vadd.f32 1.0, %v4820_v27  ;;  %v8102_v42 = vadd.f32 %v10328_v35, %v700_v9  ;;  %v1504_v11 = vmul.f32 %v10121_v40, %v8066_v44  ;;  %2233 = vperm.xlu1 %4713, %v7920_v39   ;;  %v10330_v9 = vld [vmem:[#allocation36_spill] sm:$0xff] }
 0x1ba   : > { %10325 = vst [vmem:[#allocation21_spill] sm:$0xff] %v8094_v15  ;;  %10326 = vst [vmem:[#allocation92_spill] sm:$0xff] %v8097_v3  ;;  %v4824_v12 = vpop.eup %4823  ;;  %v3097_v52 = vadd.f32 1.0, %v4822_v50  ;;  %4839 = vpow2.f32 %v4260_v19  ;;  %v8111_v33 = vadd.f32 %v10153_v59, %v10329_v24  ;;  %v1506_v19 = vmul.f32 %v10132_v10, %v8066_v44  ;;  %v10331_v50 = vld [vmem:[#allocation127_spill] sm:$0xff] }
 0x1bb   : > { %v4826_v28 = vpop.eup %4825  ;;  %4841 = vrcp.f32 %v3095_v16  ;;  %v3094_v6 = vadd.f32 1.0, %v4824_v12  ;;  %v8118_v53 = vadd.f32 %v10154_v58, %v10330_v9  ;;  %v8124_v16 = vadd.f32 %v10182_v46, %v10331_v50  ;;  %v10332_v12 = vld [vmem:[#allocation73_spill] sm:$0xff]  ;;  %v10334_v50 = vld [vmem:[#allocation150_spill] sm:$0xff] }
 0x1bc   : > { %v4828_v51 = vpop.eup %4827  ;;  %4843 = vrcp.f32 %v3097_v52  ;;  %v3096_v48 = vadd.f32 1.0, %v4826_v28  ;;  %v4265_v27 = vmul.f32 -1.442695, %v8111_v33  ;;  %v8129_v52 = vadd.f32 %v10190_v21, %v10332_v12 }
 0x1bd   : > { %v3475_v60 = vmul.f32 %v4828_v51, %v7929_v32  ;;  %4845 = vrcp.f32 %v3094_v6  ;;  %v4267_v39 = vmul.f32 -1.442695, %v8118_v53  ;;  %v8133_v35 = vadd.f32 %v10153_v59, %v10333_v5  ;;  %2237 = vperm.xlu1 %4713, %v8030_v63  }
 0x1be   : > { %4847 = vrcp.f32 %v3096_v48  ;;  %v4830_v28 = vpop.eup %4829  ;;  %v699_v32 = vmul.f32 %v10258_v54, %v10321_v56  ;;  %v701_v6 = vmul.f32 %v10262_v2, %v10321_v56  ;;  %v4264_v24 = vmul.f32 -1.442695, %v8124_v16  ;;  %v10335_v56 = vld [vmem:[#allocation146_spill] sm:$0xff] }
 0x1bf   : > { %3743 = vmatprep.mubr.f32.mxu1 %v3475_v60  ;;  %4849 = vpow2.f32 %v4262_v13  ;;  %v4832_v51 = vpop.eup %4831  ;;  %v3477_v48 = vmul.f32 %v4830_v28, %v7933_v30  ;;  %v4266_v9 = vmul.f32 -1.442695, %v8129_v52  ;;  %v8145_v60 = vadd.f32 %v10154_v58, %v10334_v50  ;;  %v8147_v13 = vpop.permute.xlu1 %1761  ;;  %v10336_v28 = vld [vmem:[#allocation122_spill] sm:$0xff] }
 0x1c0   : > { %4851 = vpow2.f32 %v4265_v27  ;;  %v4834_v12 = vpop.eup %4833  ;;  %v3099_v5 = vadd.f32 1.0, %v4832_v51  ;;  %v8149_v15 = vadd.f32 %v1504_v11, %v927_v55  ;;  %v8153_v63 = vadd.f32 %v10182_v46, %v10335_v56  ;;  %v10337_v11 = vld [vmem:[#allocation145_spill] sm:$0xff] }
 0x1c1   : > { %4853 = vpow2.f32 %v4267_v39  ;;  %3968 = vmatprep.mubr.f32.mxu0 %v3477_v48  ;;  %v3474_v30 = vmul.f32 %v4834_v12, %v7960_v49  ;;  %v4269_v27 = vmul.f32 -1.442695, %v8133_v35  ;;  %v8159_v50 = vadd.f32 %v10190_v21, %v10336_v28  ;;  %v10338_v49 = vld [vmem:[#allocation121_spill] sm:$0xff] }
 0x1c2   : > { %v4836_v25 = vpop.eup %4835  ;;  %4855 = vpow2.f32 %v4264_v24  ;;  %v929_v39 = vadd.f32 %v10337_v11, %v699_v32  ;;  %v1505_v51 = vmul.f32 %v10136_v1, %v8066_v44  ;;  %v1186_v24 = vadd.f32 %v10338_v49, %v701_v6  ;;  %v10340_v49 = vld [vmem:[#allocation71_spill] sm:$0xff] }
 0x1c3   : > { %v4838_v3 = vpop.eup %4837  ;;  %4857 = vrcp.f32 %v3099_v5  ;;  %v3101_v55 = vadd.f32 1.0, %v4836_v25  ;;  %3744 = vmatmul.mubr.f32.gmra.mrb[76].mxu1 %v3474_v30  ;;  %v4271_v12 = vmul.f32 -1.442695, %v8145_v60  ;;  %v4268_v5 = vmul.f32 -1.442695, %v8153_v63  ;;  %v8174_v6 = vpop.permute.xlu1 %2181 }
 0x1c4   : > { %v4840_v56 = vpop.eup %4839  ;;  %v3476_v48 = vmul.f32 %v4838_v3, %v7973_v23  ;;  %4859 = vpow2.f32 %v4266_v9  ;;  %v702_v25 = vmul.f32 %v10292_v34, %v8104_v4  ;;  %v1507_v23 = vmul.f32 %v10144_v47, %v8066_v44 }
 0x1c5   : > { %v4842_v62 = vpop.eup %4841  ;;  %4861 = vrcp.f32 %v3101_v55  ;;  %v3098_v28 = vadd.f32 1.0, %v4840_v56  ;;  %v4270_v3 = vmul.f32 -1.442695, %v8159_v50  ;;  %v8178_v55 = vadd.f32 %v1506_v19, %v8102_v42  ;;  %v10339_v42 = vld [vmem:[#allocation124_spill] sm:$0xff] }
 0x1c6   : > { %v4844_v32 = vpop.eup %4843  ;;  %3969 = vmatmul.mubr.f32.gmra.mrb[76].mxu0 %v3476_v48  ;;  %v3479_v11 = vmul.f32 %v4842_v62, %v7993_v17  ;;  %4863 = vpow2.f32 %v4269_v27  ;;  %v704_v56 = vmul.f32 %v10299_v61, %v8104_v4  ;;  %v8183_v44 = vadd.f32 %v1505_v51, %v929_v39 }
 0x1c7   : > { %v4846_v9 = vpop.eup %4845  ;;  %v3481_v30 = vmul.f32 %v4844_v32, %v8000_v8  ;;  %4865 = vrcp.f32 %v3098_v28  ;;  %v1508_v62 = vmul.f32 %v10121_v40, %v7750_v18  ;;  %v933_v19 = vadd.f32 %v10339_v42, %v702_v25  ;;  %v8193_v32 = vpop.f32.mrb[46].mxu0 }
 0x1c8   : > { %v4848_v48 = vpop.eup %4847  ;;  %3748 = vmatprep.mubr.f32.mxu1 %v3479_v11  ;;  %v3478_v17 = vmul.f32 %v4846_v9, %v8005_v45  ;;  %4867 = vpow2.f32 %v4271_v12  ;;  %v8191_v28 = vadd.f32 %v10153_v59, %v10340_v49  ;;  %10341 = vst [vmem:[#allocation134_spill] sm:$0xff] %v8193_v32  ;;  %v8195_v45 = vpop.f32.mrb[46].mxu1  ;;  %v8197_v12 = vadd.f32 %v1507_v23, %v1186_v24 }
 0x1c9   : > { %v4850_v27 = vpop.eup %4849  ;;  %3973 = vmatprep.mubr.f32.mxu0 %v3481_v30  ;;  %v3480_v8 = vmul.f32 %v4848_v48, %v8009_v37  ;;  %4869 = vpow2.f32 %v4268_v5  ;;  %10342 = vst [vmem:[#allocation135_spill] sm:$0xff] %v8195_v45  ;;  %v703_v37 = vmul.f32 %v10258_v54, %v8104_v4  ;;  %v8201_v5 = vpop.f32.mrb[47].mxu0  ;;  %v10345_v30 = vld [vmem:[#allocation125_spill] sm:$0xff]  ;;  %v705_v42 = vmul.f32 %v10262_v2, %v8104_v4 }
 0x1ca   : > { %v4852_v39 = vpop.eup %4851  ;;  %3749 = vmatmul.mubr.f32.gmra.mrb[78].mxu1 %v3478_v17  ;;  %v3100_v51 = vadd.f32 1.0, %v4850_v27  ;;  %4871 = vpow2.f32 %v4270_v3  ;;  %10343 = vst [vmem:[#allocation82_spill] sm:$0xff] %v8201_v5  ;;  %v8203_v25 = vpop.f32.mrb[47].mxu1  ;;  %v1190_v48 = vadd.f32 %v10345_v30, %v704_v56  ;;  %v10346_v17 = vld [vmem:[#allocation158_spill] sm:$0xff] }
 0x1cb   : > { %10344 = vst [vmem:[#allocation93_spill] sm:$0xff] %v8203_v25  ;;  %v4854_v11 = vpop.eup %4853  ;;  %3974 = vmatmul.mubr.f32.gmra.mrb[78].mxu0 %v3480_v8  ;;  %v3103_v9 = vadd.f32 1.0, %v4852_v39  ;;  %v8210_v24 = vadd.f32 %v10154_v58, %v10346_v17  ;;  %v8212_v23 = vpop.f32.mrb[48].mxu0  ;;  %v1510_v8 = vmul.f32 %v10132_v10, %v7750_v18  ;;  %v4273_v39 = vmul.f32 -1.442695, %v8191_v28 }
 0x1cc   : > { %10347 = vst [vmem:[#allocation141_spill] sm:$0xff] %v8212_v23  ;;  %v8214_v3 = vpop.f32.mrb[48].mxu1  ;;  %v4856_v27 = vpop.eup %4855  ;;  %4873 = vrcp.f32 %v3100_v51  ;;  %v3105_v49 = vadd.f32 1.0, %v4854_v11  ;;  %v1636_v25 = vadd.f32 %v1508_v62, %v933_v19  ;;  %v1509_v17 = vmul.f32 %v10136_v1, %v7750_v18  ;;  %v10351_v23 = vld [vmem:[#allocation149_spill] sm:$0xff]  ;;  %v10352_v62 = vld [vmem:[#allocation144_spill] sm:$0xff] }
 0x1cd   : > { %10348 = vst [vmem:[#allocation24_spill] sm:$0xff] %v8214_v3  ;;  %v8219_v56 = vpop.permute.xlu1 %529  ;;  %v4858_v30 = vpop.eup %4857  ;;  %4875 = vrcp.f32 %v3103_v9  ;;  %v3102_v4 = vadd.f32 1.0, %v4856_v27  ;;  %v935_v45 = vadd.f32 %v10351_v23, %v703_v37  ;;  %v4275_v32 = vmul.f32 -1.442695, %v8210_v24 }
 0x1ce   : > { %v8223_v5 = vpop.f32.mrb[49].mxu0  ;;  %v8225_v3 = vpop.f32.mrb[49].mxu1  ;;  %v3483_v11 = vmul.f32 %v4858_v30, %v8040_v20  ;;  %4877 = vrcp.f32 %v3105_v49  ;;  %v1192_v19 = vadd.f32 %v10352_v62, %v705_v42  ;;  %v1511_v27 = vmul.f32 %v10144_v47, %v7750_v18  ;;  %v10353_v20 = vld [vmem:[#allocation147_spill] sm:$0xff]  ;;  %v10354_v42 = vld [vmem:[#allocation38_spill] sm:$0xff] }
 0x1cf   : > { %10349 = vst [vmem:[#allocation142_spill] sm:$0xff] %v8223_v5  ;;  %10350 = vst [vmem:[#allocation81_spill] sm:$0xff] %v8225_v3  ;;  %v4860_v51 = vpop.eup %4859  ;;  %v1766_v10 = vpop.permute.xlu0 %1765  ;;  %4879 = vrcp.f32 %v3102_v4  ;;  %v8234_v1 = vadd.f32 %v1510_v8, %v1190_v48  ;;  %v8238_v37 = vadd.f32 %v10182_v46, %v10353_v20  ;;  %v8243_v4 = vadd.f32 %v10190_v21, %v10354_v42 }
 0x1d0   : > { %v4862_v26 = vpop.eup %4861  ;;  %v3104_v9 = vadd.f32 1.0, %v4860_v51  ;;  %3753 = vmatprep.mubr.f32.mxu1 %v3483_v11  ;;  %4881 = vpow2.f32 %v4273_v39  ;;  %v1928_v30 = vmul.f32 %v10289_v31, %v1766_v10  ;;  %v1929_v11 = vmul.f32 %v10290_v22, %v1766_v10 }
 0x1d1   : > { %v4864_v5 = vpop.eup %4863  ;;  %v3485_v3 = vmul.f32 %v4862_v26, %v8050_v29  ;;  %v1637_v26 = vadd.f32 %v1509_v17, %v935_v45  ;;  %v4272_v48 = vmul.f32 -1.442695, %v8238_v37  ;;  %v8247_v8 = vpop.permute.xlu1 %1349  ;;  %v1930_v20 = vmul.f32 %v10116_v38, %v1766_v10 }
 0x1d2   : > { %v4866_v23 = vpop.eup %4865  ;;  %4883 = vrcp.f32 %v3104_v9  ;;  %v3107_v49 = vadd.f32 1.0, %v4864_v5  ;;  %v1639_v5 = vadd.f32 %v1511_v27, %v1192_v19  ;;  %v1931_v45 = vmul.f32 %v10118_v43, %v1766_v10  ;;  %v10355_v27 = vld [vmem:[#allocation161_spill] sm:$0xff]  ;;  %v10357_v10 = vld [vmem:[#allocation159_spill] sm:$0xff] }
 0x1d3   : > { %v4868_v18 = vpop.eup %4867  ;;  %3978 = vmatprep.mubr.f32.mxu0 %v3485_v3  ;;  %v3482_v29 = vmul.f32 %v4866_v23, %v8054_v7  ;;  %4885 = vpow2.f32 %v4275_v32  ;;  %v4274_v7 = vmul.f32 -1.442695, %v8243_v4  ;;  %v8253_v3 = vadd.f32 %v1928_v30, %v1636_v25  ;;  %v10358_v30 = vld [vmem:[#allocation40_spill] sm:$0xff] }
 0x1d4   : > { %v4870_v39 = vpop.eup %4869  ;;  %4887 = vrcp.f32 %v3107_v49  ;;  %v3109_v51 = vadd.f32 1.0, %v4868_v18  ;;  %v1924_v19 = vmul.f32 %v10289_v31, %v8147_v13  ;;  %v8259_v23 = vadd.f32 %v10153_v59, %v10355_v27  ;;  %v10356_v49 = vld [vmem:[#allocation41_spill] sm:$0xff] }
 0x1d5   : > { %v4872_v9 = vpop.eup %4871  ;;  %3754 = vmatmul.mubr.f32.gmra.mrb[80].mxu1 %v3482_v29  ;;  %v3106_v62 = vadd.f32 1.0, %v4870_v39  ;;  %4889 = vpow2.f32 %v4272_v48  ;;  %v8263_v42 = vadd.f32 %v10154_v58, %v10356_v49  ;;  %v8268_v25 = vadd.f32 %v10182_v46, %v10357_v10  ;;  %v8277_v27 = vpop.permute.xlu1 %2185 }
 0x1d6   : > { %4891 = vrcp.f32 %v3109_v51  ;;  %v3108_v32 = vadd.f32 1.0, %v4872_v9  ;;  %v4874_v17 = vpop.eup %4873  ;;  %v8272_v48 = vadd.f32 %v10190_v21, %v10358_v30  ;;  %v4277_v9 = vmul.f32 -1.442695, %v8259_v23 }
 0x1d7   : > { %4893 = vrcp.f32 %v3106_v62  ;;  %v4876_v18 = vpop.eup %4875  ;;  %v3484_v29 = vmul.f32 %v4874_v17, %v8070_v57  ;;  %v4279_v62 = vmul.f32 -1.442695, %v8263_v42  ;;  %v1925_v17 = vmul.f32 %v10290_v22, %v8147_v13 }
 0x1d8   : > { %4895 = vrcp.f32 %v3108_v32  ;;  %v4878_v39 = vpop.eup %4877  ;;  %v3487_v51 = vmul.f32 %v4876_v18, %v8111_v33  ;;  %v1926_v49 = vmul.f32 %v10116_v38, %v8147_v13  ;;  %v4276_v10 = vmul.f32 -1.442695, %v8268_v25  ;;  %v8285_v33 = vpop.f32.mrb[50].mxu0 }
 0x1d9   : > { %4897 = vpow2.f32 %v4274_v7  ;;  %v4880_v57 = vpop.eup %4879  ;;  %3979 = vmatmul.mubr.f32.gmra.mrb[80].mxu0 %v3484_v29  ;;  %v3489_v32 = vmul.f32 %v4878_v39, %v8118_v53  ;;  %10359 = vst [vmem:[#allocation63_spill] sm:$0xff] %v8285_v33  ;;  %v8288_v30 = vadd.f32 %v1929_v11, %v1637_v26  ;;  %v4278_v29 = vmul.f32 -1.442695, %v8272_v48  ;;  %v8291_v53 = vpop.f32.mrb[50].mxu1 }
 0x1da   : > { %v4882_v7 = vpop.eup %4881  ;;  %3758 = vmatprep.mubr.f32.mxu1 %v3487_v51  ;;  %v3486_v18 = vmul.f32 %v4880_v57, %v8124_v16  ;;  %4899 = vpow2.f32 %v4277_v9  ;;  %10360 = vst [vmem:[#allocation120_spill] sm:$0xff] %v8291_v53  ;;  %v8293_v39 = vpop.f32.mrb[51].mxu0  ;;  %v8296_v31 = vadd.f32 %v1930_v20, %v8234_v1  ;;  %v8298_v33 = vadd.f32 %v1931_v45, %v1639_v5 }
 0x1db   : > { %10361 = vst [vmem:[#allocation25_spill] sm:$0xff] %v8293_v39  ;;  %3983 = vmatprep.mubr.f32.mxu0 %v3489_v32  ;;  %v3111_v38 = vadd.f32 1.0, %v4882_v7  ;;  %4901 = vpow2.f32 %v4279_v62  ;;  %v8300_v51 = vpop.f32.mrb[51].mxu1  ;;  %v1927_v11 = vmul.f32 %v10118_v43, %v8147_v13  ;;  %v2052_v9 = vadd.f32 %v1924_v19, %v8149_v15  ;;  %v10363_v62 = vld [vmem:[#allocation104_spill] sm:$0xff]  ;;  %v8313_v15 = vpop.permute.xlu1 %1769  ;;  %v10382_v39 = vld [vmem:[#allocation22_spill] sm:$0xff] }
 0x1dc   : > { %v4884_v22 = vpop.eup %4883  ;;  %10362 = vst [vmem:[#allocation65_spill] sm:$0xff] %v8300_v51  ;;  %3759 = vmatmul.mubr.f32.gmra.mrb[82].mxu1 %v3486_v18  ;;  %4903 = vpow2.f32 %v4276_v10  ;;  %v2053_v1 = vadd.f32 %v1925_v17, %v8183_v44  ;;  %v2054_v5 = vadd.f32 %v1926_v49, %v8178_v55  ;;  %v2344_v44 = vmul.f32 %v6262_v14, %v8174_v6  ;;  %v10364_v55 = vld [vmem:[#allocation18_spill] sm:$0xff]  ;;  %v10365_v10 = vld [vmem:[#allocation129_spill] sm:$0xff] }
 0x1dd   : > { %v4886_v16 = vpop.eup %4885  ;;  %v3488_v26 = vmul.f32 %v4884_v22, %v8129_v52  ;;  %4905 = vrcp.f32 %v3111_v38  ;;  %v710_v22 = vmul.f32 %v10292_v34, %v10363_v62  ;;  %v712_v52 = vmul.f32 %v10299_v61, %v10363_v62  ;;  %v10366_v18 = vld [vmem:[#allocation58_spill] sm:$0xff] }
 0x1de   : > { %v4888_v57 = vpop.eup %4887  ;;  %v3113_v32 = vadd.f32 1.0, %v4886_v16  ;;  %4907 = vpow2.f32 %v4278_v29  ;;  %v2345_v19 = vmul.f32 %v10364_v55, %v8174_v6  ;;  %v2346_v49 = vmul.f32 %v6268_v0, %v8174_v6 }
 0x1df   : > { %v4890_v20 = vpop.eup %4889  ;;  %3984 = vmatmul.mubr.f32.gmra.mrb[82].mxu0 %v3488_v26  ;;  %v3491_v45 = vmul.f32 %v4888_v57, %v8133_v35  ;;  %v8324_v7 = vadd.f32 %v10153_v59, %v10365_v10  ;;  %v8328_v29 = vadd.f32 %v10154_v58, %v10366_v18  ;;  %v2055_v57 = vadd.f32 %v1927_v11, %v8197_v12  ;;  %v10367_v10 = vld [vmem:[#allocation128_spill] sm:$0xff]  ;;  %v10369_v12 = vld [vmem:[#allocation39_spill] sm:$0xff] }
 0x1e0   : > { %v4892_v13 = vpop.eup %4891  ;;  %4909 = vrcp.f32 %v3113_v32  ;;  %v3110_v38 = vadd.f32 1.0, %v4890_v20  ;;  %v8339_v18 = vadd.f32 %v10182_v46, %v10367_v10  ;;  %v8345_v11 = vadd.f32 %v10369_v12, %v712_v52 }
 0x1e1   : > { %v4894_v17 = vpop.eup %4893  ;;  %3763 = vmatprep.mubr.f32.mxu1 %v3491_v45  ;;  %v3493_v35 = vmul.f32 %v4892_v13, %v8145_v60  ;;  %v2347_v60 = vmul.f32 %v10269_v36, %v8174_v6  ;;  %v4281_v45 = vmul.f32 -1.442695, %v8324_v7  ;;  %v4283_v13 = vmul.f32 -1.442695, %v8328_v29  ;;  %v10371_v6 = vld [vmem:[#allocation162_spill] sm:$0xff] }
 0x1e2   : > { %v4896_v16 = vpop.eup %4895  ;;  %v3490_v26 = vmul.f32 %v4894_v17, %v8153_v63  ;;  %4911 = vrcp.f32 %v3110_v38  ;;  %v10368_v38 = vld [vmem:[#allocation155_spill] sm:$0xff]  ;;  %10370 = vst [vmem:[#allocation119_spill] sm:$0xff] %v8345_v11  ;;  %v8353_v51 = vadd.f32 %v2345_v19, %v2053_v1  ;;  %v8355_v10 = vadd.f32 %v2346_v49, %v2054_v5  ;;  %v10376_v49 = vld [vmem:[#allocation130_spill] sm:$0xff] }
 0x1e3   : > { %v4898_v32 = vpop.eup %4897  ;;  %3988 = vmatprep.mubr.f32.mxu0 %v3493_v35  ;;  %v3492_v20 = vmul.f32 %v4896_v16, %v8159_v50  ;;  %v8342_v17 = vadd.f32 %v10368_v38, %v710_v22  ;;  %v8349_v35 = vadd.f32 %v10190_v21, %v10371_v6  ;;  %v8351_v16 = vadd.f32 %v2344_v44, %v2052_v9 }
 0x1e4   : > { %3764 = vmatmul.mubr.f32.gmra.mrb[84].mxu1 %v3490_v26  ;;  %v3112_v63 = vadd.f32 1.0, %v4898_v32  ;;  %v4900_v50 = vpop.eup %4899  ;;  %10373 = vst [vmem:[#allocation26_spill] sm:$0xff] %v8353_v51  ;;  %10374 = vst [vmem:[#allocation90_spill] sm:$0xff] %v8355_v10  ;;  %4913 = vpow2.f32 %v4281_v45  ;;  %v8357_v26 = vpop.permute.xlu1 %1353  ;;  %v8359_v52 = vadd.f32 %v2347_v60, %v2055_v57  ;;  %v711_v38 = vmul.f32 %v10258_v54, %v10363_v62  ;;  %v10377_v45 = vld [vmem:[#allocation46_spill] sm:$0xff] }
 0x1e5   : > { %3989 = vmatmul.mubr.f32.gmra.mrb[84].mxu0 %v3492_v20  ;;  %10372 = vst [vmem:[#allocation89_spill] sm:$0xff] %v8351_v16  ;;  %v4902_v22 = vpop.eup %4901  ;;  %v3115_v32 = vadd.f32 1.0, %v4900_v50  ;;  %v713_v9 = vmul.f32 %v10262_v2, %v10363_v62  ;;  %v4280_v1 = vmul.f32 -1.442695, %v8339_v18  ;;  %v4282_v19 = vmul.f32 -1.442695, %v8349_v35 }
 0x1e6   : > { %4915 = vrcp.f32 %v3112_v63  ;;  %10375 = vst [vmem:[#allocation51_spill] sm:$0xff] %v8359_v52  ;;  %v4904_v12 = vpop.eup %4903  ;;  %v3117_v6 = vadd.f32 1.0, %v4902_v22  ;;  %v8369_v57 = vadd.f32 %v10153_v59, %v10376_v49  ;;  %v8374_v63 = vadd.f32 %v10154_v58, %v10377_v45  ;;  %v10378_v62 = vld [vmem:[#allocation75_spill] sm:$0xff]  ;;  %v10392_v52 = vld [vmem:[#allocation14_spill] sm:$0xff] }
 0x1e7   : > { %4917 = vpow2.f32 %v4283_v13  ;;  %v4906_v5 = vpop.eup %4905  ;;  %v3114_v44 = vadd.f32 1.0, %v4904_v12  ;;  %v8378_v13 = vadd.f32 %v10182_v46, %v10378_v62  ;;  %v10379_v12 = vld [vmem:[#allocation83_spill] sm:$0xff]  ;;  %v8395_v53 = vadd.f32 %v10382_v39, %v713_v9 }
 0x1e8   : > { %4919 = vrcp.f32 %v3115_v32  ;;  %v4908_v60 = vpop.eup %4907  ;;  %v3495_v20 = vmul.f32 %v4906_v5, %v8191_v28  ;;  %v4285_v32 = vmul.f32 -1.442695, %v8369_v57  ;;  %v8383_v49 = vadd.f32 %v10190_v21, %v10379_v12  ;;  %v8389_v45 = vpop.permute.xlu1 %539  ;;  %v10384_v39 = vld [vmem:[#allocation91_spill] sm:$0xff] }
 0x1e9   : > { %4921 = vrcp.f32 %v3117_v6  ;;  %v3116_v22 = vadd.f32 1.0, %v4908_v60  ;;  %v706_v6 = vmul.f32 %v10292_v34, %v8219_v56  ;;  %v4287_v5 = vmul.f32 -1.442695, %v8374_v63  ;;  %10383 = vst [vmem:[#allocation67_spill] sm:$0xff] %v8395_v53  ;;  %v8433_v53 = vpop.f32.mrb[52].mxu0 }
 0x1ea   : > { %v4910_v50 = vpop.eup %4909  ;;  %4923 = vrcp.f32 %v3114_v44  ;;  %3768 = vmatprep.mubr.f32.mxu1 %v3495_v20  ;;  %v10380_v44 = vld [vmem:[#allocation64_spill] sm:$0xff]  ;;  %v4284_v20 = vmul.f32 -1.442695, %v8378_v13  ;;  %v8408_v9 = vadd.f32 %v10153_v59, %v10384_v39  ;;  %v1513_v51 = vmul.f32 %v10392_v52, %v8247_v8  ;;  %10393 = vst [vmem:[#allocation94_spill] sm:$0xff] %v8433_v53 }
 0x1eb   : > { %v3497_v28 = vmul.f32 %v4910_v50, %v8210_v24  ;;  %4925 = vpow2.f32 %v4280_v1  ;;  %v8392_v60 = vadd.f32 %v10380_v44, %v711_v38  ;;  %v707_v1 = vmul.f32 %v10258_v54, %v8219_v56  ;;  %v10398_v53 = vld [vmem:[#allocation148_spill] sm:$0xff] }
 0x1ec   : > { %v4912_v62 = vpop.eup %4911  ;;  %4927 = vrcp.f32 %v3116_v22  ;;  %v4286_v50 = vmul.f32 -1.442695, %v8383_v49  ;;  %v708_v22 = vmul.f32 %v10299_v61, %v8219_v56  ;;  %v709_v38 = vmul.f32 %v10262_v2, %v8219_v56  ;;  %10385 = vst [vmem:[#allocation28_spill] sm:$0xff] %v8408_v9 }
 0x1ed   : > { %10381 = vst [vmem:[#allocation54_spill] sm:$0xff] %v8392_v60  ;;  %3993 = vmatprep.mubr.f32.mxu0 %v3497_v28  ;;  %v3494_v24 = vmul.f32 %v4912_v62, %v8238_v37  ;;  %4929 = vpow2.f32 %v4282_v19  ;;  %v10386_v37 = vld [vmem:[#allocation151_spill] sm:$0xff]  ;;  %v1512_v28 = vmul.f32 %v10121_v40, %v8247_v8  ;;  %v8415_v62 = vadd.f32 %v10154_v58, %v8084_v41  ;;  %v8428_v41 = vpop.permute.xlu1 %1773 }
 0x1ee   : > { %4931 = vpow2.f32 %v4285_v32  ;;  %v4914_v12 = vpop.eup %4913  ;;  %v939_v19 = vadd.f32 %v10386_v37, %v706_v6  ;;  %v4289_v56 = vmul.f32 -1.442695, %v8408_v9  ;;  %v10388_v32 = vld [vmem:[#allocation84_spill] sm:$0xff]  ;;  %10391 = vst [vmem:[#allocation29_spill] sm:$0xff] %v8428_v41  ;;  %v1196_v9 = vadd.f32 %v10398_v53, %v708_v22 }
 0x1ef   : > { %3769 = vmatmul.mubr.f32.gmra.mrb[86].mxu1 %v3494_v24  ;;  %4933 = vpow2.f32 %v4287_v5  ;;  %10387 = vst [vmem:[#allocation55_spill] sm:$0xff] %v8415_v62  ;;  %v3119_v10 = vadd.f32 1.0, %v4914_v12  ;;  %v8420_v39 = vadd.f32 %v10182_v46, %v10388_v32  ;;  %v4291_v5 = vmul.f32 -1.442695, %v8415_v62  ;;  %v10390_v37 = vld [vmem:[#allocation88_spill] sm:$0xff] }
 0x1f0   : > { %v4916_v44 = vpop.eup %4915  ;;  %4935 = vpow2.f32 %v4284_v20  ;;  %v8426_v16 = vadd.f32 %v10190_v21, %v10390_v37  ;;  %v10395_v37 = vld [vmem:[#allocation152_spill] sm:$0xff] }
 0x1f1   : > { %10389 = vst [vmem:[#allocation118_spill] sm:$0xff] %v8420_v39  ;;  %v4918_v24 = vpop.eup %4917  ;;  %v3496_v6 = vmul.f32 %v4916_v44, %v8243_v4  ;;  %4937 = vpow2.f32 %v4286_v50  ;;  %v4288_v32 = vmul.f32 -1.442695, %v8420_v39  ;;  %v8435_v4 = vpop.f32.mrb[52].mxu1  ;;  %v941_v62 = vadd.f32 %v10395_v37, %v707_v1 }
 0x1f2   : > { %v4920_v12 = vpop.eup %4919  ;;  %4939 = vrcp.f32 %v3119_v10  ;;  %v3121_v20 = vadd.f32 1.0, %v4918_v24  ;;  %10394 = vst [vmem:[#allocation111_spill] sm:$0xff] %v8435_v4  ;;  %v4290_v41 = vmul.f32 -1.442695, %v8426_v16  ;;  %v8440_v10 = vpop.f32.mrb[53].mxu0  ;;  %v10399_v4 = vld [vmem:[#allocation17_spill] sm:$0xff] }
 0x1f3   : > { %v4922_v50 = vpop.eup %4921  ;;  %3994 = vmatmul.mubr.f32.gmra.mrb[86].mxu0 %v3496_v6  ;;  %v3499_v44 = vmul.f32 %v4920_v12, %v8259_v23  ;;  %4941 = vpow2.f32 %v4289_v56  ;;  %10396 = vst [vmem:[#allocation112_spill] sm:$0xff] %v8440_v10  ;;  %v8442_v24 = vpop.f32.mrb[53].mxu1  ;;  %v1198_v60 = vadd.f32 %v10399_v4, %v709_v38  ;;  %v10402_v12 = vld [vmem:[#allocation9_spill] sm:$0xff]  ;;  %v8458_v38 = vadd.f32 %v1512_v28, %v939_v19  ;;  %v10409_v28 = vld [vmem:[#allocation156_spill] sm:$0xff] }
 0x1f4   : > { %10397 = vst [vmem:[#allocation56_spill] sm:$0xff] %v8442_v24  ;;  %v4924_v11 = vpop.eup %4923  ;;  %v3501_v39 = vmul.f32 %v4922_v50, %v8263_v42  ;;  %4943 = vrcp.f32 %v3121_v20  ;;  %v8447_v6 = vpop.f32.mrb[54].mxu0  ;;  %v1514_v37 = vmul.f32 %v10402_v12, %v8247_v8  ;;  %v1515_v24 = vmul.f32 %v10144_v47, %v8247_v8  ;;  %v10405_v50 = vld [vmem:[#allocation86_spill] sm:$0xff]  ;;  %v10406_v8 = vld [vmem:[#allocation101_spill] sm:$0xff] }
 0x1f5   : > { %10400 = vst [vmem:[#allocation123_spill] sm:$0xff] %v8447_v6  ;;  %v8449_v23 = vpop.f32.mrb[54].mxu1  ;;  %v4926_v1 = vpop.eup %4925  ;;  %3773 = vmatprep.mubr.f32.mxu1 %v3499_v44  ;;  %v3498_v56 = vmul.f32 %v4924_v11, %v8268_v25  ;;  %4945 = vpow2.f32 %v4291_v5  ;;  %v8460_v20 = vadd.f32 %v1513_v51, %v941_v62  ;;  %v2469_v5 = vadd.f32 %v10406_v8, %v10405_v50  ;;  %v10407_v44 = vld [vmem:[#allocation92_spill] sm:$0xff]  ;;  %v10410_v51 = vld [vmem:[#allocation99_spill] sm:$0xff] }
 0x1f6   : > { %10401 = vst [vmem:[#allocation57_spill] sm:$0xff] %v8449_v23  ;;  %v8456_v42 = vpop.f32.mrb[55].mxu0  ;;  %v4928_v53 = vpop.eup %4927  ;;  %3998 = vmatprep.mubr.f32.mxu0 %v3501_v39  ;;  %v3118_v22 = vadd.f32 1.0, %v4926_v1  ;;  %4947 = vpow2.f32 %v4288_v32  ;;  %v2468_v62 = vadd.f32 %v10410_v51, %v10409_v28  ;;  %v10411_v32 = vld [vmem:[#allocation21_spill] sm:$0xff]  ;;  %v10412_v1 = vld [vmem:[#allocation102_spill] sm:$0xff]  ;;  %v8481_v50 = vadd.f32 %v1515_v24, %v1198_v60  ;;  %v10427_v6 = vld [vmem:[#allocation79_spill] sm:$0xff] }
 0x1f7   : > { %10403 = vst [vmem:[#allocation132_spill] sm:$0xff] %v8456_v42  ;;  %v8462_v4 = vpop.f32.mrb[55].mxu1  ;;  %v4930_v25 = vpop.eup %4929  ;;  %3774 = vmatmul.mubr.f32.gmra.mrb[88].mxu1 %v3498_v56  ;;  %v3500_v11 = vmul.f32 %v4928_v53, %v8272_v48  ;;  %4949 = vpow2.f32 %v4290_v41  ;;  %v10408_v42 = vld [vmem:[#allocation103_spill] sm:$0xff]  ;;  %v1642_v48 = vadd.f32 %v1514_v37, %v1196_v9  ;;  %v8474_v41 = vadd.f32 %v10153_v59, %v2469_v5 }
 0x1f8   : > { %10404 = vst [vmem:[#allocation27_spill] sm:$0xff] %v8462_v4  ;;  %v2471_v23 = vadd.f32 %v10408_v42, %v10407_v44  ;;  %v4932_v39 = vpop.eup %4931  ;;  %4951 = vrcp.f32 %v3118_v22  ;;  %v3120_v19 = vadd.f32 1.0, %v4930_v25  ;;  %v2470_v4 = vadd.f32 %v10412_v1, %v10411_v32  ;;  %v8479_v42 = vpop.permute.xlu1 %2193 }
 0x1f9   : > { %v4934_v10 = vpop.eup %4933  ;;  %3999 = vmatmul.mubr.f32.gmra.mrb[88].mxu0 %v3500_v11  ;;  %v3123_v56 = vadd.f32 1.0, %v4932_v39  ;;  %v2348_v8 = vmul.f32 %v6262_v14, %v8277_v27  ;;  %v2349_v9 = vmul.f32 %v10364_v55, %v8277_v27  ;;  %v4293_v37 = vmul.f32 -1.442695, %v8474_v41 }
 0x1fa   : > { %v8477_v53 = vadd.f32 %v10154_v58, %v2471_v23  ;;  %v4936_v22 = vpop.eup %4935  ;;  %4953 = vrcp.f32 %v3120_v19  ;;  %v3125_v25 = vadd.f32 1.0, %v4934_v10  ;;  %v2350_v39 = vmul.f32 %v6268_v0, %v8277_v27 }
 0x1fb   : > { %v4938_v44 = vpop.eup %4937  ;;  %4955 = vrcp.f32 %v3123_v56  ;;  %v3122_v11 = vadd.f32 1.0, %v4936_v22  ;;  %v2351_v60 = vmul.f32 %v10269_v36, %v8277_v27  ;;  %v8495_v28 = vadd.f32 %v10182_v46, %v2468_v62  ;;  %v10414_v62 = vld [vmem:[#allocation12_spill] sm:$0xff] }
 0x1fc   : > { %v4940_v23 = vpop.eup %4939  ;;  %4957 = vrcp.f32 %v3125_v25  ;;  %v3124_v5 = vadd.f32 1.0, %v4938_v44  ;;  %v4295_v19 = vmul.f32 -1.442695, %v8477_v53  ;;  %v8498_v1 = vadd.f32 %v2348_v8, %v8253_v3  ;;  %v8509_v44 = vpop.permute.xlu1 %544  ;;  %v10415_v8 = vld [vmem:[#allocation13_spill] sm:$0xff] }
 0x1fd   : > { %v4942_v10 = vpop.eup %4941  ;;  %v3503_v24 = vmul.f32 %v4940_v23, %v8324_v7  ;;  %4959 = vrcp.f32 %v3122_v11  ;;  %v8501_v56 = vadd.f32 %v10190_v21, %v2470_v4  ;;  %v8505_v7 = vadd.f32 %v2349_v9, %v8288_v30  ;;  %v10416_v23 = vld [vmem:[#allocation16_spill] sm:$0xff] }
 0x1fe   : > { %v4944_v51 = vpop.eup %4943  ;;  %4961 = vrcp.f32 %v3124_v5  ;;  %v3127_v32 = vadd.f32 1.0, %v4942_v10  ;;  %v1932_v25 = vmul.f32 %v10414_v62, %v8313_v15  ;;  %v1933_v4 = vmul.f32 %v10415_v8, %v8313_v15 }
 0x1ff   : > { %10413 = vst [vmem:[#allocation96_spill] sm:$0xff] %v8501_v56  ;;  %v4946_v22 = vpop.eup %4945  ;;  %3778 = vmatprep.mubr.f32.mxu1 %v3503_v24  ;;  %v3505_v27 = vmul.f32 %v4944_v51, %v8328_v29  ;;  %4963 = vpow2.f32 %v4293_v37  ;;  %v1934_v5 = vmul.f32 %v10416_v23, %v8313_v15  ;;  %v8516_v30 = vadd.f32 %v2350_v39, %v8296_v31 }
 0x200   : > { %v4948_v11 = vpop.eup %4947  ;;  %4965 = vrcp.f32 %v3127_v32  ;;  %v3129_v3 = vadd.f32 1.0, %v4946_v22  ;;  %v4292_v9 = vmul.f32 -1.442695, %v8495_v28  ;;  %v8520_v51 = vadd.f32 %v2351_v60, %v8298_v33 }
 0x201   : > { %v4950_v10 = vpop.eup %4949  ;;  %4003 = vmatprep.mubr.f32.mxu0 %v3505_v27  ;;  %v3126_v29 = vadd.f32 1.0, %v4948_v11  ;;  %4967 = vpow2.f32 %v4295_v19  ;;  %v4294_v32 = vmul.f32 -1.442695, %v8501_v56  ;;  %v1935_v27 = vmul.f32 %v10118_v43, %v8313_v15 }
 0x202   : > { %v4952_v37 = vpop.eup %4951  ;;  %4969 = vrcp.f32 %v3129_v3  ;;  %v3128_v24 = vadd.f32 1.0, %v4950_v10  ;;  %v8527_v31 = vadd.f32 %v1932_v25, %v8458_v38  ;;  %v8530_v19 = vadd.f32 %v1933_v4, %v8460_v20  ;;  %v8541_v25 = vpop.permute.xlu1 %1361 }
 0x203   : > { %v3502_v22 = vmul.f32 %v4952_v37, %v8339_v18  ;;  %4971 = vrcp.f32 %v3126_v29  ;;  %v8532_v11 = vadd.f32 %v1934_v5, %v1642_v48  ;;  %v714_v33 = vmul.f32 %v10292_v34, %v8389_v45  ;;  %v8543_v20 = vpop.f32.mrb[56].mxu0  ;;  %v8550_v5 = vpop.f32.mrb[56].mxu1 }
 0x204   : > { %10417 = vst [vmem:[#allocation98_spill] sm:$0xff] %v8527_v31  ;;  %v4954_v39 = vpop.eup %4953  ;;  %4973 = vrcp.f32 %v3128_v24  ;;  %10418 = vst [vmem:[#allocation153_spill] sm:$0xff] %v8530_v19  ;;  %v1516_v15 = vmul.f32 %v10121_v40, %v8357_v26  ;;  %v716_v38 = vmul.f32 %v10299_v61, %v8389_v45  ;;  %v1517_v4 = vmul.f32 %v10392_v52, %v8357_v26  ;;  %v8552_v10 = vpop.f32.mrb[57].mxu0  ;;  %v10428_v31 = vld [vmem:[#allocation54_spill] sm:$0xff] }
 0x205   : > { %10419 = vst [vmem:[#allocation42_spill] sm:$0xff] %v8532_v11  ;;  %v4956_v60 = vpop.eup %4955  ;;  %3779 = vmatmul.mubr.f32.gmra.mrb[90].mxu1 %v3502_v22  ;;  %v3504_v18 = vmul.f32 %v4954_v39, %v8349_v35  ;;  %4975 = vpow2.f32 %v4292_v9  ;;  %10420 = vst [vmem:[#allocation109_spill] sm:$0xff] %v8543_v20  ;;  %v715_v35 = vmul.f32 %v10258_v54, %v8389_v45  ;;  %v10426_v20 = vld [vmem:[#allocation47_spill] sm:$0xff] }
 0x206   : > { %v4958_v48 = vpop.eup %4957  ;;  %v3507_v3 = vmul.f32 %v4956_v60, %v8369_v57  ;;  %4977 = vpow2.f32 %v4294_v32  ;;  %10421 = vst [vmem:[#allocation70_spill] sm:$0xff] %v8550_v5  ;;  %10422 = vst [vmem:[#allocation154_spill] sm:$0xff] %v8552_v10  ;;  %v1518_v37 = vmul.f32 %v10402_v12, %v8357_v26  ;;  %v1519_v57 = vmul.f32 %v10144_v47, %v8357_v26  ;;  %v8561_v32 = vpop.f32.mrb[57].mxu1  ;;  %v10424_v60 = vld [vmem:[#allocation131_spill] sm:$0xff] }
 0x207   : > { %v4960_v29 = vpop.eup %4959  ;;  %4004 = vmatmul.mubr.f32.gmra.mrb[90].mxu0 %v3504_v18  ;;  %v3509_v9 = vmul.f32 %v4958_v48, %v8374_v63  ;;  %v717_v24 = vmul.f32 %v10262_v2, %v8389_v45  ;;  %10423 = vst [vmem:[#allocation11_spill] sm:$0xff] %v8561_v32  ;;  %v951_v10 = vadd.f32 %v10424_v60, %v714_v33  ;;  %v10425_v18 = vld [vmem:[#allocation15_spill] sm:$0xff] }
 0x208   : > { %v4962_v22 = vpop.eup %4961  ;;  %3783 = vmatprep.mubr.f32.mxu1 %v3507_v3  ;;  %v3506_v39 = vmul.f32 %v4960_v29, %v8378_v13  ;;  %v1520_v63 = vmul.f32 %v10121_v40, %v10425_v18  ;;  %v1522_v48 = vmul.f32 %v10402_v12, %v10425_v18  ;;  %v1208_v45 = vadd.f32 %v10426_v20, %v716_v38  ;;  %v1778_v13 = vpop.permute.xlu0 %1777  ;;  %v10430_v20 = vld [vmem:[#allocation119_spill] sm:$0xff] }
 0x209   : > { %v4964_v5 = vpop.eup %4963  ;;  %4008 = vmatprep.mubr.f32.mxu0 %v3509_v9  ;;  %v3508_v26 = vmul.f32 %v4962_v22, %v8383_v49  ;;  %v953_v32 = vadd.f32 %v10427_v6, %v715_v35  ;;  %v1521_v3 = vmul.f32 %v10392_v52, %v10425_v18  ;;  %v8575_v60 = vadd.f32 %v1935_v27, %v8481_v50  ;;  %v10429_v49 = vld [vmem:[#allocation28_spill] sm:$0xff] }
 0x20a   : > { %v4966_v29 = vpop.eup %4965  ;;  %3784 = vmatmul.mubr.f32.gmra.mrb[92].mxu1 %v3506_v39  ;;  %v3131_v33 = vadd.f32 1.0, %v4964_v5  ;;  %v1644_v11 = vadd.f32 %v1516_v15, %v8342_v17  ;;  %v1645_v9 = vadd.f32 %v1517_v4, %v10428_v31  ;;  %v1646_v6 = vadd.f32 %v1518_v37, %v10430_v20  ;;  %v10431_v35 = vld [vmem:[#allocation48_spill] sm:$0xff]  ;;  %v8584_v39 = vpop.permute.xlu1 %2197  ;;  %v10432_v15 = vld [vmem:[#allocation55_spill] sm:$0xff]  ;;  %v10434_v20 = vld [vmem:[#allocation118_spill] sm:$0xff] }
 0x20b   : > { %v4968_v19 = vpop.eup %4967  ;;  %4009 = vmatmul.mubr.f32.gmra.mrb[92].mxu0 %v3508_v26  ;;  %v3511_v38 = vmul.f32 %v4966_v29, %v10429_v49  ;;  %v1210_v22 = vadd.f32 %v10431_v35, %v717_v24  ;;  %v1523_v56 = vmul.f32 %v10144_v47, %v10425_v18  ;;  %v1648_v27 = vadd.f32 %v1520_v63, %v951_v10  ;;  %v10433_v26 = vld [vmem:[#allocation67_spill] sm:$0xff] }
 0x20c   : > { %v4970_v5 = vpop.eup %4969  ;;  %4979 = vrcp.f32 %v3131_v33  ;;  %v3133_v50 = vadd.f32 1.0, %v4968_v19  ;;  %v1940_v17 = vmul.f32 %v10414_v62, %v1778_v13  ;;  %v1647_v29 = vadd.f32 %v1519_v57, %v10433_v26 }
 0x20d   : > { %v4972_v31 = vpop.eup %4971  ;;  %3788 = vmatprep.mubr.f32.mxu1 %v3511_v38  ;;  %v3513_v4 = vmul.f32 %v4970_v5, %v10432_v15  ;;  %v1650_v37 = vadd.f32 %v1522_v48, %v1208_v45  ;;  %v1649_v49 = vadd.f32 %v1521_v3, %v953_v32  ;;  %v1941_v18 = vmul.f32 %v10415_v8, %v1778_v13  ;;  %v10435_v5 = vld [vmem:[#allocation26_spill] sm:$0xff]  ;;  %v10437_v3 = vld [vmem:[#allocation29_spill] sm:$0xff] }
 0x20e   : > { %v4974_v24 = vpop.eup %4973  ;;  %v3510_v35 = vmul.f32 %v4972_v31, %v10434_v20  ;;  %4981 = vrcp.f32 %v3133_v50  ;;  %v1942_v33 = vmul.f32 %v10416_v23, %v1778_v13  ;;  %v1651_v63 = vadd.f32 %v1523_v56, %v1210_v22  ;;  %v10438_v31 = vld [vmem:[#allocation51_spill] sm:$0xff] }
 0x20f   : > { %v4976_v19 = vpop.eup %4975  ;;  %4013 = vmatprep.mubr.f32.mxu0 %v3513_v4  ;;  %v3512_v10 = vmul.f32 %v4974_v24, %v8426_v16  ;;  %v1943_v38 = vmul.f32 %v10118_v43, %v1778_v13  ;;  %v8596_v57 = vadd.f32 %v10153_v59, %v10435_v5  ;;  %v8598_v45 = vadd.f32 %v1940_v17, %v1648_v27  ;;  %v10440_v13 = vld [vmem:[#allocation89_spill] sm:$0xff]  ;;  %v10442_v4 = vld [vmem:[#allocation90_spill] sm:$0xff]  ;;  %v8615_v27 = vpop.permute.xlu1 %1781 }
 0x210   : > { %v4978_v32 = vpop.eup %4977  ;;  %3789 = vmatmul.mubr.f32.gmra.mrb[94].mxu1 %v3510_v35  ;;  %v3130_v48 = vadd.f32 1.0, %v4976_v19  ;;  %v1936_v50 = vmul.f32 %v10414_v62, %v10437_v3  ;;  %v8604_v15 = vadd.f32 %v10154_v58, %v10438_v31  ;;  %v8609_v22 = vadd.f32 %v10182_v46, %v10440_v13 }
 0x211   : > { %10436 = vst [vmem:[#allocation133_spill] sm:$0xff] %v8596_v57  ;;  %4014 = vmatmul.mubr.f32.gmra.mrb[94].mxu0 %v3512_v10  ;;  %v3132_v16 = vadd.f32 1.0, %v4978_v32  ;;  %v4297_v56 = vmul.f32 -1.442695, %v8596_v57  ;;  %v8613_v26 = vadd.f32 %v10190_v21, %v10442_v4  ;;  %v1937_v17 = vmul.f32 %v10415_v8, %v10437_v3 }
 0x212   : > { %10439 = vst [vmem:[#allocation126_spill] sm:$0xff] %v8604_v15  ;;  %10441 = vst [vmem:[#allocation100_spill] sm:$0xff] %v8609_v22  ;;  %4983 = vrcp.f32 %v3130_v48  ;;  %v1938_v24 = vmul.f32 %v10416_v23, %v10437_v3  ;;  %v4299_v20 = vmul.f32 -1.442695, %v8604_v15  ;;  %v1939_v35 = vmul.f32 %v10118_v43, %v10437_v3 }
 0x213   : > { %10443 = vst [vmem:[#allocation97_spill] sm:$0xff] %v8613_v26  ;;  %4985 = vrcp.f32 %v3132_v16  ;;  %v4296_v19 = vmul.f32 -1.442695, %v8609_v22  ;;  %v4298_v10 = vmul.f32 -1.442695, %v8613_v26  ;;  %v2356_v5 = vmul.f32 %v6262_v14, %v8479_v42 }
 0x214   : > { %4987 = vpow2.f32 %v4297_v56  ;;  %v2357_v32 = vmul.f32 %v10364_v55, %v8479_v42  ;;  %v2358_v48 = vmul.f32 %v6268_v0, %v8479_v42  ;;  %v8632_v31 = vadd.f32 %v1941_v18, %v1649_v49  ;;  %v8641_v49 = vpop.permute.xlu1 %1365 }
 0x215   : > { %v8634_v16 = vadd.f32 %v1942_v33, %v1650_v37  ;;  %4989 = vpow2.f32 %v4299_v20  ;;  %v2359_v3 = vmul.f32 %v10269_v36, %v8479_v42  ;;  %v2064_v4 = vadd.f32 %v1936_v50, %v1644_v11  ;;  %v10451_v20 = vld [vmem:[#allocation87_spill] sm:$0xff] }
 0x216   : > { %v4980_v13 = vpop.eup %4979  ;;  %v2065_v56 = vadd.f32 %v1937_v17, %v1645_v9  ;;  %v2066_v26 = vadd.f32 %v1938_v24, %v1646_v6  ;;  %4991 = vpow2.f32 %v4296_v19  ;;  %v2067_v15 = vadd.f32 %v1939_v35, %v1647_v29  ;;  %v8651_v9 = vpop.f32.mrb[58].mxu0 }
 0x217   : > { %v3515_v22 = vmul.f32 %v4980_v13, %v8474_v41  ;;  %4993 = vpow2.f32 %v4298_v10  ;;  %v718_v57 = vmul.f32 %v10292_v34, %v8509_v44  ;;  %v8643_v18 = vadd.f32 %v1943_v38, %v1651_v63  ;;  %10445 = vst [vmem:[#allocation115_spill] sm:$0xff] %v8651_v9  ;;  %v8653_v6 = vpop.f32.mrb[58].mxu1  ;;  %v8664_v38 = vpop.f32.mrb[59].mxu0 }
 0x218   : > { %v4982_v37 = vpop.eup %4981  ;;  %v8645_v33 = vadd.f32 %v2356_v5, %v2064_v4  ;;  %v8647_v42 = vadd.f32 %v2357_v32, %v2065_v56  ;;  %v8649_v11 = vadd.f32 %v2358_v48, %v2066_v26  ;;  %10446 = vst [vmem:[#allocation157_spill] sm:$0xff] %v8653_v6  ;;  %v8656_v29 = vadd.f32 %v2359_v3, %v2067_v15  ;;  %v8666_v26 = vpop.f32.mrb[59].mxu1 }
 0x219   : > { %3793 = vmatprep.mubr.f32.mxu1 %v3515_v22  ;;  %v3517_v41 = vmul.f32 %v4982_v37, %v8477_v53  ;;  %v720_v50 = vmul.f32 %v10299_v61, %v8509_v44  ;;  %v8662_v63 = vadd.f32 %v10153_v59, %v8505_v7  ;;  %10447 = vst [vmem:[#allocation107_spill] sm:$0xff] %v8664_v38  ;;  %10448 = vst [vmem:[#allocation59_spill] sm:$0xff] %v8666_v26  ;;  %v8680_v7 = vpop.f32.mrb[60].mxu0  ;;  %v8682_v24 = vpop.f32.mrb[60].mxu1 }
 0x21a   : > { %10444 = vst [vmem:[#allocation19_spill] sm:$0xff] %v8649_v11  ;;  %v719_v17 = vmul.f32 %v10258_v54, %v8509_v44  ;;  %v721_v22 = vmul.f32 %v10262_v2, %v8509_v44  ;;  %v8674_v53 = vadd.f32 %v10154_v58, %v8520_v51  ;;  %v8678_v15 = vadd.f32 %v10182_v46, %v8498_v1  ;;  %v8692_v10 = vpop.f32.mrb[61].mxu0  ;;  %v8700_v3 = vpop.f32.mrb[61].mxu1 }
 0x21b   : > { %10449 = vst [vmem:[#allocation76_spill] sm:$0xff] %v8680_v7  ;;  %10450 = vst [vmem:[#allocation60_spill] sm:$0xff] %v8682_v24  ;;  %4018 = vmatprep.mubr.f32.mxu0 %v3517_v41  ;;  %v957_v35 = vadd.f32 %v10451_v20, %v718_v57  ;;  %v1524_v19 = vmul.f32 %v10121_v40, %v8541_v25  ;;  %v4301_v44 = vmul.f32 -1.442695, %v8662_v63  ;;  %v10455_v20 = vld [vmem:[#allocation96_spill] sm:$0xff]  ;;  %v1790_v6 = vpop.permute.xlu0 %1789  ;;  %v8708_v9 = vpop.permute.xlu1 %554 }
 0x21c   : > { %v8690_v51 = vadd.f32 %v10190_v21, %v8516_v30  ;;  %10452 = vst [vmem:[#allocation74_spill] sm:$0xff] %v8692_v10  ;;  %v4984_v1 = vpop.eup %4983  ;;  %v1525_v5 = vmul.f32 %v10392_v52, %v8541_v25  ;;  %v1526_v32 = vmul.f32 %v10402_v12, %v8541_v25  ;;  %v4303_v57 = vmul.f32 -1.442695, %v8674_v53  ;;  %10453 = vst [vmem:[#allocation106_spill] sm:$0xff] %v8700_v3  ;;  %v10454_v30 = vld [vmem:[#allocation49_spill] sm:$0xff]  ;;  %v10457_v7 = vld [vmem:[#allocation20_spill] sm:$0xff] }
 0x21d   : > { %v4300_v48 = vmul.f32 -1.442695, %v8678_v15  ;;  %v4986_v13 = vpop.eup %4985  ;;  %v3514_v4 = vmul.f32 %v4984_v1, %v8495_v28  ;;  %v1214_v56 = vadd.f32 %v10454_v30, %v720_v50  ;;  %4995 = vpow2.f32 %v4301_v44  ;;  %v10456_v10 = vld [vmem:[#allocation85_spill] sm:$0xff]  ;;  %v10464_v30 = vld [vmem:[#allocation44_spill] sm:$0xff] }
 0x21e   : > { %v4302_v37 = vmul.f32 -1.442695, %v8690_v51  ;;  %v4988_v41 = vpop.eup %4987  ;;  %v3516_v24 = vmul.f32 %v4986_v13, %v10455_v20  ;;  %v959_v26 = vadd.f32 %v10456_v10, %v719_v17  ;;  %v1216_v38 = vadd.f32 %v10457_v7, %v721_v22 }
 0x21f   : > { %4997 = vpow2.f32 %v4303_v57  ;;  %v4990_v3 = vpop.eup %4989  ;;  %3794 = vmatmul.mubr.f32.gmra.mrb[96].mxu1 %v3514_v4  ;;  %v3135_v11 = vadd.f32 1.0, %v4988_v41  ;;  %v1527_v28 = vmul.f32 %v10144_v47, %v8541_v25  ;;  %v8712_v50 = vadd.f32 %v1524_v19, %v957_v35  ;;  %v10458_v19 = vld [vmem:[#allocation153_spill] sm:$0xff]  ;;  %v10463_v4 = vld [vmem:[#allocation42_spill] sm:$0xff] }
 0x220   : > { %4999 = vpow2.f32 %v4300_v48  ;;  %v4992_v44 = vpop.eup %4991  ;;  %4019 = vmatmul.mubr.f32.gmra.mrb[96].mxu0 %v3516_v24  ;;  %v3137_v1 = vadd.f32 1.0, %v4990_v3  ;;  %v8714_v13 = vadd.f32 %v1525_v5, %v959_v26  ;;  %v8716_v17 = vadd.f32 %v1526_v32, %v1214_v56  ;;  %v10459_v26 = vld [vmem:[#allocation105_spill] sm:$0xff]  ;;  %v10462_v48 = vld [vmem:[#allocation110_spill] sm:$0xff] }
 0x221   : > { %5001 = vpow2.f32 %v4302_v37  ;;  %v4994_v22 = vpop.eup %4993  ;;  %v3134_v7 = vadd.f32 1.0, %v4992_v44  ;;  %v2360_v10 = vmul.f32 %v6262_v14, %v8584_v39  ;;  %v2361_v25 = vmul.f32 %v10364_v55, %v8584_v39  ;;  %v10460_v32 = vld [vmem:[#allocation45_spill] sm:$0xff]  ;;  %v1802_v44 = vpop.permute.xlu0 %1801 }
 0x222   : > { %5003 = vrcp.f32 %v3135_v11  ;;  %v3136_v35 = vadd.f32 1.0, %v4994_v22  ;;  %v2362_v24 = vmul.f32 %v6268_v0, %v8584_v39  ;;  %v2481_v5 = vadd.f32 %v10459_v26, %v10458_v19  ;;  %v10461_v11 = vld [vmem:[#allocation98_spill] sm:$0xff] }
 0x223   : > { %5005 = vrcp.f32 %v3137_v1  ;;  %v2483_v57 = vadd.f32 %v10460_v32, %v8575_v60  ;;  %v2480_v3 = vadd.f32 %v10462_v48, %v10461_v11  ;;  %v2482_v56 = vadd.f32 %v10464_v30, %v10463_v4  ;;  %v8739_v1 = vpop.permute.xlu1 %1785 }
 0x224   : > { %5007 = vrcp.f32 %v3134_v7  ;;  %v8732_v37 = vadd.f32 %v1527_v28, %v1216_v38  ;;  %v2363_v41 = vmul.f32 %v10269_v36, %v8584_v39  ;;  %v8737_v20 = vadd.f32 %v10153_v59, %v2481_v5 }
 0x225   : > { %5009 = vrcp.f32 %v3136_v35  ;;  %v8742_v60 = vmul.f32 %v10414_v62, %v1790_v6  ;;  %v8745_v22 = vmul.f32 %v10415_v8, %v1790_v6  ;;  %v8748_v7 = vmul.f32 %v10416_v23, %v1790_v6 }
 0x226   : > { %v8751_v38 = vadd.f32 %v10154_v58, %v2483_v57  ;;  %v8754_v39 = vmul.f32 %v10118_v43, %v1790_v6  ;;  %v8757_v28 = vadd.f32 %v2360_v10, %v8598_v45  ;;  %v4305_v35 = vmul.f32 -1.442695, %v8737_v20 }
 0x227   : > { %10465 = vst [vmem:[#allocation61_spill] sm:$0xff] %v8745_v22  ;;  %v8761_v19 = vadd.f32 %v10182_v46, %v2480_v3  ;;  %v4996_v26 = vpop.eup %4995  ;;  %v8764_v5 = vadd.f32 %v2361_v25, %v8632_v31  ;;  %v8767_v32 = vadd.f32 %v2362_v24, %v8634_v16  ;;  %v8771_v6 = vadd.f32 %v10190_v21, %v2482_v56  ;;  %v550_v56 = vpop.permute.xlu0 %549 }
 0x228   : > { %10466 = vst [vmem:[#allocation136_spill] sm:$0xff] %v8754_v39  ;;  %10467 = vst [vmem:[#allocation43_spill] sm:$0xff] %v8757_v28  ;;  %v4307_v57 = vmul.f32 -1.442695, %v8751_v38  ;;  %v3139_v45 = vadd.f32 1.0, %v4996_v26  ;;  %v8774_v10 = vadd.f32 %v2363_v41, %v8643_v18  ;;  %5011 = vpow2.f32 %v4305_v35  ;;  %v8788_v41 = vpop.permute.xlu1 %2205 }
 0x229   : > { %10468 = vst [vmem:[#allocation160_spill] sm:$0xff] %v8761_v19  ;;  %10469 = vst [vmem:[#allocation23_spill] sm:$0xff] %v8764_v5  ;;  %v4998_v11 = vpop.eup %4997  ;;  %v8777_v48 = vmul.f32 %v10414_v62, %v1802_v44  ;;  %v8780_v16 = vmul.f32 %v10415_v8, %v1802_v44  ;;  %v8783_v25 = vmul.f32 %v10416_v23, %v1802_v44  ;;  %v4304_v30 = vmul.f32 -1.442695, %v8761_v19  ;;  %v10478_v19 = vld [vmem:[#allocation126_spill] sm:$0xff] }
 0x22a   : > { %10470 = vst [vmem:[#allocation62_spill] sm:$0xff] %v8767_v32  ;;  %10471 = vst [vmem:[#allocation137_spill] sm:$0xff] %v8771_v6  ;;  %v5000_v3 = vpop.eup %4999  ;;  %v3141_v31 = vadd.f32 1.0, %v4998_v11  ;;  %5013 = vpow2.f32 %v4307_v57  ;;  %v1944_v18 = vmul.f32 %v10414_v62, %v8615_v27  ;;  %v4306_v57 = vmul.f32 -1.442695, %v8771_v6 }
 0x22b   : > { %10472 = vst [vmem:[#allocation80_spill] sm:$0xff] %v8774_v10  ;;  %10473 = vst [vmem:[#allocation6_spill] sm:$0xff] %v8777_v48  ;;  %v5002_v24 = vpop.eup %5001  ;;  %5015 = vrcp.f32 %v3139_v45  ;;  %v3138_v4 = vadd.f32 1.0, %v5000_v3  ;;  %v1945_v11 = vmul.f32 %v10415_v8, %v8615_v27  ;;  %v8795_v3 = vmul.f32 %v10118_v43, %v1802_v44  ;;  %v10479_v10 = vld [vmem:[#allocation100_spill] sm:$0xff] }
 0x22c   : > { %10474 = vst [vmem:[#allocation32_spill] sm:$0xff] %v8780_v16  ;;  %10475 = vst [vmem:[#allocation5_spill] sm:$0xff] %v8783_v25  ;;  %v5004_v35 = vpop.eup %5003  ;;  %5017 = vrcp.f32 %v3141_v31  ;;  %v3140_v26 = vadd.f32 1.0, %v5002_v24  ;;  %v10476_v25 = vld [vmem:[#allocation133_spill] sm:$0xff]  ;;  %v1946_v48 = vmul.f32 %v10416_v23, %v8615_v27  ;;  %v1947_v31 = vmul.f32 %v10118_v43, %v8615_v27 }
 0x22d   : > { %v5006_v16 = vpop.eup %5005  ;;  %v3519_v45 = vmul.f32 %v5004_v35, %v10476_v25  ;;  %5019 = vrcp.f32 %v3138_v4  ;;  %10477 = vst [vmem:[#allocation7_spill] sm:$0xff] %v8795_v3  ;;  %v722_v24 = vmul.f32 %v10292_v34, %v550_v56  ;;  %v8805_v44 = vadd.f32 %v1944_v18, %v8712_v50  ;;  %v8808_v35 = vpop.f32.mrb[62].mxu0  ;;  %v10488_v18 = vld [vmem:[#allocation134_spill] sm:$0xff] }
 0x22e   : > { %v5008_v32 = vpop.eup %5007  ;;  %v3521_v28 = vmul.f32 %v5006_v16, %v10478_v19  ;;  %5021 = vrcp.f32 %v3140_v26  ;;  %v724_v4 = vmul.f32 %v10299_v61, %v550_v56  ;;  %10481 = vst [vmem:[#allocation30_spill] sm:$0xff] %v8808_v35  ;;  %v8810_v3 = vpop.f32.mrb[62].mxu1  ;;  %v10483_v19 = vld [vmem:[#allocation97_spill] sm:$0xff]  ;;  %v8814_v27 = vadd.f32 %v1945_v11, %v8714_v13  ;;  %v10492_v35 = vld [vmem:[#allocation82_spill] sm:$0xff] }
 0x22f   : > { %v5010_v6 = vpop.eup %5009  ;;  %3798 = vmatprep.mubr.f32.mxu1 %v3519_v45  ;;  %v3518_v25 = vmul.f32 %v5008_v32, %v10479_v10  ;;  %5023 = vpow2.f32 %v4304_v30  ;;  %10480 = vst [vmem:[#allocation138_spill] sm:$0xff] %v8805_v44  ;;  %10482 = vst [vmem:[#allocation34_spill] sm:$0xff] %v8810_v3  ;;  %v723_v26 = vmul.f32 %v10258_v54, %v550_v56  ;;  %v8817_v32 = vpop.f32.mrb[63].mxu0  ;;  %v10489_v45 = vld [vmem:[#allocation135_spill] sm:$0xff]  ;;  %v10490_v3 = vld [vmem:[#allocation141_spill] sm:$0xff] }
 0x230   : > { %4023 = vmatprep.mubr.f32.mxu0 %v3521_v28  ;;  %v3520_v16 = vmul.f32 %v5010_v6, %v10483_v19  ;;  %5025 = vpow2.f32 %v4306_v57  ;;  %10484 = vst [vmem:[#allocation31_spill] sm:$0xff] %v8814_v27  ;;  %10485 = vst [vmem:[#allocation35_spill] sm:$0xff] %v8817_v32  ;;  %v8820_v50 = vadd.f32 %v1946_v48, %v8716_v17  ;;  %v8827_v6 = vpop.permute.xlu1 %559  ;;  %v8829_v13 = vpop.f32.mrb[63].mxu1 }
 0x231   : > { %3799 = vmatmul.mubr.f32.gmra.mrb[98].mxu1 %v3518_v25  ;;  %v1528_v10 = vmul.f32 %v10121_v40, %v8641_v49  ;;  %v725_v30 = vmul.f32 %v10262_v2, %v550_v56  ;;  %v726_v28 = vmul.f32 %v10292_v34, %v8708_v9  ;;  %10487 = vst [vmem:[#allocation37_spill] sm:$0xff] %v8829_v13 }
 0x232   : > { %10486 = vst [vmem:[#allocation53_spill] sm:$0xff] %v8820_v50  ;;  %4024 = vmatmul.mubr.f32.gmra.mrb[98].mxu0 %v3520_v16  ;;  %v963_v57 = vadd.f32 %v10488_v18, %v722_v24  ;;  %v1530_v11 = vmul.f32 %v10402_v12, %v8641_v49  ;;  %v728_v17 = vmul.f32 %v10299_v61, %v8708_v9  ;;  %v5012_v56 = vpop.eup %5011  ;;  %v10491_v16 = vld [vmem:[#allocation72_spill] sm:$0xff] }
 0x233   : > { %v727_v48 = vmul.f32 %v10258_v54, %v8708_v9  ;;  %v1220_v25 = vadd.f32 %v10489_v45, %v724_v4  ;;  %v1529_v19 = vmul.f32 %v10392_v52, %v8641_v49  ;;  %v969_v13 = vadd.f32 %v10490_v3, %v726_v28  ;;  %v10493_v45 = vld [vmem:[#allocation93_spill] sm:$0xff] }
 0x234   : > { %v1532_v24 = vmul.f32 %v10121_v40, %v10491_v16  ;;  %v5014_v18 = vpop.eup %5013  ;;  %v3143_v32 = vadd.f32 1.0, %v5012_v56  ;;  %v965_v50 = vadd.f32 %v10492_v35, %v723_v26  ;;  %v1531_v44 = vmul.f32 %v10144_v47, %v8641_v49  ;;  %v10494_v35 = vld [vmem:[#allocation24_spill] sm:$0xff]  ;;  %v10495_v49 = vld [vmem:[#allocation142_spill] sm:$0xff] }
 0x235   : > { %v1534_v27 = vmul.f32 %v10402_v12, %v10491_v16  ;;  %v5016_v54 = vpop.eup %5015  ;;  %v3145_v4 = vadd.f32 1.0, %v5014_v18  ;;  %v1222_v5 = vadd.f32 %v10493_v45, %v725_v30  ;;  %v1533_v3 = vmul.f32 %v10392_v52, %v10491_v16  ;;  %v8861_v45 = vpop.permute.xlu1 %1373 }
 0x236   : > { %v729_v28 = vmul.f32 %v10262_v2, %v8708_v9  ;;  %v5018_v40 = vpop.eup %5017  ;;  %v3523_v56 = vmul.f32 %v5016_v54, %v8662_v63  ;;  %5027 = vrcp.f32 %v3143_v32  ;;  %v1226_v26 = vadd.f32 %v10494_v35, %v728_v17 }
 0x237   : > { %v971_v39 = vadd.f32 %v10495_v49, %v727_v48  ;;  %v5020_v22 = vpop.eup %5019  ;;  %v3525_v12 = vmul.f32 %v5018_v40, %v8674_v53  ;;  %5029 = vrcp.f32 %v3145_v4  ;;  %v8859_v30 = vadd.f32 %v1947_v31, %v8732_v37  ;;  %v10496_v40 = vld [vmem:[#allocation81_spill] sm:$0xff] }
 0x238   : > { %v1660_v18 = vadd.f32 %v1532_v24, %v969_v13  ;;  %v5022_v52 = vpop.eup %5021  ;;  %3803 = vmatprep.mubr.f32.mxu1 %v3523_v56  ;;  %v3522_v9 = vmul.f32 %v5020_v22, %v8678_v15  ;;  %v1656_v54 = vadd.f32 %v1528_v10, %v963_v57  ;;  %v1658_v63 = vadd.f32 %v1530_v11, %v1220_v25 }
 0x239   : > { %v1657_v32 = vadd.f32 %v1529_v19, %v965_v50  ;;  %v5024_v17 = vpop.eup %5023  ;;  %4028 = vmatprep.mubr.f32.mxu0 %v3525_v12  ;;  %v3524_v48 = vmul.f32 %v5022_v52, %v8690_v51  ;;  %v1659_v35 = vadd.f32 %v1531_v44, %v1222_v5  ;;  %v1228_v53 = vadd.f32 %v10496_v40, %v729_v28  ;;  %v8895_v50 = vpop.permute.xlu1 %2209 }
 0x23a   : > { %v1535_v37 = vmul.f32 %v10144_v47, %v10491_v16  ;;  %v5026_v31 = vpop.eup %5025  ;;  %3804 = vmatmul.mubr.f32.gmra.mrb[100].mxu1 %v3522_v9  ;;  %v3142_v13 = vadd.f32 1.0, %v5024_v17  ;;  %v1662_v24 = vadd.f32 %v1534_v27, %v1226_v26  ;;  %v1661_v4 = vadd.f32 %v1533_v3, %v971_v39  ;;  %v10497_v27 = vld [vmem:[#allocation19_spill] sm:$0xff] }
 0x23b   : > { %v8870_v15 = vadd.f32 %v10153_v59, %v8647_v42  ;;  %4029 = vmatmul.mubr.f32.gmra.mrb[100].mxu0 %v3524_v48  ;;  %v3144_v22 = vadd.f32 1.0, %v5026_v31  ;;  %v8873_v12 = vadd.f32 %v8742_v60, %v1660_v18  ;;  %v1948_v52 = vmul.f32 %v10414_v62, %v8739_v1 }
 0x23c   : > { %v8879_v51 = vadd.f32 %v10154_v58, %v8656_v29  ;;  %5031 = vrcp.f32 %v3142_v13  ;;  %v1949_v39 = vmul.f32 %v10415_v8, %v8739_v1  ;;  %v8886_v42 = vadd.f32 %v10182_v46, %v8645_v33  ;;  %v10502_v13 = vld [vmem:[#allocation23_spill] sm:$0xff] }
 0x23d   : > { %v4309_v5 = vmul.f32 -1.442695, %v8870_v15  ;;  %5033 = vrcp.f32 %v3144_v22  ;;  %v1950_v60 = vmul.f32 %v10416_v23, %v8739_v1  ;;  %v8893_v29 = vadd.f32 %v10190_v21, %v10497_v27  ;;  %v10506_v27 = vld [vmem:[#allocation63_spill] sm:$0xff] }
 0x23e   : > { %v4311_v44 = vmul.f32 -1.442695, %v8879_v51  ;;  %v1663_v10 = vadd.f32 %v1535_v37, %v1228_v53  ;;  %v1951_v57 = vmul.f32 %v10118_v43, %v8739_v1  ;;  %v4308_v33 = vmul.f32 -1.442695, %v8886_v42 }
 0x23f   : > { %5035 = vpow2.f32 %v4309_v5  ;;  %v2076_v11 = vadd.f32 %v1948_v52, %v1656_v54  ;;  %v4310_v25 = vmul.f32 -1.442695, %v8893_v29  ;;  %v2368_v19 = vmul.f32 %v6262_v14, %v8788_v41  ;;  %v10504_v52 = vld [vmem:[#allocation80_spill] sm:$0xff]  ;;  %v10505_v5 = vld [vmem:[#allocation43_spill] sm:$0xff] }
 0x240   : > { %5037 = vpow2.f32 %v4311_v44  ;;  %v5028_v16 = vpop.eup %5027  ;;  %v2369_v3 = vmul.f32 %v10364_v55, %v8788_v41  ;;  %v2370_v28 = vmul.f32 %v6268_v0, %v8788_v41  ;;  %v2371_v1 = vmul.f32 %v10269_v36, %v8788_v41  ;;  %v10498_v41 = vld [vmem:[#allocation61_spill] sm:$0xff] }
 0x241   : > { %5039 = vpow2.f32 %v4308_v33  ;;  %v5030_v56 = vpop.eup %5029  ;;  %v3527_v26 = vmul.f32 %v5028_v16, %v8737_v20  ;;  %v2077_v49 = vadd.f32 %v1949_v39, %v1657_v32  ;;  %v2078_v18 = vadd.f32 %v1950_v60, %v1658_v63  ;;  %v10499_v20 = vld [vmem:[#allocation136_spill] sm:$0xff]  ;;  %v8955_v16 = vpop.permute.xlu0 %564 }
 0x242   : > { %5041 = vpow2.f32 %v4310_v25  ;;  %v3529_v9 = vmul.f32 %v5030_v56, %v8751_v38  ;;  %v2079_v54 = vadd.f32 %v1951_v57, %v1659_v35  ;;  %v730_v17 = vmul.f32 %v10292_v34, %v8827_v6  ;;  %v8926_v38 = vpop.permute.xlu1 %1793  ;;  %v10507_v57 = vld [vmem:[#allocation120_spill] sm:$0xff] }
 0x243   : > { %v732_v48 = vmul.f32 %v10299_v61, %v8827_v6  ;;  %3808 = vmatprep.mubr.f32.mxu1 %v3527_v26  ;;  %v8916_v40 = vadd.f32 %v8748_v7, %v1662_v24  ;;  %v8919_v53 = vadd.f32 %v10498_v41, %v1661_v4  ;;  %v8922_v32 = vadd.f32 %v10499_v20, %v1663_v10  ;;  %v10503_v24 = vld [vmem:[#allocation10_spill] sm:$0xff]  ;;  %v10514_v41 = vld [vmem:[#allocation9_spill] sm:$0xff] }
 0x244   : > { %v8924_v63 = vadd.f32 %v2368_v19, %v2076_v11  ;;  %4033 = vmatprep.mubr.f32.mxu0 %v3529_v9  ;;  %v8928_v35 = vadd.f32 %v2369_v3, %v2077_v49  ;;  %v8930_v37 = vadd.f32 %v2370_v28, %v2078_v18  ;;  %v8932_v31 = vadd.f32 %v2371_v1, %v2079_v54  ;;  %v10508_v11 = vld [vmem:[#allocation8_spill] sm:$0xff]  ;;  %v10510_v26 = vld [vmem:[#allocation62_spill] sm:$0xff]  ;;  %v10512_v9 = vld [vmem:[#allocation137_spill] sm:$0xff] }
 0x245   : > { %v8936_v7 = vadd.f32 %v10153_v59, %v10502_v13  ;;  %v731_v4 = vmul.f32 %v10503_v24, %v8827_v6  ;;  %v733_v22 = vmul.f32 %v10262_v2, %v8827_v6  ;;  %v8944_v39 = vadd.f32 %v10154_v58, %v10504_v52  ;;  %v10509_v3 = vld [vmem:[#allocation160_spill] sm:$0xff] }
 0x246   : > { %10500 = vst [vmem:[#allocation113_spill] sm:$0xff] %v8924_v63  ;;  %10501 = vst [vmem:[#allocation52_spill] sm:$0xff] %v8930_v37  ;;  %v8948_v60 = vadd.f32 %v10182_v46, %v10505_v5  ;;  %v5032_v44 = vpop.eup %5031  ;;  %v975_v10 = vadd.f32 %v10506_v27, %v730_v17  ;;  %v1232_v33 = vadd.f32 %v10507_v57, %v732_v48  ;;  %v10513_v17 = vld [vmem:[#allocation14_spill] sm:$0xff]  ;;  %v10515_v5 = vld [vmem:[#allocation25_spill] sm:$0xff] }
 0x247   : > { %v1536_v25 = vmul.f32 %v10508_v11, %v8861_v45  ;;  %v4313_v19 = vmul.f32 -1.442695, %v8936_v7  ;;  %v5034_v6 = vpop.eup %5033  ;;  %v3526_v28 = vmul.f32 %v5032_v44, %v10509_v3  ;;  %v4315_v1 = vmul.f32 -1.442695, %v8944_v39  ;;  %v10516_v27 = vld [vmem:[#allocation65_spill] sm:$0xff]  ;;  %v8971_v3 = vpop.permute.xlu1 %1377 }
 0x248   : > { %v4312_v56 = vmul.f32 -1.442695, %v8948_v60  ;;  %v8962_v49 = vadd.f32 %v10190_v21, %v10510_v26  ;;  %v3528_v54 = vmul.f32 %v5034_v6, %v10512_v9  ;;  %v1537_v48 = vmul.f32 %v10513_v17, %v8861_v45 }
 0x249   : > { %v5036_v18 = vpop.eup %5035  ;;  %v1538_v20 = vmul.f32 %v10514_v41, %v8861_v45  ;;  %5043 = vpow2.f32 %v4313_v19  ;;  %3809 = vmatmul.mubr.f32.gmra.mrb[102].mxu1 %v3526_v28  ;;  %v977_v44 = vadd.f32 %v10515_v5, %v731_v4  ;;  %v1234_v57 = vadd.f32 %v10516_v27, %v733_v22  ;;  %v8982_v27 = vpop.permute.xlu0 %579 }
 0x24a   : > { %10511 = vst [vmem:[#allocation66_spill] sm:$0xff] %v8962_v49  ;;  %v5038_v13 = vpop.eup %5037  ;;  %v3147_v52 = vadd.f32 1.0, %v5036_v18  ;;  %5045 = vpow2.f32 %v4315_v1  ;;  %4034 = vmatmul.mubr.f32.gmra.mrb[102].mxu0 %v3528_v54  ;;  %v1539_v9 = vmul.f32 %v10144_v47, %v8861_v45  ;;  %v1664_v37 = vadd.f32 %v1536_v25, %v975_v10  ;;  %v10517_v1 = vld [vmem:[#allocation31_spill] sm:$0xff]  ;;  %v10518_v18 = vld [vmem:[#allocation116_spill] sm:$0xff]  ;;  %v10519_v54 = vld [vmem:[#allocation33_spill] sm:$0xff] }
 0x24b   : > { %v5040_v26 = vpop.eup %5039  ;;  %v3149_v6 = vadd.f32 1.0, %v5038_v13  ;;  %5047 = vpow2.f32 %v4312_v56  ;;  %v4314_v28 = vmul.f32 -1.442695, %v8962_v49  ;;  %v2372_v4 = vmul.f32 %v6262_v14, %v8895_v50  ;;  %10520 = vst [vmem:[#allocation117_spill] sm:$0xff] %v8982_v27  ;;  %v10521_v10 = vld [vmem:[#allocation138_spill] sm:$0xff]  ;;  %v10522_v25 = vld [vmem:[#allocation108_spill] sm:$0xff] }
 0x24c   : > { %v5042_v63 = vpop.eup %5041  ;;  %5049 = vrcp.f32 %v3147_v52  ;;  %v3146_v19 = vadd.f32 1.0, %v5040_v26  ;;  %v2493_v5 = vadd.f32 %v10518_v18, %v10517_v1  ;;  %v2495_v13 = vadd.f32 %v10519_v54, %v8859_v30  ;;  %v10523_v52 = vld [vmem:[#allocation53_spill] sm:$0xff]  ;;  %v10524_v26 = vld [vmem:[#allocation50_spill] sm:$0xff]  ;;  %v9003_v54 = vpop.permute.xlu1 %569 }
 0x24d   : > { %5051 = vrcp.f32 %v3149_v6  ;;  %v3148_v22 = vadd.f32 1.0, %v5042_v63  ;;  %v2373_v45 = vmul.f32 %v10364_v55, %v8895_v50  ;;  %v2492_v56 = vadd.f32 %v10522_v25, %v10521_v10 }
 0x24e   : > { %5053 = vrcp.f32 %v3146_v19  ;;  %v2494_v49 = vadd.f32 %v10524_v26, %v10523_v52  ;;  %v2374_v63 = vmul.f32 %v6268_v0, %v8895_v50  ;;  %v8993_v6 = vadd.f32 %v10153_v59, %v2493_v5 }
 0x24f   : > { %5055 = vrcp.f32 %v3148_v22  ;;  %v8996_v30 = vadd.f32 %v10154_v58, %v2495_v13  ;;  %v1666_v19 = vadd.f32 %v1538_v20, %v1232_v33  ;;  %v2375_v1 = vmul.f32 %v10269_v36, %v8895_v50 }
 0x250   : > { %5057 = vpow2.f32 %v4314_v28  ;;  %v9001_v18 = vadd.f32 %v10182_v46, %v2492_v56  ;;  %v1665_v22 = vadd.f32 %v1537_v48, %v977_v44  ;;  %v4317_v10 = vmul.f32 -1.442695, %v8993_v6  ;;  %v2214_v44 = vpop.permute.xlu0 %2213 }
 0x251   : > { %v4319_v25 = vmul.f32 -1.442695, %v8996_v30  ;;  %v9008_v5 = vadd.f32 %v10190_v21, %v2494_v49  ;;  %v1667_v13 = vadd.f32 %v1539_v9, %v1234_v57  ;;  %v9011_v33 = vadd.f32 %v2372_v4, %v8873_v12 }
 0x252   : > { %v4316_v20 = vmul.f32 -1.442695, %v9001_v18  ;;  %v1956_v50 = vmul.f32 %v10414_v62, %v8926_v38  ;;  %v9017_v56 = vadd.f32 %v2373_v45, %v8919_v53  ;;  %v9020_v48 = vadd.f32 %v2374_v63, %v8916_v40 }
 0x253   : > { %10525 = vst [vmem:[#allocation69_spill] sm:$0xff] %v9008_v5  ;;  %10526 = vst [vmem:[#allocation114_spill] sm:$0xff] %v9011_v33  ;;  %v5044_v28 = vpop.eup %5043  ;;  %5059 = vpow2.f32 %v4317_v10  ;;  %v1957_v49 = vmul.f32 %v10415_v8, %v8926_v38  ;;  %v9025_v9 = vadd.f32 %v2375_v1, %v8922_v32  ;;  %v1958_v4 = vmul.f32 %v10416_v23, %v8926_v38  ;;  %v9033_v32 = vpop.permute.xlu1 %1797 }
 0x254   : > { %10527 = vst [vmem:[#allocation68_spill] sm:$0xff] %v9017_v56  ;;  %10528 = vst [vmem:[#allocation95_spill] sm:$0xff] %v9020_v48  ;;  %v5046_v57 = vpop.eup %5045  ;;  %v3151_v12 = vadd.f32 1.0, %v5044_v28  ;;  %5061 = vpow2.f32 %v4319_v25  ;;  %v4318_v40 = vmul.f32 -1.442695, %v9008_v5  ;;  %v1959_v45 = vmul.f32 %v10118_v43, %v8926_v38  ;;  %v9035_v1 = vpop.f32.mrb[64].mxu1 }
 0x255   : > { %10529 = vst [vmem:[#allocation139_spill] sm:$0xff] %v9025_v9  ;;  %v5048_v52 = vpop.eup %5047  ;;  %v3153_v53 = vadd.f32 1.0, %v5046_v57  ;;  %5063 = vpow2.f32 %v4316_v20  ;;  %v2084_v10 = vadd.f32 %v1956_v50, %v1664_v37  ;;  %v2376_v28 = vmul.f32 %v6262_v14, %v2214_v44  ;;  %10530 = vst [vmem:[#allocation140_spill] sm:$0xff] %v9035_v1  ;;  %v9039_v48 = vpop.f32.mrb[64].mxu0 }
 0x256   : > { %v5050_v26 = vpop.eup %5049  ;;  %5065 = vrcp.f32 %v3151_v12  ;;  %v3150_v63 = vadd.f32 1.0, %v5048_v52  ;;  %v2085_v20 = vadd.f32 %v1957_v49, %v1665_v22  ;;  %v2377_v57 = vmul.f32 %v10364_v55, %v2214_v44  ;;  %10531 = vst [vmem:[#allocation77_spill] sm:$0xff] %v9039_v48  ;;  %v3717_v38 = vpop.f32.mrb[65].mxu1  ;;  %v10539_v48 = vld [vmem:[#allocation57_spill] sm:$0xff] }
 0x257   : > { %v5052_v25 = vpop.eup %5051  ;;  %v3531_v27 = vmul.f32 %v5050_v26, %v8870_v15  ;;  %5067 = vrcp.f32 %v3153_v53  ;;  %v2086_v37 = vadd.f32 %v1958_v4, %v1666_v19  ;;  %v734_v50 = vmul.f32 %v10292_v34, %v8955_v16  ;;  %v3942_v52 = vpop.f32.mrb[65].mxu0 }
 0x258   : > { %v5054_v5 = vpop.eup %5053  ;;  %v3533_v12 = vmul.f32 %v5052_v25, %v8879_v51  ;;  %5069 = vrcp.f32 %v3150_v63  ;;  %v2087_v22 = vadd.f32 %v1959_v45, %v1667_v13  ;;  %v736_v49 = vmul.f32 %v10299_v61, %v8955_v16  ;;  %v10534_v13 = vld [vmem:[#allocation94_spill] sm:$0xff]  ;;  %v10536_v52 = vld [vmem:[#allocation123_spill] sm:$0xff] }
 0x259   : > { %v5056_v1 = vpop.eup %5055  ;;  %3813 = vmatprep.mubr.f32.mxu1 %v3531_v27  ;;  %v3530_v15 = vmul.f32 %v5054_v5, %v8886_v42  ;;  %5071 = vpow2.f32 %v4318_v40  ;;  %v2378_v51 = vmul.f32 %v6268_v0, %v2214_v44  ;;  %v2379_v19 = vmul.f32 %v10269_v36, %v2214_v44 }
 0x25a   : > { %v5058_v53 = vpop.eup %5057  ;;  %4038 = vmatprep.mubr.f32.mxu0 %v3533_v12  ;;  %v3532_v26 = vmul.f32 %v5056_v1, %v8893_v29  ;;  %v9050_v4 = vadd.f32 %v2376_v28, %v2084_v10  ;;  %v9052_v27 = vadd.f32 %v2377_v57, %v2085_v20  ;;  %v735_v42 = vmul.f32 %v10503_v24, %v8955_v16  ;;  %v9065_v10 = vpop.permute.xlu1 %2217  ;;  %v10535_v1 = vld [vmem:[#allocation111_spill] sm:$0xff] }
 0x25b   : > { %3814 = vmatmul.mubr.f32.gmra.mrb[104].mxu1 %v3530_v15  ;;  %v3152_v63 = vadd.f32 1.0, %v5058_v53  ;;  %v737_v5 = vmul.f32 %v10262_v2, %v8955_v16  ;;  %v981_v40 = vadd.f32 %v10534_v13, %v734_v50  ;;  %v1540_v29 = vmul.f32 %v10508_v11, %v8971_v3  ;;  %v10538_v13 = vld [vmem:[#allocation56_spill] sm:$0xff] }
 0x25c   : > { %10532 = vst [vmem:[#allocation36_spill] sm:$0xff] %v9050_v4  ;;  %10533 = vst [vmem:[#allocation127_spill] sm:$0xff] %v9052_v27  ;;  %4039 = vmatmul.mubr.f32.gmra.mrb[104].mxu0 %v3532_v26  ;;  %v1542_v44 = vmul.f32 %v10514_v41, %v8971_v3  ;;  %v738_v45 = vmul.f32 %v10292_v34, %v9003_v54  ;;  %v1238_v25 = vadd.f32 %v10535_v1, %v736_v49 }
 0x25d   : > { %v5060_v28 = vpop.eup %5059  ;;  %5073 = vrcp.f32 %v3152_v63  ;;  %v740_v16 = vmul.f32 %v10299_v61, %v9003_v54  ;;  %v739_v20 = vmul.f32 %v10503_v24, %v9003_v54  ;;  %v1541_v12 = vmul.f32 %v10513_v17, %v8971_v3  ;;  %v10537_v63 = vld [vmem:[#allocation112_spill] sm:$0xff] }
 0x25e   : > { %v5062_v57 = vpop.eup %5061  ;;  %v3155_v38 = vadd.f32 1.0, %v5060_v28  ;;  %v1543_v50 = vmul.f32 %v10144_v47, %v8971_v3  ;;  %v987_v15 = vadd.f32 %v10536_v52, %v738_v45  ;;  %v983_v49 = vadd.f32 %v10537_v63, %v735_v42  ;;  %v10540_v28 = vld [vmem:[#allocation78_spill] sm:$0xff]  ;;  %v9084_v3 = vpop.f32.mrb[66].mxu1  ;;  %v10542_v42 = vld [vmem:[#allocation132_spill] sm:$0xff] }
 0x25f   : > { %v5064_v53 = vpop.eup %5063  ;;  %v3157_v26 = vadd.f32 1.0, %v5062_v57  ;;  %v1240_v1 = vadd.f32 %v10538_v13, %v737_v5  ;;  %v1244_v4 = vadd.f32 %v10539_v48, %v740_v16  ;;  %v1544_v9 = vmul.f32 %v10508_v11, %v10540_v28  ;;  %10541 = vst [vmem:[#allocation73_spill] sm:$0xff] %v9084_v3  ;;  %v3722_v5 = vpop.f32.mrb[67].mxu1 }
 0x260   : > { %v5066_v27 = vpop.eup %5065  ;;  %5075 = vrcp.f32 %v3155_v38  ;;  %v3154_v33 = vadd.f32 1.0, %v5064_v53  ;;  %v1546_v56 = vmul.f32 %v10514_v41, %v10540_v28  ;;  %v989_v52 = vadd.f32 %v10542_v42, %v739_v20  ;;  %v9091_v13 = vpop.permute.xlu1 %574 }
 0x261   : > { %v5068_v45 = vpop.eup %5067  ;;  %v3535_v57 = vmul.f32 %v5066_v27, %v8936_v7  ;;  %5077 = vrcp.f32 %v3157_v26  ;;  %v741_v48 = vmul.f32 %v10262_v2, %v9003_v54  ;;  %v1672_v53 = vadd.f32 %v1544_v9, %v987_v15  ;;  %v10544_v9 = vld [vmem:[#allocation27_spill] sm:$0xff] }
 0x262   : > { %v5070_v16 = vpop.eup %5069  ;;  %v3537_v38 = vmul.f32 %v5068_v45, %v8944_v39  ;;  %5079 = vrcp.f32 %v3154_v33  ;;  %v1674_v63 = vadd.f32 %v1546_v56, %v1244_v4  ;;  %v9094_v7 = vadd.f32 %v2378_v51, %v2086_v37  ;;  %v9100_v33 = vpop.f32.mrb[66].mxu0  ;;  %v10549_v45 = vld [vmem:[#allocation52_spill] sm:$0xff] }
 0x263   : > { %v5072_v41 = vpop.eup %5071  ;;  %3818 = vmatprep.mubr.f32.mxu1 %v3535_v57  ;;  %v3534_v3 = vmul.f32 %v5070_v16, %v8948_v60  ;;  %v9096_v27 = vadd.f32 %v2379_v19, %v2087_v22  ;;  %v1668_v20 = vadd.f32 %v1540_v29, %v981_v40  ;;  %v1670_v26 = vadd.f32 %v1542_v44, %v1238_v25  ;;  %v10545_v22 = vld [vmem:[#allocation6_spill] sm:$0xff]  ;;  %v10546_v19 = vld [vmem:[#allocation5_spill] sm:$0xff] }
 0x264   : > { %4043 = vmatprep.mubr.f32.mxu0 %v3537_v38  ;;  %v3156_v54 = vadd.f32 1.0, %v5072_v41  ;;  %v1669_v42 = vadd.f32 %v1541_v12, %v983_v49  ;;  %v1545_v39 = vmul.f32 %v10513_v17, %v10540_v28  ;;  %10543 = vst [vmem:[#allocation143_spill] sm:$0xff] %v9100_v33  ;;  %v1671_v56 = vadd.f32 %v1543_v50, %v1240_v1  ;;  %v3947_v41 = vpop.f32.mrb[67].mxu0  ;;  %v10547_v50 = vld [vmem:[#allocation66_spill] sm:$0xff]  ;;  %v10548_v1 = vld [vmem:[#allocation113_spill] sm:$0xff] }
 0x265   : > { %3819 = vmatmul.mubr.f32.gmra.mrb[106].mxu1 %v3534_v3  ;;  %v1246_v4 = vadd.f32 %v10544_v9, %v741_v48  ;;  %v9105_v60 = vadd.f32 %v10153_v59, %v8928_v35  ;;  %v9109_v37 = vadd.f32 %v10154_v58, %v8932_v31  ;;  %v9112_v51 = vadd.f32 %v10545_v22, %v1672_v53  ;;  %v10550_v9 = vld [vmem:[#allocation32_spill] sm:$0xff] }
 0x266   : > { %5081 = vrcp.f32 %v3156_v54  ;;  %v9115_v40 = vadd.f32 %v10546_v19, %v1674_v63  ;;  %v1673_v29 = vadd.f32 %v1545_v39, %v989_v52  ;;  %v1547_v25 = vmul.f32 %v10144_v47, %v10540_v28  ;;  %v9134_v28 = vpop.permute.xlu1 %1385 }
 0x267   : > { %v5074_v44 = vpop.eup %5073  ;;  %v1960_v35 = vmul.f32 %v10414_v62, %v9033_v32  ;;  %v4321_v12 = vmul.f32 -1.442695, %v9105_v60  ;;  %v4323_v31 = vmul.f32 -1.442695, %v9109_v37  ;;  %v1961_v49 = vmul.f32 %v10415_v8, %v9033_v32  ;;  %v9150_v22 = vpop.f32.mrb[68].mxu1 }
 0x268   : > { %v3536_v15 = vmul.f32 %v5074_v44, %v10547_v50  ;;  %v9128_v3 = vadd.f32 %v10182_v46, %v10548_v1  ;;  %v9132_v57 = vadd.f32 %v10190_v21, %v10549_v45  ;;  %v1675_v52 = vadd.f32 %v1547_v25, %v1246_v4  ;;  %10551 = vst [vmem:[#allocation150_spill] sm:$0xff] %v9150_v22 }
 0x269   : > { %v1962_v48 = vmul.f32 %v10416_v23, %v9033_v32  ;;  %v1963_v5 = vmul.f32 %v10118_v43, %v9033_v32  ;;  %5083 = vpow2.f32 %v4321_v12  ;;  %v2380_v63 = vmul.f32 %v6262_v14, %v9065_v10 }
 0x26a   : > { %v5076_v16 = vpop.eup %5075  ;;  %4044 = vmatmul.mubr.f32.gmra.mrb[106].mxu0 %v3536_v15  ;;  %5085 = vpow2.f32 %v4323_v31  ;;  %v4320_v38 = vmul.f32 -1.442695, %v9128_v3  ;;  %v4322_v53 = vmul.f32 -1.442695, %v9132_v57  ;;  %v9146_v4 = vadd.f32 %v10550_v9, %v1673_v29  ;;  %v3727_v31 = vpop.f32.mrb[69].mxu1 }
 0x26b   : > { %v5078_v54 = vpop.eup %5077  ;;  %v3539_v39 = vmul.f32 %v5076_v16, %v8993_v6  ;;  %v2088_v41 = vadd.f32 %v1960_v35, %v1668_v20  ;;  %v2381_v32 = vmul.f32 %v10364_v55, %v9065_v10  ;;  %v2089_v25 = vadd.f32 %v1961_v49, %v1669_v42  ;;  %v10552_v35 = vld [vmem:[#allocation7_spill] sm:$0xff]  ;;  %v9165_v49 = vpop.permute.xlu1 %2221 }
 0x26c   : > { %v5080_v19 = vpop.eup %5079  ;;  %v3541_v44 = vmul.f32 %v5078_v54, %v8996_v30  ;;  %5087 = vpow2.f32 %v4320_v38  ;;  %v2382_v12 = vmul.f32 %v6268_v0, %v9065_v10  ;;  %v2383_v20 = vmul.f32 %v10269_v36, %v9065_v10  ;;  %v9167_v1 = vpop.f32.mrb[68].mxu0  ;;  %v10555_v38 = vld [vmem:[#allocation139_spill] sm:$0xff] }
 0x26d   : > { %3823 = vmatprep.mubr.f32.mxu1 %v3539_v39  ;;  %v3538_v6 = vmul.f32 %v5080_v19, %v9001_v18  ;;  %5089 = vpow2.f32 %v4322_v53  ;;  %v742_v29 = vmul.f32 %v10292_v34, %v9091_v13  ;;  %v9161_v50 = vadd.f32 %v10552_v35, %v1675_v52  ;;  %10553 = vst [vmem:[#allocation146_spill] sm:$0xff] %v9167_v1  ;;  %v10557_v39 = vld [vmem:[#allocation69_spill] sm:$0xff]  ;;  %v10559_v31 = vld [vmem:[#allocation95_spill] sm:$0xff] }
 0x26e   : > { %4048 = vmatprep.mubr.f32.mxu0 %v3541_v44  ;;  %v2090_v30 = vadd.f32 %v1962_v48, %v1670_v26  ;;  %v2091_v42 = vadd.f32 %v1963_v5, %v1671_v56  ;;  %v9163_v15 = vadd.f32 %v2380_v63, %v2088_v41  ;;  %v9169_v18 = vadd.f32 %v2381_v32, %v2089_v25  ;;  %v3952_v26 = vpop.f32.mrb[69].mxu0  ;;  %v10554_v5 = vld [vmem:[#allocation68_spill] sm:$0xff]  ;;  %v10556_v63 = vld [vmem:[#allocation114_spill] sm:$0xff]  ;;  %v10565_v1 = vld [vmem:[#allocation127_spill] sm:$0xff] }
 0x26f   : > { %3824 = vmatmul.mubr.f32.gmra.mrb[108].mxu1 %v3538_v6  ;;  %v744_v10 = vmul.f32 %v10299_v61, %v9091_v13  ;;  %v743_v45 = vmul.f32 %v10503_v24, %v9091_v13  ;;  %v745_v52 = vmul.f32 %v10262_v2, %v9091_v13  ;;  %v9181_v16 = vadd.f32 %v10153_v59, %v10554_v5  ;;  %v10558_v13 = vld [vmem:[#allocation109_spill] sm:$0xff]  ;;  %v10563_v26 = vld [vmem:[#allocation11_spill] sm:$0xff]  ;;  %v1806_v33 = vpop.permute.xlu1 %1805 }
 0x270   : > { %v5082_v56 = vpop.eup %5081  ;;  %v9177_v48 = vadd.f32 %v2382_v12, %v2090_v30  ;;  %v9185_v53 = vadd.f32 %v10154_v58, %v10555_v38  ;;  %v9189_v54 = vadd.f32 %v10182_v46, %v10556_v63  ;;  %v9192_v41 = vadd.f32 %v2383_v20, %v2091_v42  ;;  %v10561_v20 = vld [vmem:[#allocation70_spill] sm:$0xff]  ;;  %v10564_v5 = vld [vmem:[#allocation9_spill] sm:$0xff] }
 0x271   : > { %v3540_v9 = vmul.f32 %v5082_v56, %v10557_v39  ;;  %v993_v32 = vadd.f32 %v10558_v13, %v742_v29  ;;  %v1548_v19 = vmul.f32 %v10508_v11, %v9134_v28  ;;  %v1549_v44 = vmul.f32 %v10513_v17, %v9134_v28  ;;  %v10562_v42 = vld [vmem:[#allocation154_spill] sm:$0xff] }
 0x272   : > { %v4325_v25 = vmul.f32 -1.442695, %v9181_v16  ;;  %v4327_v12 = vmul.f32 -1.442695, %v9185_v53  ;;  %v9203_v6 = vadd.f32 %v10190_v21, %v10559_v31  ;;  %v1250_v30 = vadd.f32 %v10561_v20, %v744_v10 }
 0x273   : > { %v5084_v35 = vpop.eup %5083  ;;  %4049 = vmatmul.mubr.f32.gmra.mrb[108].mxu0 %v3540_v9  ;;  %v995_v29 = vadd.f32 %v10562_v42, %v743_v45  ;;  %v1252_v56 = vadd.f32 %v10563_v26, %v745_v52  ;;  %v1550_v38 = vmul.f32 %v10564_v5, %v9134_v28  ;;  %v4324_v13 = vmul.f32 -1.442695, %v9189_v54 }
 0x274   : > { %10560 = vst [vmem:[#allocation122_spill] sm:$0xff] %v9203_v6  ;;  %v5086_v63 = vpop.eup %5085  ;;  %v3159_v39 = vadd.f32 1.0, %v5084_v35  ;;  %5091 = vpow2.f32 %v4325_v25  ;;  %v9213_v31 = vadd.f32 %v10153_v59, %v10565_v1  ;;  %v1551_v10 = vmul.f32 %v10144_v47, %v9134_v28 }
 0x275   : > { %v3161_v9 = vadd.f32 1.0, %v5086_v63  ;;  %v1676_v45 = vadd.f32 %v1548_v19, %v993_v32  ;;  %5093 = vpow2.f32 %v4327_v12  ;;  %v1677_v20 = vadd.f32 %v1549_v44, %v995_v29  ;;  %v10568_v63 = vld [vmem:[#allocation36_spill] sm:$0xff]  ;;  %v9228_v32 = vpop.f32.mrb[70].mxu1 }
 0x276   : > { %10566 = vst [vmem:[#allocation145_spill] sm:$0xff] %v9213_v31  ;;  %v5088_v52 = vpop.eup %5087  ;;  %5095 = vrcp.f32 %v3159_v39  ;;  %v4326_v42 = vmul.f32 -1.442695, %v9203_v6  ;;  %v2384_v25 = vmul.f32 %v6262_v14, %v9165_v49  ;;  %v9222_v1 = vadd.f32 %v10154_v58, %v9096_v27  ;;  %10570 = vst [vmem:[#allocation71_spill] sm:$0xff] %v9228_v32  ;;  %v3732_v29 = vpop.f32.mrb[71].mxu1 }
 0x277   : > { %v5090_v35 = vpop.eup %5089  ;;  %5097 = vrcp.f32 %v3161_v9  ;;  %v3158_v26 = vadd.f32 1.0, %v5088_v52  ;;  %v9226_v28 = vadd.f32 %v10182_v46, %v10568_v63  ;;  %v4329_v44 = vmul.f32 -1.442695, %v9213_v31  ;;  %v9239_v52 = vpop.f32.mrb[70].mxu0 }
 0x278   : > { %10567 = vst [vmem:[#allocation121_spill] sm:$0xff] %v9222_v1  ;;  %v3160_v19 = vadd.f32 1.0, %v5090_v35  ;;  %5099 = vpow2.f32 %v4324_v13  ;;  %v9233_v12 = vadd.f32 %v10190_v21, %v9094_v7  ;;  %v2385_v27 = vmul.f32 %v10364_v55, %v9165_v49  ;;  %10572 = vst [vmem:[#allocation158_spill] sm:$0xff] %v9239_v52  ;;  %v9244_v7 = vpop.permute.xlu1 %1389  ;;  %v3957_v29 = vpop.f32.mrb[71].mxu0 }
 0x279   : > { %10569 = vst [vmem:[#allocation124_spill] sm:$0xff] %v9226_v28  ;;  %5101 = vrcp.f32 %v3158_v26  ;;  %v4331_v39 = vmul.f32 -1.442695, %v9222_v1  ;;  %v1968_v9 = vmul.f32 %v10414_v62, %v1806_v33  ;;  %v4328_v13 = vmul.f32 -1.442695, %v9226_v28  ;;  %v2226_v1 = vpop.permute.xlu0 %2225 }
 0x27a   : > { %10571 = vst [vmem:[#allocation125_spill] sm:$0xff] %v9233_v12  ;;  %5103 = vrcp.f32 %v3160_v19  ;;  %v1969_v35 = vmul.f32 %v10415_v8, %v1806_v33  ;;  %v1970_v63 = vmul.f32 %v10416_v23, %v1806_v33  ;;  %v1678_v26 = vadd.f32 %v1550_v38, %v1250_v30 }
 0x27b   : > { %v1679_v32 = vadd.f32 %v1551_v10, %v1252_v56  ;;  %5105 = vpow2.f32 %v4326_v42  ;;  %v4330_v22 = vmul.f32 -1.442695, %v9233_v12  ;;  %v2386_v31 = vmul.f32 %v6268_v0, %v9165_v49 }
 0x27c   : > { %v2387_v19 = vmul.f32 %v10269_v36, %v9165_v49  ;;  %v9252_v52 = vadd.f32 %v2384_v25, %v9112_v51  ;;  %5107 = vpow2.f32 %v4329_v44  ;;  %v9255_v28 = vadd.f32 %v2385_v27, %v9146_v4  ;;  %v585_v27 = vpop.permute.xlu1 %584 }
 0x27d   : > { %5109 = vpow2.f32 %v4331_v39  ;;  %v1971_v30 = vmul.f32 %v10118_v43, %v1806_v33  ;;  %v2096_v56 = vadd.f32 %v1968_v9, %v1676_v45  ;;  %v2097_v10 = vadd.f32 %v1969_v35, %v1677_v20  ;;  %v10574_v45 = vld [vmem:[#allocation117_spill] sm:$0xff] }
 0x27e   : > { %v5092_v38 = vpop.eup %5091  ;;  %5111 = vpow2.f32 %v4328_v13  ;;  %v2098_v42 = vadd.f32 %v1970_v63, %v1678_v26  ;;  %v2388_v29 = vmul.f32 %v6262_v14, %v2226_v1  ;;  %v2389_v51 = vmul.f32 %v10364_v55, %v2226_v1 }
 0x27f   : > { %v5094_v12 = vpop.eup %5093  ;;  %v3163_v6 = vadd.f32 1.0, %v5092_v38  ;;  %5113 = vpow2.f32 %v4330_v22  ;;  %v2390_v49 = vmul.f32 %v6268_v0, %v2226_v1  ;;  %v9262_v44 = vadd.f32 %v2386_v31, %v9115_v40  ;;  %v1394_v38 = vpop.permute.xlu0 %1393 }
 0x280   : > { %v5096_v25 = vpop.eup %5095  ;;  %v3165_v4 = vadd.f32 1.0, %v5094_v12  ;;  %v9265_v33 = vadd.f32 %v2387_v19, %v9161_v50  ;;  %v746_v20 = vmul.f32 %v10292_v34, %v10574_v45  ;;  %v9270_v22 = vadd.f32 %v1971_v30, %v1679_v32  ;;  %v10578_v19 = vld [vmem:[#allocation115_spill] sm:$0xff] }
 0x281   : > { %10573 = vst [vmem:[#allocation149_spill] sm:$0xff] %v9262_v44  ;;  %v5098_v39 = vpop.eup %5097  ;;  %v3543_v9 = vmul.f32 %v5096_v25, %v9105_v60  ;;  %5115 = vrcp.f32 %v3163_v6  ;;  %v748_v13 = vmul.f32 %v10299_v61, %v10574_v45  ;;  %v9276_v50 = vmul.f32 %v10269_v36, %v2226_v1 }
 0x282   : > { %v5100_v12 = vpop.eup %5099  ;;  %v3545_v40 = vmul.f32 %v5098_v39, %v9109_v37  ;;  %5117 = vrcp.f32 %v3165_v4  ;;  %v747_v31 = vmul.f32 %v10503_v24, %v10574_v45  ;;  %v9280_v60 = vadd.f32 %v2388_v29, %v2096_v56 }
 0x283   : > { %v5102_v35 = vpop.eup %5101  ;;  %3828 = vmatprep.mubr.f32.mxu1 %v3543_v9  ;;  %v3162_v63 = vadd.f32 1.0, %v5100_v12  ;;  %v9282_v6 = vadd.f32 %v2389_v51, %v2097_v10  ;;  %v9284_v32 = vadd.f32 %v2390_v49, %v2098_v42  ;;  %v999_v30 = vadd.f32 %v10578_v19, %v746_v20  ;;  %v10579_v10 = vld [vmem:[#allocation157_spill] sm:$0xff]  ;;  %v9295_v51 = vpop.f32.mrb[72].mxu1  ;;  %v10581_v20 = vld [vmem:[#allocation107_spill] sm:$0xff]  ;;  %v10582_v9 = vld [vmem:[#allocation76_spill] sm:$0xff] }
 0x284   : > { %10575 = vst [vmem:[#allocation144_spill] sm:$0xff] %v9280_v60  ;;  %v5104_v26 = vpop.eup %5103  ;;  %4053 = vmatprep.mubr.f32.mxu0 %v3545_v40  ;;  %v3542_v37 = vmul.f32 %v5102_v35, %v9128_v3  ;;  %v749_v1 = vmul.f32 %v10262_v2, %v10574_v45  ;;  %v750_v25 = vmul.f32 %v10292_v34, %v585_v27  ;;  %10580 = vst [vmem:[#allocation161_spill] sm:$0xff] %v9295_v51  ;;  %v9301_v40 = vpop.permute.xlu1 %1809 }
 0x285   : > { %10576 = vst [vmem:[#allocation147_spill] sm:$0xff] %v9282_v6  ;;  %10577 = vst [vmem:[#allocation38_spill] sm:$0xff] %v9284_v32  ;;  %v5106_v4 = vpop.eup %5105  ;;  %v3544_v56 = vmul.f32 %v5104_v26, %v9132_v57  ;;  %5119 = vrcp.f32 %v3162_v63  ;;  %v1256_v29 = vadd.f32 %v10579_v10, %v748_v13  ;;  %v1552_v42 = vmul.f32 %v10508_v11, %v9244_v7  ;;  %v3737_v57 = vpop.f32.mrb[73].mxu1  ;;  %v10584_v10 = vld [vmem:[#allocation59_spill] sm:$0xff] }
 0x286   : > { %v5108_v3 = vpop.eup %5107  ;;  %3829 = vmatmul.mubr.f32.gmra.mrb[110].mxu1 %v3542_v37  ;;  %v3164_v49 = vadd.f32 1.0, %v5106_v4  ;;  %v1001_v39 = vadd.f32 %v10581_v20, %v747_v31  ;;  %v1553_v45 = vmul.f32 %v10513_v17, %v9244_v7  ;;  %v1005_v12 = vadd.f32 %v10582_v9, %v750_v25  ;;  %v9306_v19 = vpop.f32.mrb[72].mxu0 }
 0x287   : > { %v5110_v35 = vpop.eup %5109  ;;  %4054 = vmatmul.mubr.f32.gmra.mrb[110].mxu0 %v3544_v56  ;;  %v3167_v13 = vadd.f32 1.0, %v5108_v3  ;;  %v1556_v63 = vmul.f32 %v10508_v11, %v1394_v38  ;;  %v752_v26 = vmul.f32 %v10299_v61, %v585_v27  ;;  %v751_v37 = vmul.f32 %v10503_v24, %v585_v27  ;;  %10583 = vst [vmem:[#allocation41_spill] sm:$0xff] %v9306_v19  ;;  %v3962_v9 = vpop.f32.mrb[73].mxu0  ;;  %v10585_v3 = vld [vmem:[#allocation74_spill] sm:$0xff] }
 0x288   : > { %v5112_v31 = vpop.eup %5111  ;;  %5121 = vrcp.f32 %v3164_v49  ;;  %v3169_v4 = vadd.f32 1.0, %v5110_v35  ;;  %v1258_v20 = vadd.f32 %v10584_v10, %v749_v1  ;;  %v1557_v25 = vmul.f32 %v10513_v17, %v1394_v38  ;;  %v1814_v35 = vpop.permute.xlu0 %1813  ;;  %v10586_v9 = vld [vmem:[#allocation60_spill] sm:$0xff] }
 0x289   : > { %v5114_v57 = vpop.eup %5113  ;;  %5123 = vrcp.f32 %v3167_v13  ;;  %v3166_v56 = vadd.f32 1.0, %v5112_v31  ;;  %v1007_v32 = vadd.f32 %v10585_v3, %v751_v37  ;;  %v753_v60 = vmul.f32 %v10262_v2, %v585_v27  ;;  %v10587_v27 = vld [vmem:[#allocation106_spill] sm:$0xff]  ;;  %v9321_v3 = vpop.permute.xlu1 %2229 }
 0x28a   : > { %5125 = vrcp.f32 %v3169_v4  ;;  %v3168_v6 = vadd.f32 1.0, %v5114_v57  ;;  %v1554_v19 = vmul.f32 %v10564_v5, %v9244_v7  ;;  %v1555_v49 = vmul.f32 %v10144_v47, %v9244_v7  ;;  %v9323_v44 = vpop.f32.mrb[74].mxu1 }
 0x28b   : > { %v5116_v1 = vpop.eup %5115  ;;  %5127 = vrcp.f32 %v3166_v56  ;;  %v1684_v10 = vadd.f32 %v1556_v63, %v1005_v12  ;;  %v1262_v51 = vadd.f32 %v10586_v9, %v752_v26  ;;  %v1558_v13 = vmul.f32 %v10564_v5, %v1394_v38  ;;  %v3742_v26 = vpop.f32.mrb[75].mxu1 }
 0x28c   : > { %v5118_v31 = vpop.eup %5117  ;;  %v3547_v37 = vmul.f32 %v5116_v1, %v9181_v16  ;;  %5129 = vrcp.f32 %v3168_v6  ;;  %v1264_v4 = vadd.f32 %v10587_v27, %v753_v60  ;;  %v1559_v57 = vmul.f32 %v10144_v47, %v1394_v38  ;;  %v9332_v1 = vpop.f32.mrb[74].mxu0  ;;  %v10590_v26 = vld [vmem:[#allocation121_spill] sm:$0xff] }
 0x28d   : > { %v3549_v7 = vmul.f32 %v5118_v31, %v9185_v53  ;;  %v1685_v56 = vadd.f32 %v1557_v25, %v1007_v32  ;;  %v1976_v12 = vmul.f32 %v10414_v62, %v1814_v35  ;;  %v1977_v63 = vmul.f32 %v10415_v8, %v1814_v35  ;;  %v3967_v31 = vpop.f32.mrb[75].mxu0 }
 0x28e   : > { %3833 = vmatprep.mubr.f32.mxu1 %v3547_v37  ;;  %v9330_v16 = vadd.f32 %v9276_v50, %v9270_v22  ;;  %v1680_v60 = vadd.f32 %v1552_v42, %v999_v30  ;;  %v1681_v6 = vadd.f32 %v1553_v45, %v1001_v39  ;;  %v1682_v38 = vadd.f32 %v1554_v19, %v1256_v29 }
 0x28f   : > { %v5120_v9 = vpop.eup %5119  ;;  %4058 = vmatprep.mubr.f32.mxu0 %v3549_v7  ;;  %v1683_v27 = vadd.f32 %v1555_v49, %v1258_v20  ;;  %v1686_v53 = vadd.f32 %v1558_v13, %v1262_v51  ;;  %v1978_v32 = vmul.f32 %v10416_v23, %v1814_v35  ;;  %v9337_v25 = vadd.f32 %v10153_v59, %v9169_v18  ;;  %v590_v49 = vpop.permute.xlu1 %589 }
 0x290   : > { %v3546_v22 = vmul.f32 %v5120_v9, %v9189_v54  ;;  %v1687_v50 = vadd.f32 %v1559_v57, %v1264_v4  ;;  %v1979_v30 = vmul.f32 %v10118_v43, %v1814_v35  ;;  %v9343_v29 = vadd.f32 %v10154_v58, %v9192_v41  ;;  %v10589_v57 = vld [vmem:[#allocation145_spill] sm:$0xff] }
 0x291   : > { %v9345_v42 = vadd.f32 %v1976_v12, %v1684_v10  ;;  %v9347_v51 = vadd.f32 %v1977_v63, %v1685_v56  ;;  %v4333_v39 = vmul.f32 -1.442695, %v9337_v25  ;;  %v9352_v18 = vadd.f32 %v10182_v46, %v9163_v15  ;;  %v10588_v10 = vld [vmem:[#allocation122_spill] sm:$0xff]  ;;  %v9375_v12 = vld [vmem:[%s9715_s6] ss:$0 sm:$0xff] }
 0x292   : > { %v5122_v45 = vpop.eup %5121  ;;  %3834 = vmatmul.mubr.f32.gmra.mrb[112].mxu1 %v3546_v22  ;;  %v1972_v54 = vmul.f32 %v10414_v62, %v9301_v40  ;;  %v1973_v19 = vmul.f32 %v10415_v8, %v9301_v40  ;;  %v4335_v41 = vmul.f32 -1.442695, %v9343_v29  ;;  %v9361_v20 = vadd.f32 %v10190_v21, %v9177_v48 }
 0x293   : > { %v5124_v35 = vpop.eup %5123  ;;  %v3548_v15 = vmul.f32 %v5122_v45, %v10588_v10  ;;  %v1974_v13 = vmul.f32 %v10416_v23, %v9301_v40  ;;  %5131 = vpow2.f32 %v4333_v39  ;;  %v4332_v37 = vmul.f32 -1.442695, %v9352_v18 }
 0x294   : > { %v5126_v4 = vpop.eup %5125  ;;  %v3551_v7 = vmul.f32 %v5124_v35, %v10589_v57  ;;  %v9369_v56 = vadd.f32 %v1978_v32, %v1686_v53  ;;  %5133 = vpow2.f32 %v4335_v41  ;;  %v4334_v48 = vmul.f32 -1.442695, %v9361_v20  ;;  %v10591_v32 = vld [vmem:[#allocation124_spill] sm:$0xff]  ;;  %v10592_v35 = vld [vmem:[#allocation125_spill] sm:$0xff] }
 0x295   : > { %v5128_v63 = vpop.eup %5127  ;;  %4059 = vmatmul.mubr.f32.gmra.mrb[112].mxu0 %v3548_v15  ;;  %v3553_v9 = vmul.f32 %v5126_v4, %v10590_v26  ;;  %v9378_v31 = vadd.f32 %v1979_v30, %v1687_v50  ;;  %v1975_v22 = vmul.f32 %v10118_v43, %v9301_v40  ;;  %5135 = vpow2.f32 %v4332_v37  ;;  %v10593_v30 = vld [vmem:[#allocation140_spill] sm:$0xff]  ;;  %v10596_v57 = vld [vmem:[#allocation77_spill] sm:$0xff] }
 0x296   : > { %v5130_v53 = vpop.eup %5129  ;;  %3838 = vmatprep.mubr.f32.mxu1 %v3551_v7  ;;  %v3550_v39 = vmul.f32 %v5128_v63, %v10591_v32  ;;  %v2100_v45 = vadd.f32 %v1972_v54, %v1680_v60  ;;  %v2101_v41 = vadd.f32 %v1973_v19, %v1681_v6  ;;  %5137 = vpow2.f32 %v4334_v48  ;;  %v10594_v60 = vld [vmem:[#allocation73_spill] sm:$0xff]  ;;  %v10595_v54 = vld [vmem:[#allocation150_spill] sm:$0xff] }
 0x297   : > { %4063 = vmatprep.mubr.f32.mxu0 %v3553_v9  ;;  %v3552_v10 = vmul.f32 %v5130_v53, %v10592_v35  ;;  %v9386_v15 = vadd.f32 %v1974_v13, %v1682_v38  ;;  %v2392_v50 = vmul.f32 %v6262_v14, %v9321_v3  ;;  %v3716_v40 = vadd.f32 %v9375_v12, %v10593_v30  ;;  %v1398_v38 = vpop.permute.xlu1 %1397  ;;  %v10597_v9 = vld [vmem:[#allocation143_spill] sm:$0xff]  ;;  %v10598_v32 = vld [vmem:[#allocation146_spill] sm:$0xff]  ;;  %v9409_v35 = vpop.f32.mrb[76].mxu1 }
 0x298   : > { %3839 = vmatmul.mubr.f32.gmra.mrb[114].mxu1 %v3550_v39  ;;  %v2393_v37 = vmul.f32 %v10364_v55, %v9321_v3  ;;  %v754_v4 = vmul.f32 %v10292_v34, %v590_v49  ;;  %v3721_v6 = vadd.f32 %v9375_v12, %v10594_v60  ;;  %v3726_v19 = vadd.f32 %v9375_v12, %v10595_v54 }
 0x299   : > { %4064 = vmatmul.mubr.f32.gmra.mrb[114].mxu0 %v3552_v10  ;;  %v9399_v13 = vadd.f32 %v1975_v22, %v1683_v27  ;;  %v3941_v7 = vadd.f32 %v10596_v57, %v3716_v40  ;;  %v755_v48 = vmul.f32 %v10503_v24, %v590_v49  ;;  %v756_v63 = vmul.f32 %v10299_v61, %v590_v49  ;;  %v3747_v24 = vpop.f32.mrb[77].mxu1  ;;  %v10599_v10 = vld [vmem:[#allocation30_spill] sm:$0xff]  ;;  %v10600_v40 = vld [vmem:[#allocation35_spill] sm:$0xff] }
 0x29a   : > { %v2394_v26 = vmul.f32 %v6268_v0, %v9321_v3  ;;  %v757_v34 = vmul.f32 %v10262_v2, %v590_v49  ;;  %v3946_v53 = vadd.f32 %v10597_v9, %v3721_v6  ;;  %v3951_v39 = vadd.f32 %v10598_v32, %v3726_v19  ;;  %v10602_v19 = vld [vmem:[#allocation37_spill] sm:$0xff] }
 0x29b   : > { %v2395_v27 = vmul.f32 %v10269_v36, %v9321_v3  ;;  %v9413_v22 = vadd.f32 %v2392_v50, %v2100_v45  ;;  %4099 = vst [vmem:[%s9415_s23] sm:$0xff] %v3941_v7  ;;  %v1560_v61 = vmul.f32 %v10508_v11, %v1398_v38  ;;  %v9421_v2 = vadd.f32 %v10153_v59, %v9255_v28  ;;  %v9433_v50 = vpop.f32.mrb[76].mxu0  ;;  %v10601_v28 = vld [vmem:[#allocation34_spill] sm:$0xff]  ;;  %v10603_v7 = vld [vmem:[#allocation149_spill] sm:$0xff] }
 0x29c   : > { %v9423_v49 = vadd.f32 %v2393_v37, %v2101_v41  ;;  %v1011_v30 = vadd.f32 %v10599_v10, %v754_v4  ;;  %4100 = vst [vmem:[%s9415_s23 + $0x8] sm:$0xff] %v3946_v53  ;;  %4101 = vst [vmem:[%s9415_s23 + $0x10] sm:$0xff] %v3951_v39  ;;  %v1561_v3 = vmul.f32 %v10513_v17, %v1398_v38  ;;  %v3972_v4 = vpop.f32.mrb[77].mxu0 }
 0x29d   : > { %v9431_v45 = vadd.f32 %v10154_v58, %v9265_v33  ;;  %v5132_v11 = vpop.eup %5131  ;;  %v1013_v60 = vadd.f32 %v10600_v40, %v755_v48  ;;  %v1268_v6 = vadd.f32 %v10601_v28, %v756_v63  ;;  %v4337_v41 = vmul.f32 -1.442695, %v9421_v2  ;;  %v1818_v48 = vpop.permute.xlu0 %1817 }
 0x29e   : > { %v9440_v37 = vadd.f32 %v10182_v46, %v9252_v52  ;;  %v5134_v54 = vpop.eup %5133  ;;  %v3171_v17 = vadd.f32 1.0, %v5132_v11  ;;  %v1270_v57 = vadd.f32 %v10602_v19, %v757_v34  ;;  %v1562_v33 = vmul.f32 %v10564_v5, %v1398_v38  ;;  %v3750_v34 = vpop.f32.mrb[78].mxu1 }
 0x29f   : > { %v9446_v9 = vadd.f32 %v10190_v21, %v10603_v7  ;;  %v5136_v53 = vpop.eup %5135  ;;  %v3173_v63 = vadd.f32 1.0, %v5134_v54  ;;  %v1563_v32 = vmul.f32 %v10144_v47, %v1398_v38  ;;  %5139 = vpow2.f32 %v4337_v41  ;;  %v9452_v4 = vpop.f32.mrb[78].mxu0  ;;  %v10605_v7 = vld [vmem:[#allocation158_spill] sm:$0xff] }
 0x2a0   : > { %v1688_v39 = vadd.f32 %v1560_v61, %v1011_v30  ;;  %v5138_v52 = vpop.eup %5137  ;;  %5141 = vrcp.f32 %v3171_v17  ;;  %v3170_v24 = vadd.f32 1.0, %v5136_v53  ;;  %v4339_v10 = vmul.f32 -1.442695, %v9431_v45  ;;  %v3752_v54 = vpop.f32.mrb[79].mxu1  ;;  %v10604_v61 = vld [vmem:[#allocation71_spill] sm:$0xff] }
 0x2a1   : > { %v1689_v11 = vadd.f32 %v1561_v3, %v1013_v60  ;;  %5143 = vrcp.f32 %v3173_v63  ;;  %v3172_v5 = vadd.f32 1.0, %v5138_v52  ;;  %v4336_v40 = vmul.f32 -1.442695, %v9440_v37  ;;  %v2234_v41 = vpop.permute.xlu1 %2233  ;;  %v3977_v3 = vpop.f32.mrb[79].mxu0  ;;  %v10606_v63 = vld [vmem:[#allocation161_spill] sm:$0xff] }
 0x2a2   : > { %v1980_v28 = vmul.f32 %v10414_v62, %v1818_v48  ;;  %5145 = vrcp.f32 %v3170_v24  ;;  %v4338_v47 = vmul.f32 -1.442695, %v9446_v9  ;;  %v1690_v38 = vadd.f32 %v1562_v33, %v1268_v6 }
 0x2a3   : > { %v3731_v30 = vadd.f32 %v9375_v12, %v10604_v61  ;;  %5147 = vrcp.f32 %v3172_v5  ;;  %v1691_v60 = vadd.f32 %v1563_v32, %v1270_v57  ;;  %v1981_v17 = vmul.f32 %v10415_v8, %v1818_v48 }
 0x2a4   : > { %v1982_v19 = vmul.f32 %v10416_v23, %v1818_v48  ;;  %5149 = vpow2.f32 %v4339_v10  ;;  %v1983_v62 = vmul.f32 %v10118_v43, %v1818_v48  ;;  %v3736_v6 = vadd.f32 %v9375_v12, %v10606_v63  ;;  %v10607_v23 = vld [vmem:[#allocation147_spill] sm:$0xff]  ;;  %v10608_v48 = vld [vmem:[#allocation41_spill] sm:$0xff] }
 0x2a5   : > { %v3956_v53 = vadd.f32 %v10605_v7, %v3731_v30  ;;  %v9464_v33 = vadd.f32 %v2394_v26, %v9386_v15  ;;  %v2523_v52 = vadd.f32 %v2395_v27, %v9399_v13  ;;  %5151 = vpow2.f32 %v4336_v40  ;;  %v10609_v13 = vld [vmem:[#allocation144_spill] sm:$0xff]  ;;  %v10610_v27 = vld [vmem:[#allocation38_spill] sm:$0xff] }
 0x2a6   : > { %v9467_v57 = vadd.f32 %v1980_v28, %v1688_v39  ;;  %5153 = vpow2.f32 %v4338_v47  ;;  %v2397_v8 = vmul.f32 %v10364_v55, %v2234_v41  ;;  %v9473_v43 = vadd.f32 %v10153_v59, %v10607_v23  ;;  %v9497_v28 = vpop.permute.xlu1 %2237 }
 0x2a7   : > { %4102 = vst [vmem:[%s9415_s23 + $0x18] sm:$0xff] %v3956_v53  ;;  %v3961_v32 = vadd.f32 %v10608_v48, %v3736_v6  ;;  %v9476_v24 = vadd.f32 %v1981_v17, %v1689_v11  ;;  %v9480_v15 = vadd.f32 %v10154_v58, %v9330_v16  ;;  %v9484_v26 = vadd.f32 %v10182_v46, %v10609_v13 }
 0x2a8   : > { %v9488_v39 = vadd.f32 %v10190_v21, %v10610_v27  ;;  %v9490_v10 = vadd.f32 %v1982_v19, %v1690_v38  ;;  %v9492_v5 = vadd.f32 %v1983_v62, %v1691_v60  ;;  %v2396_v40 = vmul.f32 %v6262_v14, %v2234_v41  ;;  %v3755_v19 = vpop.f32.mrb[80].mxu1 }
 0x2a9   : > { %v4341_v11 = vmul.f32 -1.442695, %v9473_v43  ;;  %4103 = vst [vmem:[%s9415_s23 + $0x20] sm:$0xff] %v3961_v32  ;;  %v5140_v16 = vpop.eup %5139  ;;  %v2398_v54 = vmul.f32 %v6268_v0, %v2234_v41  ;;  %v2399_v47 = vmul.f32 %v10269_v36, %v2234_v41  ;;  %v4343_v61 = vmul.f32 -1.442695, %v9480_v15  ;;  %v3757_v63 = vpop.f32.mrb[81].mxu1 }
 0x2aa   : > { %v4340_v30 = vmul.f32 -1.442695, %v9484_v26  ;;  %v5142_v38 = vpop.eup %5141  ;;  %v3175_v3 = vadd.f32 1.0, %v5140_v16  ;;  %v9504_v60 = vadd.f32 %v2397_v8, %v9347_v51  ;;  %v4342_v17 = vmul.f32 -1.442695, %v9488_v39 }
 0x2ab   : > { %5155 = vpow2.f32 %v4341_v11  ;;  %v5144_v62 = vpop.eup %5143  ;;  %v3555_v7 = vmul.f32 %v5142_v38, %v9337_v25  ;;  %v2401_v41 = vmul.f32 %v10364_v55, %v9497_v28  ;;  %v3741_v53 = vadd.f32 %v9375_v12, %v9323_v44 }
 0x2ac   : > { %5157 = vpow2.f32 %v4343_v61  ;;  %v5146_v6 = vpop.eup %5145  ;;  %v3557_v23 = vmul.f32 %v5144_v62, %v9343_v29  ;;  %v3746_v51 = vadd.f32 %v9375_v12, %v9409_v35  ;;  %v3751_v8 = vadd.f32 %v9375_v12, %v3750_v34 }
 0x2ad   : > { %5159 = vrcp.f32 %v3175_v3  ;;  %v5148_v48 = vpop.eup %5147  ;;  %3843 = vmatprep.mubr.f32.mxu1 %v3555_v7  ;;  %v3554_v25 = vmul.f32 %v5146_v6, %v9352_v18  ;;  %v3966_v55 = vadd.f32 %v9332_v1, %v3741_v53  ;;  %v3756_v44 = vadd.f32 %v9375_v12, %v3755_v19  ;;  %v3980_v18 = vpop.f32.mrb[80].mxu0 }
 0x2ae   : > { %5161 = vpow2.f32 %v4340_v30  ;;  %v5150_v32 = vpop.eup %5149  ;;  %4068 = vmatprep.mubr.f32.mxu0 %v3557_v23  ;;  %v3556_v29 = vmul.f32 %v5148_v48, %v9361_v20  ;;  %v3971_v35 = vadd.f32 %v9433_v50, %v3746_v51  ;;  %v3976_v34 = vadd.f32 %v9452_v4, %v3751_v8  ;;  %v3982_v30 = vpop.f32.mrb[81].mxu0 }
 0x2af   : > { %5163 = vpow2.f32 %v4342_v17  ;;  %v5152_v13 = vpop.eup %5151  ;;  %3844 = vmatmul.mubr.f32.gmra.mrb[116].mxu1 %v3554_v25  ;;  %v3177_v27 = vadd.f32 1.0, %v5150_v32  ;;  %4104 = vst [vmem:[%s9415_s23 + $0x28] sm:$0xff] %v3966_v55  ;;  %v9525_v1 = vadd.f32 %v10153_v59, %v9423_v49  ;;  %v9528_v11 = vadd.f32 %v10154_v58, %v2523_v52 }
 0x2b0   : > { %v9532_v20 = vadd.f32 %v10182_v46, %v9413_v22  ;;  %v5154_v16 = vpop.eup %5153  ;;  %4069 = vmatmul.mubr.f32.gmra.mrb[116].mxu0 %v3556_v29  ;;  %v3174_v50 = vadd.f32 1.0, %v5152_v13  ;;  %v2527_v4 = vadd.f32 %v2399_v47, %v9378_v31  ;;  %4105 = vst [vmem:[%s9415_s23 + $0x30] sm:$0xff] %v3971_v35  ;;  %4106 = vst [vmem:[%s9415_s23 + $0x38] sm:$0xff] %v3976_v34  ;;  %v3760_v47 = vpop.f32.mrb[82].mxu1 }
 0x2b1   : > { %v3981_v61 = vadd.f32 %v3980_v18, %v3756_v44  ;;  %v9539_v49 = vadd.f32 %v10190_v21, %v9464_v33  ;;  %5165 = vrcp.f32 %v3177_v27  ;;  %v3176_v52 = vadd.f32 1.0, %v5154_v16  ;;  %v3762_v7 = vpop.f32.mrb[83].mxu1 }
 0x2b2   : > { %v4345_v38 = vmul.f32 -1.442695, %v9525_v1  ;;  %v4347_v22 = vmul.f32 -1.442695, %v9528_v11  ;;  %5167 = vrcp.f32 %v3174_v50  ;;  %v2524_v3 = vadd.f32 %v2396_v40, %v9345_v42 }
 0x2b3   : > { %v2526_v17 = vadd.f32 %v2398_v54, %v9369_v56  ;;  %4107 = vst [vmem:[%s9415_s23 + $0x40] sm:$0xff] %v3981_v61  ;;  %v4344_v31 = vmul.f32 -1.442695, %v9532_v20  ;;  %5169 = vrcp.f32 %v3176_v52  ;;  %v2400_v33 = vmul.f32 %v6262_v14, %v9497_v28  ;;  %v3985_v56 = vpop.f32.mrb[82].mxu0 }
 0x2b4   : > { %v2529_v19 = vadd.f32 %v2401_v41, %v9476_v24  ;;  %v3761_v62 = vadd.f32 %v9375_v12, %v3760_v47  ;;  %v2403_v63 = vmul.f32 %v10269_v36, %v9497_v28  ;;  %5171 = vpow2.f32 %v4345_v38  ;;  %v3987_v41 = vpop.f32.mrb[83].mxu0 }
 0x2b5   : > { %v5156_v53 = vpop.eup %5155  ;;  %v4346_v42 = vmul.f32 -1.442695, %v9539_v49  ;;  %v9556_v40 = vadd.f32 %v10153_v59, %v9504_v60  ;;  %5173 = vpow2.f32 %v4347_v22  ;;  %v9559_v6 = vadd.f32 %v10154_v58, %v2527_v4 }
 0x2b6   : > { %v5158_v54 = vpop.eup %5157  ;;  %v3179_v14 = vadd.f32 1.0, %v5156_v53  ;;  %v3986_v24 = vadd.f32 %v3985_v56, %v3761_v62  ;;  %v2402_v36 = vmul.f32 %v6268_v0, %v9497_v28  ;;  %5175 = vpow2.f32 %v4344_v31 }
 0x2b7   : > { %v5160_v23 = vpop.eup %5159  ;;  %v3181_v51 = vadd.f32 1.0, %v5158_v54  ;;  %v9564_v8 = vadd.f32 %v10182_v46, %v2524_v3  ;;  %v9569_v25 = vadd.f32 %v10190_v21, %v2526_v17  ;;  %v9572_v55 = vadd.f32 %v10153_v59, %v2529_v19 }
 0x2b8   : > { %v5162_v48 = vpop.eup %5161  ;;  %v3559_v60 = vmul.f32 %v5160_v23, %v9421_v2  ;;  %5177 = vrcp.f32 %v3179_v14  ;;  %4108 = vst [vmem:[%s9415_s23 + $0x48] sm:$0xff] %v3986_v24  ;;  %v2531_v0 = vadd.f32 %v2403_v63, %v9492_v5  ;;  %v4349_v28 = vmul.f32 -1.442695, %v9556_v40  ;;  %v3765_v2 = vpop.f32.mrb[84].mxu1 }
 0x2b9   : > { %v5164_v44 = vpop.eup %5163  ;;  %5179 = vrcp.f32 %v3181_v51  ;;  %v3178_v32 = vadd.f32 1.0, %v5162_v48  ;;  %v2528_v35 = vadd.f32 %v2400_v33, %v9467_v57  ;;  %v4351_v34 = vmul.f32 -1.442695, %v9559_v6  ;;  %v3990_v59 = vpop.f32.mrb[84].mxu0 }
 0x2ba   : > { %3848 = vmatprep.mubr.f32.mxu1 %v3559_v60  ;;  %v3180_v29 = vadd.f32 1.0, %v5164_v44  ;;  %5181 = vpow2.f32 %v4346_v42  ;;  %v3766_v13 = vadd.f32 %v9375_v12, %v3765_v2  ;;  %v3767_v27 = vpop.f32.mrb[85].mxu1  ;;  %v4348_v18 = vmul.f32 -1.442695, %v9564_v8  ;;  %v3992_v50 = vpop.f32.mrb[85].mxu0 }
 0x2bb   : > { %5183 = vrcp.f32 %v3178_v32  ;;  %v5166_v16 = vpop.eup %5165  ;;  %v2530_v5 = vadd.f32 %v2402_v36, %v9490_v10  ;;  %v4350_v4 = vmul.f32 -1.442695, %v9569_v25  ;;  %v4353_v57 = vmul.f32 -1.442695, %v9572_v55 }
 0x2bc   : > { %5185 = vrcp.f32 %v3180_v29  ;;  %v5168_v61 = vpop.eup %5167  ;;  %v3561_v30 = vmul.f32 %v5166_v16, %v9431_v45  ;;  %v3991_v52 = vadd.f32 %v3990_v59, %v3766_v13  ;;  %v9585_v38 = vadd.f32 %v10154_v58, %v2531_v0 }
 0x2bd   : > { %5187 = vpow2.f32 %v4349_v28  ;;  %v5170_v22 = vpop.eup %5169  ;;  %v3558_v3 = vmul.f32 %v5168_v61, %v9440_v37  ;;  %v9589_v10 = vadd.f32 %v10182_v46, %v2528_v35  ;;  %v9594_v58 = vadd.f32 %v10190_v21, %v2530_v5 }
 0x2be   : > { %5189 = vpow2.f32 %v4351_v34  ;;  %v5172_v17 = vpop.eup %5171  ;;  %4073 = vmatprep.mubr.f32.mxu0 %v3561_v30  ;;  %v3560_v31 = vmul.f32 %v5170_v22, %v9446_v9  ;;  %4109 = vst [vmem:[%s9415_s23 + $0x50] sm:$0xff] %v3991_v52  ;;  %v4355_v46 = vmul.f32 -1.442695, %v9585_v38 }
 0x2bf   : > { %5191 = vpow2.f32 %v4348_v18  ;;  %v5174_v47 = vpop.eup %5173  ;;  %3849 = vmatmul.mubr.f32.gmra.mrb[118].mxu1 %v3558_v3  ;;  %v3183_v45 = vadd.f32 1.0, %v5172_v17  ;;  %v4352_v9 = vmul.f32 -1.442695, %v9589_v10  ;;  %v4354_v21 = vmul.f32 -1.442695, %v9594_v58 }
 0x2c0   : > { %5193 = vpow2.f32 %v4350_v4  ;;  %v5176_v33 = vpop.eup %5175  ;;  %4074 = vmatmul.mubr.f32.gmra.mrb[118].mxu0 %v3560_v31  ;;  %v3185_v37 = vadd.f32 1.0, %v5174_v47 }
 0x2c1   : > { %5195 = vpow2.f32 %v4353_v57  ;;  %v3182_v62 = vadd.f32 1.0, %v5176_v33 }
 0x2c2   : > { %v5178_v19 = vpop.eup %5177  ;;  %5197 = vrcp.f32 %v3183_v45  ;;  %v3770_v14 = vpop.f32.mrb[86].mxu1 }
 0x2c3   : > { %v5180_v7 = vpop.eup %5179  ;;  %v3563_v53 = vmul.f32 %v5178_v19, %v9473_v43  ;;  %5199 = vrcp.f32 %v3185_v37  ;;  %v3771_v23 = vadd.f32 %v9375_v12, %v3770_v14  ;;  %v3772_v51 = vpop.f32.mrb[87].mxu1 }
 0x2c4   : > { %v5182_v63 = vpop.eup %5181  ;;  %v3565_v42 = vmul.f32 %v5180_v7, %v9480_v15  ;;  %5201 = vrcp.f32 %v3182_v62 }
 0x2c5   : > { %v5184_v56 = vpop.eup %5183  ;;  %3853 = vmatprep.mubr.f32.mxu1 %v3563_v53  ;;  %v3184_v54 = vadd.f32 1.0, %v5182_v63  ;;  %5203 = vpow2.f32 %v4355_v46 }
 0x2c6   : > { %v5186_v24 = vpop.eup %5185  ;;  %4078 = vmatprep.mubr.f32.mxu0 %v3565_v42  ;;  %v3562_v41 = vmul.f32 %v5184_v56, %v9484_v26  ;;  %5205 = vpow2.f32 %v4352_v9  ;;  %v3995_v44 = vpop.f32.mrb[86].mxu0 }
 0x2c7   : > { %v5188_v43 = vpop.eup %5187  ;;  %v3564_v36 = vmul.f32 %v5186_v24, %v9488_v39  ;;  %5207 = vrcp.f32 %v3184_v54  ;;  %v3996_v28 = vadd.f32 %v3995_v44, %v3771_v23  ;;  %v3997_v26 = vpop.f32.mrb[87].mxu0 }
 0x2c8   : > { %v5190_v15 = vpop.eup %5189  ;;  %3854 = vmatmul.mubr.f32.gmra.mrb[120].mxu1 %v3562_v41  ;;  %v3187_v48 = vadd.f32 1.0, %v5188_v43  ;;  %5209 = vpow2.f32 %v4354_v21 }
 0x2c9   : > { %v5192_v60 = vpop.eup %5191  ;;  %4079 = vmatmul.mubr.f32.gmra.mrb[120].mxu0 %v3564_v36  ;;  %v3189_v32 = vadd.f32 1.0, %v5190_v15  ;;  %4110 = vst [vmem:[%s9415_s23 + $0x58] sm:$0xff] %v3996_v28 }
 0x2ca   : > { %v5194_v0 = vpop.eup %5193  ;;  %5211 = vrcp.f32 %v3187_v48  ;;  %v3186_v29 = vadd.f32 1.0, %v5192_v60  ;;  %v3775_v27 = vpop.f32.mrb[88].mxu1 }
 0x2cb   : > { %v5196_v35 = vpop.eup %5195  ;;  %5213 = vrcp.f32 %v3189_v32  ;;  %v3188_v2 = vadd.f32 1.0, %v5194_v0  ;;  %v3776_v5 = vadd.f32 %v9375_v12, %v3775_v27  ;;  %v3777_v50 = vpop.f32.mrb[89].mxu1 }
 0x2cc   : > { %v5198_v34 = vpop.eup %5197  ;;  %5215 = vrcp.f32 %v3186_v29  ;;  %v3191_v39 = vadd.f32 1.0, %v5196_v35  ;;  %v4000_v61 = vpop.f32.mrb[88].mxu0 }
 0x2cd   : > { %v5200_v13 = vpop.eup %5199  ;;  %v3567_v59 = vmul.f32 %v5198_v34, %v9525_v1  ;;  %5217 = vrcp.f32 %v3188_v2  ;;  %v4001_v52 = vadd.f32 %v4000_v61, %v3776_v5  ;;  %v4002_v22 = vpop.f32.mrb[89].mxu0 }
 0x2ce   : > { %v5202_v18 = vpop.eup %5201  ;;  %v3569_v16 = vmul.f32 %v5200_v13, %v9528_v11  ;;  %5219 = vrcp.f32 %v3191_v39 }
 0x2cf   : > { %v5204_v4 = vpop.eup %5203  ;;  %3858 = vmatprep.mubr.f32.mxu1 %v3567_v59  ;;  %v3566_v57 = vmul.f32 %v5202_v18, %v9532_v20  ;;  %4111 = vst [vmem:[%s9415_s23 + $0x60] sm:$0xff] %v4001_v52 }
 0x2d0   : > { %v5206_v30 = vpop.eup %5205  ;;  %4083 = vmatprep.mubr.f32.mxu0 %v3569_v16  ;;  %v3193_v1 = vadd.f32 1.0, %v5204_v4 }
 0x2d1   : > { %v5208_v3 = vpop.eup %5207  ;;  %3859 = vmatmul.mubr.f32.gmra.mrb[122].mxu1 %v3566_v57  ;;  %v3190_v17 = vadd.f32 1.0, %v5206_v30 }
 0x2d2   : > { %v5210_v31 = vpop.eup %5209  ;;  %v3568_v11 = vmul.f32 %v5208_v3, %v9539_v49  ;;  %5221 = vrcp.f32 %v3193_v1 }
 0x2d3   : > { %5223 = vrcp.f32 %v3190_v17  ;;  %v3192_v47 = vadd.f32 1.0, %v5210_v31 }
 0x2d4   : > { %v5212_v45 = vpop.eup %5211  ;;  %4084 = vmatmul.mubr.f32.gmra.mrb[122].mxu0 %v3568_v11 }
 0x2d5   : > { %v5214_v33 = vpop.eup %5213  ;;  %v3571_v20 = vmul.f32 %v5212_v45, %v9556_v40  ;;  %5225 = vrcp.f32 %v3192_v47 }
 0x2d6   : > { %v5216_v37 = vpop.eup %5215  ;;  %v3573_v46 = vmul.f32 %v5214_v33, %v9559_v6 }
 0x2d7   : > { %v5218_v19 = vpop.eup %5217  ;;  %3863 = vmatprep.mubr.f32.mxu1 %v3571_v20  ;;  %v3570_v62 = vmul.f32 %v5216_v37, %v9564_v8 }
 0x2d8   : > { %v5220_v9 = vpop.eup %5219  ;;  %4088 = vmatprep.mubr.f32.mxu0 %v3573_v46  ;;  %v3572_v49 = vmul.f32 %v5218_v19, %v9569_v25  ;;  %v3780_v53 = vpop.f32.mrb[90].mxu1 }
 0x2d9   : > { %3864 = vmatmul.mubr.f32.gmra.mrb[124].mxu1 %v3570_v62  ;;  %v3575_v7 = vmul.f32 %v5220_v9, %v9572_v55  ;;  %v3781_v63 = vadd.f32 %v9375_v12, %v3780_v53  ;;  %v3782_v42 = vpop.f32.mrb[91].mxu1 }
 0x2da   : > { %4089 = vmatmul.mubr.f32.gmra.mrb[124].mxu0 %v3572_v49  ;;  %v4005_v21 = vpop.f32.mrb[90].mxu0 }
 0x2db   : > { %3868 = vmatprep.mubr.f32.mxu1 %v3575_v7  ;;  %v4006_v8 = vadd.f32 %v4005_v21, %v3781_v63  ;;  %v4007_v54 = vpop.f32.mrb[91].mxu0 }
 0x2dc   : > { %v5222_v40 = vpop.eup %5221 }
 0x2dd   : > { %v5224_v6 = vpop.eup %5223  ;;  %v3577_v56 = vmul.f32 %v5222_v40, %v9585_v38  ;;  %4112 = vst [vmem:[%s9415_s23 + $0x68] sm:$0xff] %v4006_v8  ;;  %v3785_v24 = vpop.f32.mrb[92].mxu1 }
 0x2de   : > { %v3574_v25 = vmul.f32 %v5224_v6, %v9589_v10  ;;  %v3786_v41 = vadd.f32 %v9375_v12, %v3785_v24  ;;  %v4010_v23 = vpop.f32.mrb[92].mxu0  ;;  %v3787_v51 = vpop.f32.mrb[93].mxu1 }
 0x2df   : > { %v5226_v14 = vpop.eup %5225  ;;  %4093 = vmatprep.mubr.f32.mxu0 %v3577_v56  ;;  %v4012_v43 = vpop.f32.mrb[93].mxu0 }
 0x2e0   : > { %3869 = vmatmul.mubr.f32.gmra.mrb[126].mxu1 %v3574_v25  ;;  %v3576_v55 = vmul.f32 %v5226_v14, %v9594_v58  ;;  %v4011_v38 = vadd.f32 %v4010_v23, %v3786_v41 }
 0x2e2   : > { %4094 = vmatmul.mubr.f32.gmra.mrb[126].mxu0 %v3576_v55  ;;  %4113 = vst [vmem:[%s9415_s23 + $0x70] sm:$0xff] %v4011_v38 }
 0x2e3   : > { %v3790_v36 = vpop.f32.mrb[94].mxu1 }
 0x2e4   : > { %v3791_v10 = vadd.f32 %v9375_v12, %v3790_v36  ;;  %v4015_v15 = vpop.f32.mrb[94].mxu0  ;;  %v3792_v48 = vpop.f32.mrb[95].mxu1 }
 0x2e5   : > { %v4017_v60 = vpop.f32.mrb[95].mxu0 }
 0x2e6   : > { %v4016_v44 = vadd.f32 %v4015_v15, %v3791_v10 }
 0x2e8   : > { %4114 = vst [vmem:[%s9415_s23 + $0x78] sm:$0xff] %v4016_v44 }
 0x2f2   : > { %v3795_v58 = vpop.f32.mrb[96].mxu1 }
 0x2f3   : > { %v3796_v32 = vadd.f32 %v9375_v12, %v3795_v58  ;;  %v4020_v0 = vpop.f32.mrb[96].mxu0  ;;  %v3797_v28 = vpop.f32.mrb[97].mxu1 }
 0x2f4   : > { %v4022_v26 = vpop.f32.mrb[97].mxu0 }
 0x2f5   : > { %v4021_v29 = vadd.f32 %v4020_v0, %v3796_v32 }
 0x2f7   : > { %4115 = vst [vmem:[%s9415_s23 + $0x80] sm:$0xff] %v4021_v29 }
 0x304   : > { %v3800_v35 = vpop.f32.mrb[98].mxu1 }
 0x305   : > { %v3801_v2 = vadd.f32 %v9375_v12, %v3800_v35  ;;  %v4025_v34 = vpop.f32.mrb[98].mxu0  ;;  %v3802_v39 = vpop.f32.mrb[99].mxu1 }
 0x306   : > { %v4027_v13 = vpop.f32.mrb[99].mxu0 }
 0x307   : > { %v4026_v59 = vadd.f32 %v4025_v34, %v3801_v2 }
 0x309   : > { %4116 = vst [vmem:[%s9415_s23 + $0x88] sm:$0xff] %v4026_v59 }
 0x30d   : > { %v3805_v27 = vpop.f32.mrb[100].mxu1 }
 0x30e   : > { %v3806_v18 = vadd.f32 %v9375_v12, %v3805_v27  ;;  %v4030_v16 = vpop.f32.mrb[100].mxu0  ;;  %v3807_v5 = vpop.f32.mrb[101].mxu1 }
 0x30f   : > { %v4032_v50 = vpop.f32.mrb[101].mxu0 }
 0x310   : > { %v4031_v4 = vadd.f32 %v4030_v16, %v3806_v18 }
 0x312   : > { %4117 = vst [vmem:[%s9415_s23 + $0x90] sm:$0xff] %v4031_v4 }
 0x31c   : > { %v3810_v57 = vpop.f32.mrb[102].mxu1 }
 0x31d   : > { %v3811_v61 = vadd.f32 %v9375_v12, %v3810_v57  ;;  %v4035_v30 = vpop.f32.mrb[102].mxu0  ;;  %v3812_v52 = vpop.f32.mrb[103].mxu1 }
 0x31e   : > { %v4037_v22 = vpop.f32.mrb[103].mxu0 }
 0x31f   : > { %v4036_v1 = vadd.f32 %v4035_v30, %v3811_v61 }
 0x321   : > { %4118 = vst [vmem:[%s9415_s23 + $0x98] sm:$0xff] %v4036_v1 }
 0x32e   : > { %v3815_v3 = vpop.f32.mrb[104].mxu1 }
 0x32f   : > { %v3816_v17 = vadd.f32 %v9375_v12, %v3815_v3  ;;  %v4040_v31 = vpop.f32.mrb[104].mxu0  ;;  %v3817_v11 = vpop.f32.mrb[105].mxu1 }
 0x330   : > { %v4042_v47 = vpop.f32.mrb[105].mxu0 }
 0x331   : > { %v4041_v45 = vadd.f32 %v4040_v31, %v3816_v17 }
 0x333   : > { %4119 = vst [vmem:[%s9415_s23 + $0xa0] sm:$0xff] %v4041_v45 }
 0x338   : > { %v3820_v33 = vpop.f32.mrb[106].mxu1 }
 0x339   : > { %v3822_v20 = vpop.f32.mrb[107].mxu1  ;;  %v3821_v37 = vadd.f32 %v9375_v12, %v3820_v33 }
 0x33d   : > { %v4045_v46 = vpop.f32.mrb[106].mxu0 }
 0x33e   : > { %v4046_v19 = vadd.f32 %v4045_v46, %v3821_v37  ;;  %v4047_v62 = vpop.f32.mrb[107].mxu0 }
 0x340   : > { %4120 = vst [vmem:[%s9415_s23 + $0xa8] sm:$0xff] %v4046_v19 }
 0x342   : > { %v3825_v9 = vpop.f32.mrb[108].mxu1 }
 0x343   : > { %v3826_v49 = vadd.f32 %v9375_v12, %v3825_v9  ;;  %v3827_v7 = vpop.f32.mrb[109].mxu1 }
 0x346   : > { %v4050_v53 = vpop.f32.mrb[108].mxu0 }
 0x347   : > { %v4051_v40 = vadd.f32 %v4050_v53, %v3826_v49  ;;  %v4052_v63 = vpop.f32.mrb[109].mxu0 }
 0x349   : > { %4121 = vst [vmem:[%s9415_s23 + $0xb0] sm:$0xff] %v4051_v40 }
 0x359   : > { %v3830_v42 = vpop.f32.mrb[110].mxu1 }
 0x35a   : > { %v3831_v6 = vadd.f32 %v9375_v12, %v3830_v42  ;;  %v4055_v21 = vpop.f32.mrb[110].mxu0  ;;  %v3832_v56 = vpop.f32.mrb[111].mxu1 }
 0x35b   : > { %v4057_v8 = vpop.f32.mrb[111].mxu0 }
 0x35c   : > { %v4056_v54 = vadd.f32 %v4055_v21, %v3831_v6 }
 0x35e   : > { %4122 = vst [vmem:[%s9415_s23 + $0xb8] sm:$0xff] %v4056_v54 }
 0x365   : > { %v3835_v25 = vpop.f32.mrb[112].mxu1 }
 0x366   : > { %v3836_v14 = vadd.f32 %v9375_v12, %v3835_v25  ;;  %v3837_v55 = vpop.f32.mrb[113].mxu1 }
 0x368   : > { %v4060_v24 = vpop.f32.mrb[112].mxu0 }
 0x369   : > { %v4061_v41 = vadd.f32 %v4060_v24, %v3836_v14  ;;  %v4062_v23 = vpop.f32.mrb[113].mxu0 }
 0x36b   : > { %4123 = vst [vmem:[%s9415_s23 + $0xc0] sm:$0xff] %v4061_v41  ;;  %v3840_v51 = vpop.f32.mrb[114].mxu1 }
 0x36c   : > { %v3841_v43 = vadd.f32 %v9375_v12, %v3840_v51  ;;  %v4065_v38 = vpop.f32.mrb[114].mxu0  ;;  %v3842_v36 = vpop.f32.mrb[115].mxu1 }
 0x36d   : > { %v4067_v10 = vpop.f32.mrb[115].mxu0 }
 0x36e   : > { %v4066_v15 = vadd.f32 %v4065_v38, %v3841_v43 }
 0x370   : > { %4124 = vst [vmem:[%s9415_s23 + $0xc8] sm:$0xff] %v4066_v15 }
 0x382   : > { %v3845_v48 = vpop.f32.mrb[116].mxu1 }
 0x383   : > { %v3846_v60 = vadd.f32 %v9375_v12, %v3845_v48  ;;  %v4070_v44 = vpop.f32.mrb[116].mxu0  ;;  %v3847_v58 = vpop.f32.mrb[117].mxu1 }
 0x384   : > { %v4072_v32 = vpop.f32.mrb[117].mxu0 }
 0x385   : > { %v4071_v0 = vadd.f32 %v4070_v44, %v3846_v60 }
 0x387   : > { %4125 = vst [vmem:[%s9415_s23 + $0xd0] sm:$0xff] %v4071_v0 }
 0x392   : > { %v3850_v28 = vpop.f32.mrb[118].mxu1 }
 0x393   : > { %v3851_v26 = vadd.f32 %v9375_v12, %v3850_v28  ;;  %v4075_v29 = vpop.f32.mrb[118].mxu0  ;;  %v3852_v35 = vpop.f32.mrb[119].mxu1 }
 0x394   : > { %v4077_v2 = vpop.f32.mrb[119].mxu0 }
 0x395   : > { %v4076_v34 = vadd.f32 %v4075_v29, %v3851_v26 }
 0x397   : > { %4126 = vst [vmem:[%s9415_s23 + $0xd8] sm:$0xff] %v4076_v34 }
 0x39b   : > { %v3855_v39 = vpop.f32.mrb[120].mxu1 }
 0x39c   : > { %v3856_v13 = vadd.f32 %v9375_v12, %v3855_v39  ;;  %v4080_v59 = vpop.f32.mrb[120].mxu0  ;;  %v3857_v27 = vpop.f32.mrb[121].mxu1 }
 0x39d   : > { %v4082_v18 = vpop.f32.mrb[121].mxu0 }
 0x39e   : > { %v4081_v16 = vadd.f32 %v4080_v59, %v3856_v13 }
 0x3a0   : > { %4127 = vst [vmem:[%s9415_s23 + $0xe0] sm:$0xff] %v4081_v16 }
 0x3a4   : > { %v3860_v5 = vpop.f32.mrb[122].mxu1 }
 0x3a5   : > { %v3861_v50 = vadd.f32 %v9375_v12, %v3860_v5  ;;  %v3862_v4 = vpop.f32.mrb[123].mxu1 }
 0x3a7   : > { %v4085_v57 = vpop.f32.mrb[122].mxu0 }
 0x3a8   : > { %v4086_v61 = vadd.f32 %v4085_v57, %v3861_v50  ;;  %v4087_v30 = vpop.f32.mrb[123].mxu0 }
 0x3aa   : > { %4128 = vst [vmem:[%s9415_s23 + $0xe8] sm:$0xff] %v4086_v61 }
 0x3ac   : > { %v3865_v52 = vpop.f32.mrb[124].mxu1 }
 0x3ad   : > { %v3866_v22 = vadd.f32 %v9375_v12, %v3865_v52  ;;  %v4090_v1 = vpop.f32.mrb[124].mxu0  ;;  %v3867_v3 = vpop.f32.mrb[125].mxu1 }
 0x3ae   : > { %v4092_v17 = vpop.f32.mrb[125].mxu0 }
 0x3af   : > { %v4091_v31 = vadd.f32 %v4090_v1, %v3866_v22 }
 0x3b1   : > { %4129 = vst [vmem:[%s9415_s23 + $0xf0] sm:$0xff] %v4091_v31 }
 0x3b3   : > { %v3870_v11 = vpop.f32.mrb[126].mxu1 }
 0x3b4   : > { %v3871_v47 = vadd.f32 %v9375_v12, %v3870_v11  ;;  %v3872_v45 = vpop.f32.mrb[127].mxu1 }
 0x3b5   : > { %v4095_v33 = vpop.f32.mrb[126].mxu0 }
 0x3b6   : > { %v4096_v20 = vadd.f32 %v4095_v33, %v3871_v47  ;;  %v4097_v37 = vpop.f32.mrb[127].mxu0 }
 0x3b8   : > { %4130 = vst [vmem:[%s9415_s23 + $0xf8] sm:$0xff] %v4096_v20 }
 0x3b9   : > { %5245 = shalt.err (!%p5242_p3)
}
 0x3ba   : > { %s5246_s15 = scalar_lea.hbm %s9661_s14, 4096  ;;  %s5250_s22 = scalar_lea.hbm %s9716_s7, 8192 }
 0x3bb   : > { %p5247_p4 = scmp.ne.s32.totalorder %s9661_s14, %s5246_s15  ;;  %p5251_p9 = scmp.lt.u32.totalorder %s9661_s14, %s9716_s7 }
 0x3bc   : > { %p5252_p10 = scmp.lt.u32.totalorder %s5250_s22, %s5246_s15  ;;  %p5254_p12 = scmp.lt.u32.totalorder %s5246_s15, %s9661_s14 }
 0x3bd   : > { %p5248_p7 = pnand %p5247_p4, %p5383_p5 }
 0x3be   : > { %p5253_p11 = por %p5252_p10, %p5251_p9 }
 0x3bf   : > { %p5249_p8 = pneg %p5248_p7 }
 0x3c0   : > { %p5255_p13 = por %p5254_p12, %p5253_p11 }
 0x3c2   : > { %p5256_p0 = pnand %p5255_p13, %p5249_p8 }
 0x3c4   : > { %5259 = shalt.err (!%p5256_p0)
}
 0x3c5   : > { %s5303_s13 = smov 128   ;;  %s5304_s18 = smov 8  }
 0x3c6   : > { %4587 = dma.vmem_to_hbm [thread:$0]  (%p5383_p5), %s9663_s8, 4096, %s9661_s14, %s9668_s28, %s5303_s13, %s5303_s13, %s5304_s18  }
 0x3c7 PF: > { %p4593_p1 = scmp.ge.s32.totalorder %s5294_s27, 2  ;;  %s4160_s21 = sand.u32 1, %s5282_s24  }
 0x3c8   : > { %s4161_s16 = scalar_lea.sflag [#allocation3], %s4160_s21 }
 0x3c9   : > { %p4590_p2 = pnand %p4593_p1, %p5387_p6 }
 0x3cb   : > { %5277 = dma.done.wait (!%p4590_p2), %s4161_s16, 4096  }
 0x3cc   : > { %5279 = vsyncadd (!%p4590_p2), %s4161_s16, 4294963200  ;;  %p17_p3 = scmp.ge.s32.totalorder %s5370_s30, 4   ;;  %s10611_s24 = smov %s5286_s25 }
 0x3cd   : > { %s10612_s25 = smov %s5290_s26  ;;  %s10613_s26 = smov %s5381_s10 }
 0x3ce   : > { %s10614_s27 = smov %s5370_s30  ;;  %19 = sbr.rel (!%p17_p3) target bundleno = 3 (0x3), region = 86 }
 0x3d5   :  { %4166 = vsyncpa [#allocation3], 1 }
 0x3d6   :  { %4168 = vsyncpa [#allocation3 + $0x1], 1 }

</bundles_post_ra>
